<compile_context>
chip_gen: v6e
topology: v6e:2x2x1
jax: 0.10.0
libtpu: 0.0.40
codegen_flags: <defaults>
</compile_context>

<pallas_src>
import functools

import jax
import jax.numpy as jnp
from jax.experimental import pallas as pl
from jax.experimental.pallas import tpu as pltpu

PRED_LEN = 6
N_EMBD = 128                      # head.transformer.embed_dims
QUERY_SIZE = 64
HIDDEN = QUERY_SIZE + 1 + 1       # 64 + light + cmd = 66
INPUT_SIZE = 2 + 2 + 2            # x + tp + x_last[:, t] = 6

STATE = 128                       # padded (lane-aligned) state width
SLAB = 128                        # per-gate slab width of the fused weight

LANE_LIGHT = QUERY_SIZE           # 64
LANE_CMD = QUERY_SIZE + 1         # 65
LANE_X = HIDDEN                   # 66, 67
LANE_XL = HIDDEN + 2              # 68, 69
LANE_TP = HIDDEN + 4              # 70, 71
LANE_ONE = HIDDEN + 6             # 72  (constant 1.0 -> carries the biases)

# Fused gate-weight slab order == consumption / MXU result-pop order.
SLAB_R, SLAB_GHN, SLAB_GIN, SLAB_Z = 0, 1, 2, 3


def _round_up(a, m):
    return ((a + m - 1) // m) * m


def _aug_layout(n_embd):
    """Column layout of the augmented per-batch input stream."""
    col_light = n_embd
    col_cmd = n_embd + 1
    col_tp = n_embd + 2           # 2 columns
    col_one = n_embd + 4
    col_xlast = n_embd + 5        # 2 * PRED_LEN columns
    aug_w = _round_up(col_xlast + 2 * PRED_LEN, 8)
    return col_light, col_cmd, col_tp, col_one, col_xlast, aug_w


# ----------------------------------------------------------------------------
# One-time (load-time) parameter packing.
# ----------------------------------------------------------------------------
def pack_wp_grurefine_params(params):
    f32 = jnp.float32
    w_head_t = jnp.asarray(params["w_head_t"], f32)          # (n_embd, 64)
    b_head = jnp.asarray(params["b_head"], f32).reshape(QUERY_SIZE)
    w_ih = jnp.asarray(params["w_ih"], f32)                  # (3, 6, 66) [r,z,n]
    b_ih = jnp.asarray(params["b_ih"], f32).reshape(3, HIDDEN)
    w_hh = jnp.asarray(params["w_hh"], f32)                  # (3, 66, 66)
    b_hh = jnp.asarray(params["b_hh"], f32).reshape(3, HIDDEN)
    w_out_t = jnp.asarray(params["w_out_t"], f32)            # (66, 2)
    b_out = jnp.asarray(params["b_out"], f32).reshape(2)

    n_embd = w_head_t.shape[0]
    col_light, col_cmd, col_tp, col_one, _, aug_w = _aug_layout(n_embd)

    # Packed head weight: augmented input (bs, aug_w) @ whead -> full initial
    # state  [ wp_head(cls)+b_head | light | cmd | 0 0 | 0 0 | tp | 1 | 0.. ].
    whead = jnp.zeros((aug_w, STATE), f32)
    whead = whead.at[:n_embd, :QUERY_SIZE].set(w_head_t)
    whead = whead.at[col_one, :QUERY_SIZE].set(b_head)       # bias via 1-column
    whead = whead.at[col_light, LANE_LIGHT].set(1.0)
    whead = whead.at[col_cmd, LANE_CMD].set(1.0)
    whead = whead.at[col_tp, LANE_TP].set(1.0)
    whead = whead.at[col_tp + 1, LANE_TP + 1].set(1.0)
    whead = whead.at[col_one, LANE_ONE].set(1.0)

    wbig = jnp.zeros((STATE, 4 * SLAB), f32)

    def place(wb, slab, hh, ih, bias):
        c0 = slab * SLAB
        if hh is not None:
            wb = wb.at[0:HIDDEN, c0:c0 + HIDDEN].set(hh)
        if ih is not None:
            wb = wb.at[LANE_X:LANE_X + 2, c0:c0 + HIDDEN].set(ih[0:2])   # x
            wb = wb.at[LANE_XL:LANE_XL + 2, c0:c0 + HIDDEN].set(ih[4:6])  # x_last
            wb = wb.at[LANE_TP:LANE_TP + 2, c0:c0 + HIDDEN].set(ih[2:4])  # tp
        wb = wb.at[LANE_ONE, c0:c0 + HIDDEN].set(bias)
        return wb

    wbig = place(wbig, SLAB_R, w_hh[0], w_ih[0], b_ih[0] + b_hh[0])   # r
    wbig = place(wbig, SLAB_GHN, w_hh[2], None, b_hh[2])              # gh_n
    wbig = place(wbig, SLAB_GIN, None, w_ih[2], b_ih[2])              # gi_n
    wbig = place(wbig, SLAB_Z, w_hh[1], w_ih[1], b_ih[1] + b_hh[1])   # z (last)

    # z-slab control biases (read against the constant-1 lane of the state):
    #   lanes 66..69 (x, x_last slots) -> zg = 0 -> zeroed by the update
    #   lanes 70..127 (tp, 1, padding) -> zg = 1 -> preserved exactly
    zc0 = SLAB_Z * SLAB
    wbig = wbig.at[LANE_ONE, zc0 + LANE_X:zc0 + LANE_TP].set(-100.0)
    wbig = wbig.at[LANE_ONE, zc0 + LANE_TP:zc0 + SLAB].set(100.0)

    wout = jnp.zeros((STATE, 2), f32).at[0:HIDDEN, :].set(w_out_t)
    wout = wout.at[LANE_ONE, :].set(b_out)                   # fold b_out

    return {"whead": whead, "wbig": wbig, "wout": wout}


# ----------------------------------------------------------------------------
# Kernel
# ----------------------------------------------------------------------------
def _gru_refine_kernel(aug_ref, whead_ref, wbig_ref, wout_ref, out_ref,
                       *, col_xlast):
    f32 = jnp.float32
    bb = aug_ref.shape[0]

    # Initial state from ONE fused matmul (biases / light / cmd / tp / 1 folded
    # into whead; x_last columns have zero rows and do not contribute).
    s = jnp.dot(aug_ref[...], whead_ref[...], preferred_element_type=f32)

    lane = jax.lax.broadcasted_iota(jnp.int32, (1, STATE), 1)
    m_x0 = (lane == LANE_X).astype(f32)
    m_x1 = (lane == LANE_X + 1).astype(f32)
    m_l0 = (lane == LANE_XL).astype(f32)
    m_l1 = (lane == LANE_XL + 1).astype(f32)

    # pred_wp[:, :, 0] -= 1.3 : applied at store time.
    shift = -1.3 * (jax.lax.broadcasted_iota(jnp.int32, (1, 2), 1) == 0).astype(f32)

    x = jnp.zeros((bb, 2), f32)

    for t in range(PRED_LEN):        # static unroll: serial 6-step recurrence
        xl = aug_ref[:, col_xlast + 2 * t:col_xlast + 2 * t + 2]      # (bb, 2)
        s = s + xl[:, 0:1] * m_l0 + xl[:, 1:2] * m_l1                 # place x_last[t]

        # Single fused MXU matmul -> [ r | gh_n | gi_n | z ] (+ all biases),
        # sliced in the same order the MXU produces them.
        g = jnp.dot(s, wbig_ref[...], preferred_element_type=f32)     # (bb, 512)
        r = jax.nn.sigmoid(g[:, SLAB_R * SLAB:(SLAB_R + 1) * SLAB])
        n = jnp.tanh(g[:, SLAB_GIN * SLAB:(SLAB_GIN + 1) * SLAB]
                     + r * g[:, SLAB_GHN * SLAB:(SLAB_GHN + 1) * SLAB])
        zg = jax.nn.sigmoid(g[:, SLAB_Z * SLAB:(SLAB_Z + 1) * SLAB])

        # GRUCell update, rewritten as n + zg*(s-n) (one fewer vmul / step).
        # Control biases: zg==0 on lanes 66..69 -> those lanes become n==0
        # (ready for re-insertion); zg==1 on lanes 70..127 -> s preserved
        # exactly (n==0 there, so n + 1*(s-n) == s bit-exactly).
        s = n + zg * (s - n)

        dx = jnp.dot(s, wout_ref[...], preferred_element_type=f32)    # b_out folded
        x = x + dx
        out_ref[:, 2 * t:2 * t + 2] = x + shift                       # direct store
        s = s + x[:, 0:1] * m_x0 + x[:, 1:2] * m_x1                   # place new x


# ----------------------------------------------------------------------------
# Wrapper
# ----------------------------------------------------------------------------
def wp_grurefine_forward(x_last, cls_emb, tp_batch, light_batch, cmd_batch,
                         packed, batch_npred_bbox=None, *, batch_block=256):
    del batch_npred_bbox            # gru_use_box == 0 -> unused
    f32 = jnp.float32
    bs, n_embd = cls_emb.shape
    _, _, _, _, col_xlast, aug_w = _aug_layout(n_embd)

    # One augmented per-batch stream: [cls | light | cmd | tp | 1 | x_last | pad]
    aug = jnp.concatenate(
        [cls_emb.astype(f32),
         light_batch.astype(f32).reshape(bs, 1),
         cmd_batch.astype(f32).reshape(bs, 1),
         tp_batch.astype(f32).reshape(bs, 2),
         jnp.ones((bs, 1), f32),
         jnp.reshape(x_last.astype(f32), (bs, PRED_LEN * 2))],
        axis=1)
    if aug.shape[1] < aug_w:
        aug = jnp.pad(aug, ((0, 0), (0, aug_w - aug.shape[1])))

    # Batch tiling: always an EVEN number of tiles (>= 2) so the "parallel"
    # grid axis can feed both v7x TensorCores; tiles capped at batch_block.
    n_tiles = 2 * max(1, -(-bs // (2 * batch_block)))
    bb = _round_up(max(1, -(-bs // n_tiles)), 8)
    bs_pad = bb * n_tiles
    if bs_pad > bs:
        aug = jnp.pad(aug, ((0, bs_pad - bs), (0, 0)))

    cost = pl.CostEstimate(
        flops=2 * bs_pad * (aug_w * STATE
                            + PRED_LEN * (STATE * 4 * SLAB + STATE * 2)),
        transcendentals=bs_pad * PRED_LEN * 3 * SLAB,
        bytes_accessed=4 * (bs_pad * aug_w + aug_w * STATE + STATE * 4 * SLAB
                            + STATE * 2 + bs_pad * PRED_LEN * 2))

    kernel = functools.partial(_gru_refine_kernel, col_xlast=col_xlast)

    out = pl.pallas_call(
        kernel,
        grid=(n_tiles,),
        in_specs=[pl.BlockSpec((bb, aug_w), lambda i: (i, 0)),        # aug stream
                  pl.BlockSpec((aug_w, STATE), lambda i: (0, 0)),     # head weight
                  pl.BlockSpec((STATE, 4 * SLAB), lambda i: (0, 0)),  # fused gates
                  pl.BlockSpec((STATE, 2), lambda i: (0, 0))],        # output head
        out_specs=pl.BlockSpec((bb, PRED_LEN * 2), lambda i: (i, 0)),
        out_shape=jax.ShapeDtypeStruct((bs_pad, PRED_LEN * 2), jnp.float32),
        compiler_params=pltpu.CompilerParams(dimension_semantics=("parallel",)),
        cost_estimate=cost,
    )(aug, packed["whead"], packed["wbig"], packed["wout"])
    return jnp.reshape(out[:bs], (bs, PRED_LEN, 2))


# ----------------------------------------------------------------------------
# Pure-JAX reference (mirrors the PyTorch forward / GRUCell semantics).
# ----------------------------------------------------------------------------
def reference_forward(x_last, cls_emb, tp, light, cmd, params):
    hp = jax.lax.Precision.HIGHEST
    z = jnp.dot(cls_emb, params["w_head_t"], precision=hp) + params["b_head"]
    z = jnp.concatenate([z, light, cmd], axis=1)
    bs = cls_emb.shape[0]
    x = jnp.zeros((bs, 2), jnp.float32)
    w_ih, b_ih = params["w_ih"], params["b_ih"]
    w_hh, b_hh = params["w_hh"], params["b_hh"]
    outs = []
    for t in range(PRED_LEN):
        x_in = jnp.concatenate([x, tp, x_last[:, t]], axis=1)
        gi = [jnp.dot(x_in, w_ih[g], precision=hp) + b_ih[g, 0] for g in range(3)]
        gh = [jnp.dot(z, w_hh[g], precision=hp) + b_hh[g, 0] for g in range(3)]
        r = jax.nn.sigmoid(gi[0] + gh[0])
        zg = jax.nn.sigmoid(gi[1] + gh[1])
        n = jnp.tanh(gi[2] + r * gh[2])
        z = (1.0 - zg) * n + zg * z
        dx = jnp.dot(z, params["w_out_t"], precision=hp) + params["b_out"][0]
        x = x + dx
        outs.append(x)
    pred = jnp.stack(outs, axis=1)
    return pred.at[:, :, 0].add(-1.3)


if __name__ == "__main__":
    bs = 64
    key = jax.random.PRNGKey(0)
    ks = jax.random.split(key, 13)
    params = {
        "w_head_t": jax.random.normal(ks[0], (N_EMBD, QUERY_SIZE), jnp.float32) * 0.05,
        "b_head":   jax.random.normal(ks[1], (QUERY_SIZE,), jnp.float32) * 0.05,
        "w_ih":     jax.random.normal(ks[2], (3, INPUT_SIZE, HIDDEN), jnp.float32) * 0.1,
        "b_ih":     jax.random.normal(ks[3], (3, 1, HIDDEN), jnp.float32) * 0.1,
        "w_hh":     jax.random.normal(ks[4], (3, HIDDEN, HIDDEN), jnp.float32) * 0.1,
        "b_hh":     jax.random.normal(ks[5], (3, 1, HIDDEN), jnp.float32) * 0.1,
        "w_out_t":  jax.random.normal(ks[6], (HIDDEN, 2), jnp.float32) * 0.1,
        "b_out":    jax.random.normal(ks[7], (1, 2), jnp.float32) * 0.1,
    }
    cls_emb     = jax.random.normal(ks[8], (bs, N_EMBD), jnp.float32)
    tp_batch    = jax.random.normal(ks[9], (bs, 2), jnp.float32)
    light_batch = jax.random.normal(ks[10], (bs, 1), jnp.float32)
    cmd_batch   = jax.random.normal(ks[11], (bs, 1), jnp.float32)
    x_last      = jax.random.normal(ks[12], (bs, PRED_LEN, 2), jnp.float32)

    # Weight packing happens ONCE, outside the per-call path.
    packed = pack_wp_grurefine_params(params)

    fwd = jax.jit(wp_grurefine_forward)   # default batch_block=256 -> bb=32, grid=(2,)
    pred_wp = fwd(x_last, cls_emb, tp_batch, light_batch, cmd_batch, packed)
    pred_wp = jax.block_until_ready(pred_wp)

    ref = reference_forward(x_last, cls_emb, tp_batch, light_batch, cmd_batch, params)
    assert pred_wp.shape == (bs, PRED_LEN, 2), pred_wp.shape
    if not jnp.allclose(pred_wp, ref, atol=1e-2, rtol=1e-2):
        raise AssertionError(
            f"mismatch: max abs err = {float(jnp.max(jnp.abs(pred_wp - ref)))}")
    print("KERNEL_OK")
</pallas_src>

<mosaic_0001>
module attributes {stable_mosaic.version = 11 : i64} {
  func.func @_gru_refine_kernel(%arg0: i32, %arg1: memref<32x152xf32, #tpu.memory_space<vmem>>, %arg2: memref<152x128xf32, #tpu.memory_space<vmem>>, %arg3: memref<128x512xf32, #tpu.memory_space<vmem>>, %arg4: memref<128x2xf32, #tpu.memory_space<vmem>>, %arg5: memref<32x12xf32, #tpu.memory_space<vmem>>) attributes {dimension_semantics = [#tpu.dimension_semantics<parallel>], iteration_bounds = array<i64: 2>, scalar_prefetch = 0 : i64, scratch_operands = 0 : i64, tpu.core_type = #tpu.core_type<tc>, window_params = [{transform_indices = @transform_0, window_bounds = array<i64: 32, 152>}, {pipeline_mode = #tpu.pipeline_mode<synchronous>, transform_indices = @transform_1, window_bounds = array<i64: 152, 128>}, {pipeline_mode = #tpu.pipeline_mode<synchronous>, transform_indices = @transform_2, window_bounds = array<i64: 128, 512>}, {pipeline_mode = #tpu.pipeline_mode<synchronous>, transform_indices = @transform_3, window_bounds = array<i64: 128, 2>}, {transform_indices = @transform_4, window_bounds = array<i64: 32, 12>}]} {
    %c0 = arith.constant 0 : index
    %c0_0 = arith.constant 0 : index
    %0 = vector.load %arg1[%c0, %c0_0] : memref<32x152xf32, #tpu.memory_space<vmem>>, vector<32x152xf32>
    %c0_1 = arith.constant 0 : index
    %c0_2 = arith.constant 0 : index
    %1 = vector.load %arg2[%c0_1, %c0_2] : memref<152x128xf32, #tpu.memory_space<vmem>>, vector<152x128xf32>
    %cst = arith.constant dense<0.000000e+00> : vector<32x128xf32>
    %2 = tpu.matmul %0, %1, %cst {dimension_numbers = #tpu.dot_dimension_numbers<[1], [0], [0], [1], [0, 0, 1, 1], [], []>} : vector<32x152xf32>, vector<152x128xf32>, vector<32x128xf32> -> vector<32x128xf32>
    %3 = tpu.iota {dimensions = array<i32: 1>} : vector<1x128xi32>
    %c66_i32 = arith.constant 66 : i32
    %4 = vector.broadcast %c66_i32 : i32 to vector<1x128xi32>
    %5 = arith.cmpi eq, %3, %4 : vector<1x128xi32>
    %6 = arith.extui %5 : vector<1x128xi1> to vector<1x128xi32>
    %7 = arith.sitofp %6 : vector<1x128xi32> to vector<1x128xf32>
    %c67_i32 = arith.constant 67 : i32
    %8 = vector.broadcast %c67_i32 : i32 to vector<1x128xi32>
    %9 = arith.cmpi eq, %3, %8 : vector<1x128xi32>
    %10 = arith.extui %9 : vector<1x128xi1> to vector<1x128xi32>
    %11 = arith.sitofp %10 : vector<1x128xi32> to vector<1x128xf32>
    %c68_i32 = arith.constant 68 : i32
    %12 = vector.broadcast %c68_i32 : i32 to vector<1x128xi32>
    %13 = arith.cmpi eq, %3, %12 : vector<1x128xi32>
    %14 = arith.extui %13 : vector<1x128xi1> to vector<1x128xi32>
    %15 = arith.sitofp %14 : vector<1x128xi32> to vector<1x128xf32>
    %c69_i32 = arith.constant 69 : i32
    %16 = vector.broadcast %c69_i32 : i32 to vector<1x128xi32>
    %17 = arith.cmpi eq, %3, %16 : vector<1x128xi32>
    %18 = arith.extui %17 : vector<1x128xi1> to vector<1x128xi32>
    %19 = arith.sitofp %18 : vector<1x128xi32> to vector<1x128xf32>
    %20 = tpu.iota {dimensions = array<i32: 1>} : vector<1x2xi32>
    %c0_i32 = arith.constant 0 : i32
    %21 = vector.broadcast %c0_i32 : i32 to vector<1x2xi32>
    %22 = arith.cmpi eq, %20, %21 : vector<1x2xi32>
    %23 = arith.extui %22 : vector<1x2xi1> to vector<1x2xi32>
    %24 = arith.sitofp %23 : vector<1x2xi32> to vector<1x2xf32>
    %cst_3 = arith.constant -1.300000e+00 : f32
    %25 = vector.broadcast %cst_3 : f32 to vector<1x2xf32>
    %26 = arith.mulf %25, %24 : vector<1x2xf32>
    %cst_4 = arith.constant 0.000000e+00 : f32
    %27 = vector.broadcast %cst_4 : f32 to vector<32x2xf32>
    %c0_5 = arith.constant 0 : index
    %c133 = arith.constant 133 : index
    %28 = vector.load %arg1[%c0_5, %c133] : memref<32x152xf32, #tpu.memory_space<vmem>>, vector<32x2xf32>
    %29 = vector.extract_strided_slice %28 {offsets = [0, 0], sizes = [32, 1], strides = [1, 1]} : vector<32x2xf32> to vector<32x1xf32>
    %30 = vector.broadcast %29 : vector<32x1xf32> to vector<32x128xf32>
    %31 = vector.broadcast %15 : vector<1x128xf32> to vector<32x128xf32>
    %32 = arith.mulf %30, %31 : vector<32x128xf32>
    %33 = arith.addf %2, %32 : vector<32x128xf32>
    %34 = vector.extract_strided_slice %28 {offsets = [0, 1], sizes = [32, 1], strides = [1, 1]} : vector<32x2xf32> to vector<32x1xf32>
    %35 = vector.broadcast %34 : vector<32x1xf32> to vector<32x128xf32>
    %36 = vector.broadcast %19 : vector<1x128xf32> to vector<32x128xf32>
    %37 = arith.mulf %35, %36 : vector<32x128xf32>
    %38 = arith.addf %33, %37 : vector<32x128xf32>
    %c0_6 = arith.constant 0 : index
    %c0_7 = arith.constant 0 : index
    %39 = vector.load %arg3[%c0_6, %c0_7] : memref<128x512xf32, #tpu.memory_space<vmem>>, vector<128x512xf32>
    %cst_8 = arith.constant dense<0.000000e+00> : vector<32x512xf32>
    %40 = tpu.matmul %38, %39, %cst_8 {dimension_numbers = #tpu.dot_dimension_numbers<[1], [0], [0], [1], [0, 0, 1, 1], [], []>} : vector<32x128xf32>, vector<128x512xf32>, vector<32x512xf32> -> vector<32x512xf32>
    %41 = vector.extract_strided_slice %40 {offsets = [0, 0], sizes = [32, 128], strides = [1, 1]} : vector<32x512xf32> to vector<32x128xf32>
    %42 = arith.negf %41 : vector<32x128xf32>
    %43 = math.exp %42 : vector<32x128xf32>
    %cst_9 = arith.constant 1.000000e+00 : f32
    %44 = vector.broadcast %cst_9 : f32 to vector<32x128xf32>
    %45 = arith.addf %44, %43 : vector<32x128xf32>
    %46 = arith.divf %44, %45 : vector<32x128xf32>
    %47 = vector.extract_strided_slice %40 {offsets = [0, 256], sizes = [32, 128], strides = [1, 1]} : vector<32x512xf32> to vector<32x128xf32>
    %48 = vector.extract_strided_slice %40 {offsets = [0, 128], sizes = [32, 128], strides = [1, 1]} : vector<32x512xf32> to vector<32x128xf32>
    %49 = arith.mulf %46, %48 : vector<32x128xf32>
    %50 = arith.addf %47, %49 : vector<32x128xf32>
    %51 = math.tanh %50 : vector<32x128xf32>
    %52 = vector.extract_strided_slice %40 {offsets = [0, 384], sizes = [32, 128], strides = [1, 1]} : vector<32x512xf32> to vector<32x128xf32>
    %53 = arith.negf %52 : vector<32x128xf32>
    %54 = math.exp %53 : vector<32x128xf32>
    %cst_10 = arith.constant 1.000000e+00 : f32
    %55 = vector.broadcast %cst_10 : f32 to vector<32x128xf32>
    %56 = arith.addf %55, %54 : vector<32x128xf32>
    %57 = arith.divf %55, %56 : vector<32x128xf32>
    %58 = arith.subf %38, %51 : vector<32x128xf32>
    %59 = arith.mulf %57, %58 : vector<32x128xf32>
    %60 = arith.addf %51, %59 : vector<32x128xf32>
    %c0_11 = arith.constant 0 : index
    %c0_12 = arith.constant 0 : index
    %61 = vector.load %arg4[%c0_11, %c0_12] : memref<128x2xf32, #tpu.memory_space<vmem>>, vector<128x2xf32>
    %cst_13 = arith.constant dense<0.000000e+00> : vector<32x2xf32>
    %62 = tpu.matmul %60, %61, %cst_13 {dimension_numbers = #tpu.dot_dimension_numbers<[1], [0], [0], [1], [0, 0, 1, 1], [], []>} : vector<32x128xf32>, vector<128x2xf32>, vector<32x2xf32> -> vector<32x2xf32>
    %63 = arith.addf %27, %62 : vector<32x2xf32>
    %64 = vector.broadcast %26 : vector<1x2xf32> to vector<32x2xf32>
    %65 = arith.addf %63, %64 : vector<32x2xf32>
    %c0_14 = arith.constant 0 : index
    %c0_15 = arith.constant 0 : index
    %66 = vector.load %arg5[%c0_14, %c0_15] : memref<32x12xf32, #tpu.memory_space<vmem>>, vector<32x2xf32>
    tpu.vector_store %arg5[%c0_14, %c0_15], %65 {strides = array<i32>} : memref<32x12xf32, #tpu.memory_space<vmem>>, vector<32x2xf32>,
    %67 = vector.extract_strided_slice %63 {offsets = [0, 0], sizes = [32, 1], strides = [1, 1]} : vector<32x2xf32> to vector<32x1xf32>
    %68 = vector.broadcast %67 : vector<32x1xf32> to vector<32x128xf32>
    %69 = vector.broadcast %7 : vector<1x128xf32> to vector<32x128xf32>
    %70 = arith.mulf %68, %69 : vector<32x128xf32>
    %71 = arith.addf %60, %70 : vector<32x128xf32>
    %72 = vector.extract_strided_slice %63 {offsets = [0, 1], sizes = [32, 1], strides = [1, 1]} : vector<32x2xf32> to vector<32x1xf32>
    %73 = vector.broadcast %72 : vector<32x1xf32> to vector<32x128xf32>
    %74 = vector.broadcast %11 : vector<1x128xf32> to vector<32x128xf32>
    %75 = arith.mulf %73, %74 : vector<32x128xf32>
    %76 = arith.addf %71, %75 : vector<32x128xf32>
    %c0_16 = arith.constant 0 : index
    %c135 = arith.constant 135 : index
    %77 = vector.load %arg1[%c0_16, %c135] : memref<32x152xf32, #tpu.memory_space<vmem>>, vector<32x2xf32>
    %78 = vector.extract_strided_slice %77 {offsets = [0, 0], sizes = [32, 1], strides = [1, 1]} : vector<32x2xf32> to vector<32x1xf32>
    %79 = vector.broadcast %78 : vector<32x1xf32> to vector<32x128xf32>
    %80 = vector.broadcast %15 : vector<1x128xf32> to vector<32x128xf32>
    %81 = arith.mulf %79, %80 : vector<32x128xf32>
    %82 = arith.addf %76, %81 : vector<32x128xf32>
    %83 = vector.extract_strided_slice %77 {offsets = [0, 1], sizes = [32, 1], strides = [1, 1]} : vector<32x2xf32> to vector<32x1xf32>
    %84 = vector.broadcast %83 : vector<32x1xf32> to vector<32x128xf32>
    %85 = vector.broadcast %19 : vector<1x128xf32> to vector<32x128xf32>
    %86 = arith.mulf %84, %85 : vector<32x128xf32>
    %87 = arith.addf %82, %86 : vector<32x128xf32>
    %c0_17 = arith.constant 0 : index
    %c0_18 = arith.constant 0 : index
    %88 = vector.load %arg3[%c0_17, %c0_18] : memref<128x512xf32, #tpu.memory_space<vmem>>, vector<128x512xf32>
    %cst_19 = arith.constant dense<0.000000e+00> : vector<32x512xf32>
    %89 = tpu.matmul %87, %88, %cst_19 {dimension_numbers = #tpu.dot_dimension_numbers<[1], [0], [0], [1], [0, 0, 1, 1], [], []>} : vector<32x128xf32>, vector<128x512xf32>, vector<32x512xf32> -> vector<32x512xf32>
    %90 = vector.extract_strided_slice %89 {offsets = [0, 0], sizes = [32, 128], strides = [1, 1]} : vector<32x512xf32> to vector<32x128xf32>
    %91 = arith.negf %90 : vector<32x128xf32>
    %92 = math.exp %91 : vector<32x128xf32>
    %cst_20 = arith.constant 1.000000e+00 : f32
    %93 = vector.broadcast %cst_20 : f32 to vector<32x128xf32>
    %94 = arith.addf %93, %92 : vector<32x128xf32>
    %95 = arith.divf %93, %94 : vector<32x128xf32>
    %96 = vector.extract_strided_slice %89 {offsets = [0, 256], sizes = [32, 128], strides = [1, 1]} : vector<32x512xf32> to vector<32x128xf32>
    %97 = vector.extract_strided_slice %89 {offsets = [0, 128], sizes = [32, 128], strides = [1, 1]} : vector<32x512xf32> to vector<32x128xf32>
    %98 = arith.mulf %95, %97 : vector<32x128xf32>
    %99 = arith.addf %96, %98 : vector<32x128xf32>
    %100 = math.tanh %99 : vector<32x128xf32>
    %101 = vector.extract_strided_slice %89 {offsets = [0, 384], sizes = [32, 128], strides = [1, 1]} : vector<32x512xf32> to vector<32x128xf32>
    %102 = arith.negf %101 : vector<32x128xf32>
    %103 = math.exp %102 : vector<32x128xf32>
    %cst_21 = arith.constant 1.000000e+00 : f32
    %104 = vector.broadcast %cst_21 : f32 to vector<32x128xf32>
    %105 = arith.addf %104, %103 : vector<32x128xf32>
    %106 = arith.divf %104, %105 : vector<32x128xf32>
    %107 = arith.subf %87, %100 : vector<32x128xf32>
    %108 = arith.mulf %106, %107 : vector<32x128xf32>
    %109 = arith.addf %100, %108 : vector<32x128xf32>
    %c0_22 = arith.constant 0 : index
    %c0_23 = arith.constant 0 : index
    %110 = vector.load %arg4[%c0_22, %c0_23] : memref<128x2xf32, #tpu.memory_space<vmem>>, vector<128x2xf32>
    %cst_24 = arith.constant dense<0.000000e+00> : vector<32x2xf32>
    %111 = tpu.matmul %109, %110, %cst_24 {dimension_numbers = #tpu.dot_dimension_numbers<[1], [0], [0], [1], [0, 0, 1, 1], [], []>} : vector<32x128xf32>, vector<128x2xf32>, vector<32x2xf32> -> vector<32x2xf32>
    %112 = arith.addf %63, %111 : vector<32x2xf32>
    %113 = vector.broadcast %26 : vector<1x2xf32> to vector<32x2xf32>
    %114 = arith.addf %112, %113 : vector<32x2xf32>
    %c0_25 = arith.constant 0 : index
    %c2 = arith.constant 2 : index
    %115 = vector.load %arg5[%c0_25, %c2] : memref<32x12xf32, #tpu.memory_space<vmem>>, vector<32x2xf32>
    tpu.vector_store %arg5[%c0_25, %c2], %114 {strides = array<i32>} : memref<32x12xf32, #tpu.memory_space<vmem>>, vector<32x2xf32>,
    %116 = vector.extract_strided_slice %112 {offsets = [0, 0], sizes = [32, 1], strides = [1, 1]} : vector<32x2xf32> to vector<32x1xf32>
    %117 = vector.broadcast %116 : vector<32x1xf32> to vector<32x128xf32>
    %118 = vector.broadcast %7 : vector<1x128xf32> to vector<32x128xf32>
    %119 = arith.mulf %117, %118 : vector<32x128xf32>
    %120 = arith.addf %109, %119 : vector<32x128xf32>
    %121 = vector.extract_strided_slice %112 {offsets = [0, 1], sizes = [32, 1], strides = [1, 1]} : vector<32x2xf32> to vector<32x1xf32>
    %122 = vector.broadcast %121 : vector<32x1xf32> to vector<32x128xf32>
    %123 = vector.broadcast %11 : vector<1x128xf32> to vector<32x128xf32>
    %124 = arith.mulf %122, %123 : vector<32x128xf32>
    %125 = arith.addf %120, %124 : vector<32x128xf32>
    %c0_26 = arith.constant 0 : index
    %c137 = arith.constant 137 : index
    %126 = vector.load %arg1[%c0_26, %c137] : memref<32x152xf32, #tpu.memory_space<vmem>>, vector<32x2xf32>
    %127 = vector.extract_strided_slice %126 {offsets = [0, 0], sizes = [32, 1], strides = [1, 1]} : vector<32x2xf32> to vector<32x1xf32>
    %128 = vector.broadcast %127 : vector<32x1xf32> to vector<32x128xf32>
    %129 = vector.broadcast %15 : vector<1x128xf32> to vector<32x128xf32>
    %130 = arith.mulf %128, %129 : vector<32x128xf32>
    %131 = arith.addf %125, %130 : vector<32x128xf32>
    %132 = vector.extract_strided_slice %126 {offsets = [0, 1], sizes = [32, 1], strides = [1, 1]} : vector<32x2xf32> to vector<32x1xf32>
    %133 = vector.broadcast %132 : vector<32x1xf32> to vector<32x128xf32>
    %134 = vector.broadcast %19 : vector<1x128xf32> to vector<32x128xf32>
    %135 = arith.mulf %133, %134 : vector<32x128xf32>
    %136 = arith.addf %131, %135 : vector<32x128xf32>
    %c0_27 = arith.constant 0 : index
    %c0_28 = arith.constant 0 : index
    %137 = vector.load %arg3[%c0_27, %c0_28] : memref<128x512xf32, #tpu.memory_space<vmem>>, vector<128x512xf32>
    %cst_29 = arith.constant dense<0.000000e+00> : vector<32x512xf32>
    %138 = tpu.matmul %136, %137, %cst_29 {dimension_numbers = #tpu.dot_dimension_numbers<[1], [0], [0], [1], [0, 0, 1, 1], [], []>} : vector<32x128xf32>, vector<128x512xf32>, vector<32x512xf32> -> vector<32x512xf32>
    %139 = vector.extract_strided_slice %138 {offsets = [0, 0], sizes = [32, 128], strides = [1, 1]} : vector<32x512xf32> to vector<32x128xf32>
    %140 = arith.negf %139 : vector<32x128xf32>
    %141 = math.exp %140 : vector<32x128xf32>
    %cst_30 = arith.constant 1.000000e+00 : f32
    %142 = vector.broadcast %cst_30 : f32 to vector<32x128xf32>
    %143 = arith.addf %142, %141 : vector<32x128xf32>
    %144 = arith.divf %142, %143 : vector<32x128xf32>
    %145 = vector.extract_strided_slice %138 {offsets = [0, 256], sizes = [32, 128], strides = [1, 1]} : vector<32x512xf32> to vector<32x128xf32>
    %146 = vector.extract_strided_slice %138 {offsets = [0, 128], sizes = [32, 128], strides = [1, 1]} : vector<32x512xf32> to vector<32x128xf32>
    %147 = arith.mulf %144, %146 : vector<32x128xf32>
    %148 = arith.addf %145, %147 : vector<32x128xf32>
    %149 = math.tanh %148 : vector<32x128xf32>
    %150 = vector.extract_strided_slice %138 {offsets = [0, 384], sizes = [32, 128], strides = [1, 1]} : vector<32x512xf32> to vector<32x128xf32>
    %151 = arith.negf %150 : vector<32x128xf32>
    %152 = math.exp %151 : vector<32x128xf32>
    %cst_31 = arith.constant 1.000000e+00 : f32
    %153 = vector.broadcast %cst_31 : f32 to vector<32x128xf32>
    %154 = arith.addf %153, %152 : vector<32x128xf32>
    %155 = arith.divf %153, %154 : vector<32x128xf32>
    %156 = arith.subf %136, %149 : vector<32x128xf32>
    %157 = arith.mulf %155, %156 : vector<32x128xf32>
    %158 = arith.addf %149, %157 : vector<32x128xf32>
    %c0_32 = arith.constant 0 : index
    %c0_33 = arith.constant 0 : index
    %159 = vector.load %arg4[%c0_32, %c0_33] : memref<128x2xf32, #tpu.memory_space<vmem>>, vector<128x2xf32>
    %cst_34 = arith.constant dense<0.000000e+00> : vector<32x2xf32>
    %160 = tpu.matmul %158, %159, %cst_34 {dimension_numbers = #tpu.dot_dimension_numbers<[1], [0], [0], [1], [0, 0, 1, 1], [], []>} : vector<32x128xf32>, vector<128x2xf32>, vector<32x2xf32> -> vector<32x2xf32>
    %161 = arith.addf %112, %160 : vector<32x2xf32>
    %162 = vector.broadcast %26 : vector<1x2xf32> to vector<32x2xf32>
    %163 = arith.addf %161, %162 : vector<32x2xf32>
    %c0_35 = arith.constant 0 : index
    %c4 = arith.constant 4 : index
    %164 = vector.load %arg5[%c0_35, %c4] : memref<32x12xf32, #tpu.memory_space<vmem>>, vector<32x2xf32>
    tpu.vector_store %arg5[%c0_35, %c4], %163 {strides = array<i32>} : memref<32x12xf32, #tpu.memory_space<vmem>>, vector<32x2xf32>,
    %165 = vector.extract_strided_slice %161 {offsets = [0, 0], sizes = [32, 1], strides = [1, 1]} : vector<32x2xf32> to vector<32x1xf32>
    %166 = vector.broadcast %165 : vector<32x1xf32> to vector<32x128xf32>
    %167 = vector.broadcast %7 : vector<1x128xf32> to vector<32x128xf32>
    %168 = arith.mulf %166, %167 : vector<32x128xf32>
    %169 = arith.addf %158, %168 : vector<32x128xf32>
    %170 = vector.extract_strided_slice %161 {offsets = [0, 1], sizes = [32, 1], strides = [1, 1]} : vector<32x2xf32> to vector<32x1xf32>
    %171 = vector.broadcast %170 : vector<32x1xf32> to vector<32x128xf32>
    %172 = vector.broadcast %11 : vector<1x128xf32> to vector<32x128xf32>
    %173 = arith.mulf %171, %172 : vector<32x128xf32>
    %174 = arith.addf %169, %173 : vector<32x128xf32>
    %c0_36 = arith.constant 0 : index
    %c139 = arith.constant 139 : index
    %175 = vector.load %arg1[%c0_36, %c139] : memref<32x152xf32, #tpu.memory_space<vmem>>, vector<32x2xf32>
    %176 = vector.extract_strided_slice %175 {offsets = [0, 0], sizes = [32, 1], strides = [1, 1]} : vector<32x2xf32> to vector<32x1xf32>
    %177 = vector.broadcast %176 : vector<32x1xf32> to vector<32x128xf32>
    %178 = vector.broadcast %15 : vector<1x128xf32> to vector<32x128xf32>
    %179 = arith.mulf %177, %178 : vector<32x128xf32>
    %180 = arith.addf %174, %179 : vector<32x128xf32>
    %181 = vector.extract_strided_slice %175 {offsets = [0, 1], sizes = [32, 1], strides = [1, 1]} : vector<32x2xf32> to vector<32x1xf32>
    %182 = vector.broadcast %181 : vector<32x1xf32> to vector<32x128xf32>
    %183 = vector.broadcast %19 : vector<1x128xf32> to vector<32x128xf32>
    %184 = arith.mulf %182, %183 : vector<32x128xf32>
    %185 = arith.addf %180, %184 : vector<32x128xf32>
    %c0_37 = arith.constant 0 : index
    %c0_38 = arith.constant 0 : index
    %186 = vector.load %arg3[%c0_37, %c0_38] : memref<128x512xf32, #tpu.memory_space<vmem>>, vector<128x512xf32>
    %cst_39 = arith.constant dense<0.000000e+00> : vector<32x512xf32>
    %187 = tpu.matmul %185, %186, %cst_39 {dimension_numbers = #tpu.dot_dimension_numbers<[1], [0], [0], [1], [0, 0, 1, 1], [], []>} : vector<32x128xf32>, vector<128x512xf32>, vector<32x512xf32> -> vector<32x512xf32>
    %188 = vector.extract_strided_slice %187 {offsets = [0, 0], sizes = [32, 128], strides = [1, 1]} : vector<32x512xf32> to vector<32x128xf32>
    %189 = arith.negf %188 : vector<32x128xf32>
    %190 = math.exp %189 : vector<32x128xf32>
    %cst_40 = arith.constant 1.000000e+00 : f32
    %191 = vector.broadcast %cst_40 : f32 to vector<32x128xf32>
    %192 = arith.addf %191, %190 : vector<32x128xf32>
    %193 = arith.divf %191, %192 : vector<32x128xf32>
    %194 = vector.extract_strided_slice %187 {offsets = [0, 256], sizes = [32, 128], strides = [1, 1]} : vector<32x512xf32> to vector<32x128xf32>
    %195 = vector.extract_strided_slice %187 {offsets = [0, 128], sizes = [32, 128], strides = [1, 1]} : vector<32x512xf32> to vector<32x128xf32>
    %196 = arith.mulf %193, %195 : vector<32x128xf32>
    %197 = arith.addf %194, %196 : vector<32x128xf32>
    %198 = math.tanh %197 : vector<32x128xf32>
    %199 = vector.extract_strided_slice %187 {offsets = [0, 384], sizes = [32, 128], strides = [1, 1]} : vector<32x512xf32> to vector<32x128xf32>
    %200 = arith.negf %199 : vector<32x128xf32>
    %201 = math.exp %200 : vector<32x128xf32>
    %cst_41 = arith.constant 1.000000e+00 : f32
    %202 = vector.broadcast %cst_41 : f32 to vector<32x128xf32>
    %203 = arith.addf %202, %201 : vector<32x128xf32>
    %204 = arith.divf %202, %203 : vector<32x128xf32>
    %205 = arith.subf %185, %198 : vector<32x128xf32>
    %206 = arith.mulf %204, %205 : vector<32x128xf32>
    %207 = arith.addf %198, %206 : vector<32x128xf32>
    %c0_42 = arith.constant 0 : index
    %c0_43 = arith.constant 0 : index
    %208 = vector.load %arg4[%c0_42, %c0_43] : memref<128x2xf32, #tpu.memory_space<vmem>>, vector<128x2xf32>
    %cst_44 = arith.constant dense<0.000000e+00> : vector<32x2xf32>
    %209 = tpu.matmul %207, %208, %cst_44 {dimension_numbers = #tpu.dot_dimension_numbers<[1], [0], [0], [1], [0, 0, 1, 1], [], []>} : vector<32x128xf32>, vector<128x2xf32>, vector<32x2xf32> -> vector<32x2xf32>
    %210 = arith.addf %161, %209 : vector<32x2xf32>
    %211 = vector.broadcast %26 : vector<1x2xf32> to vector<32x2xf32>
    %212 = arith.addf %210, %211 : vector<32x2xf32>
    %c0_45 = arith.constant 0 : index
    %c6 = arith.constant 6 : index
    %213 = vector.load %arg5[%c0_45, %c6] : memref<32x12xf32, #tpu.memory_space<vmem>>, vector<32x2xf32>
    tpu.vector_store %arg5[%c0_45, %c6], %212 {strides = array<i32>} : memref<32x12xf32, #tpu.memory_space<vmem>>, vector<32x2xf32>,
    %214 = vector.extract_strided_slice %210 {offsets = [0, 0], sizes = [32, 1], strides = [1, 1]} : vector<32x2xf32> to vector<32x1xf32>
    %215 = vector.broadcast %214 : vector<32x1xf32> to vector<32x128xf32>
    %216 = vector.broadcast %7 : vector<1x128xf32> to vector<32x128xf32>
    %217 = arith.mulf %215, %216 : vector<32x128xf32>
    %218 = arith.addf %207, %217 : vector<32x128xf32>
    %219 = vector.extract_strided_slice %210 {offsets = [0, 1], sizes = [32, 1], strides = [1, 1]} : vector<32x2xf32> to vector<32x1xf32>
    %220 = vector.broadcast %219 : vector<32x1xf32> to vector<32x128xf32>
    %221 = vector.broadcast %11 : vector<1x128xf32> to vector<32x128xf32>
    %222 = arith.mulf %220, %221 : vector<32x128xf32>
    %223 = arith.addf %218, %222 : vector<32x128xf32>
    %c0_46 = arith.constant 0 : index
    %c141 = arith.constant 141 : index
    %224 = vector.load %arg1[%c0_46, %c141] : memref<32x152xf32, #tpu.memory_space<vmem>>, vector<32x2xf32>
    %225 = vector.extract_strided_slice %224 {offsets = [0, 0], sizes = [32, 1], strides = [1, 1]} : vector<32x2xf32> to vector<32x1xf32>
    %226 = vector.broadcast %225 : vector<32x1xf32> to vector<32x128xf32>
    %227 = vector.broadcast %15 : vector<1x128xf32> to vector<32x128xf32>
    %228 = arith.mulf %226, %227 : vector<32x128xf32>
    %229 = arith.addf %223, %228 : vector<32x128xf32>
    %230 = vector.extract_strided_slice %224 {offsets = [0, 1], sizes = [32, 1], strides = [1, 1]} : vector<32x2xf32> to vector<32x1xf32>
    %231 = vector.broadcast %230 : vector<32x1xf32> to vector<32x128xf32>
    %232 = vector.broadcast %19 : vector<1x128xf32> to vector<32x128xf32>
    %233 = arith.mulf %231, %232 : vector<32x128xf32>
    %234 = arith.addf %229, %233 : vector<32x128xf32>
    %c0_47 = arith.constant 0 : index
    %c0_48 = arith.constant 0 : index
    %235 = vector.load %arg3[%c0_47, %c0_48] : memref<128x512xf32, #tpu.memory_space<vmem>>, vector<128x512xf32>
    %cst_49 = arith.constant dense<0.000000e+00> : vector<32x512xf32>
    %236 = tpu.matmul %234, %235, %cst_49 {dimension_numbers = #tpu.dot_dimension_numbers<[1], [0], [0], [1], [0, 0, 1, 1], [], []>} : vector<32x128xf32>, vector<128x512xf32>, vector<32x512xf32> -> vector<32x512xf32>
    %237 = vector.extract_strided_slice %236 {offsets = [0, 0], sizes = [32, 128], strides = [1, 1]} : vector<32x512xf32> to vector<32x128xf32>
    %238 = arith.negf %237 : vector<32x128xf32>
    %239 = math.exp %238 : vector<32x128xf32>
    %cst_50 = arith.constant 1.000000e+00 : f32
    %240 = vector.broadcast %cst_50 : f32 to vector<32x128xf32>
    %241 = arith.addf %240, %239 : vector<32x128xf32>
    %242 = arith.divf %240, %241 : vector<32x128xf32>
    %243 = vector.extract_strided_slice %236 {offsets = [0, 256], sizes = [32, 128], strides = [1, 1]} : vector<32x512xf32> to vector<32x128xf32>
    %244 = vector.extract_strided_slice %236 {offsets = [0, 128], sizes = [32, 128], strides = [1, 1]} : vector<32x512xf32> to vector<32x128xf32>
    %245 = arith.mulf %242, %244 : vector<32x128xf32>
    %246 = arith.addf %243, %245 : vector<32x128xf32>
    %247 = math.tanh %246 : vector<32x128xf32>
    %248 = vector.extract_strided_slice %236 {offsets = [0, 384], sizes = [32, 128], strides = [1, 1]} : vector<32x512xf32> to vector<32x128xf32>
    %249 = arith.negf %248 : vector<32x128xf32>
    %250 = math.exp %249 : vector<32x128xf32>
    %cst_51 = arith.constant 1.000000e+00 : f32
    %251 = vector.broadcast %cst_51 : f32 to vector<32x128xf32>
    %252 = arith.addf %251, %250 : vector<32x128xf32>
    %253 = arith.divf %251, %252 : vector<32x128xf32>
    %254 = arith.subf %234, %247 : vector<32x128xf32>
    %255 = arith.mulf %253, %254 : vector<32x128xf32>
    %256 = arith.addf %247, %255 : vector<32x128xf32>
    %c0_52 = arith.constant 0 : index
    %c0_53 = arith.constant 0 : index
    %257 = vector.load %arg4[%c0_52, %c0_53] : memref<128x2xf32, #tpu.memory_space<vmem>>, vector<128x2xf32>
    %cst_54 = arith.constant dense<0.000000e+00> : vector<32x2xf32>
    %258 = tpu.matmul %256, %257, %cst_54 {dimension_numbers = #tpu.dot_dimension_numbers<[1], [0], [0], [1], [0, 0, 1, 1], [], []>} : vector<32x128xf32>, vector<128x2xf32>, vector<32x2xf32> -> vector<32x2xf32>
    %259 = arith.addf %210, %258 : vector<32x2xf32>
    %260 = vector.broadcast %26 : vector<1x2xf32> to vector<32x2xf32>
    %261 = arith.addf %259, %260 : vector<32x2xf32>
    %c0_55 = arith.constant 0 : index
    %c8 = arith.constant 8 : index
    %262 = vector.load %arg5[%c0_55, %c8] : memref<32x12xf32, #tpu.memory_space<vmem>>, vector<32x2xf32>
    tpu.vector_store %arg5[%c0_55, %c8], %261 {strides = array<i32>} : memref<32x12xf32, #tpu.memory_space<vmem>>, vector<32x2xf32>,
    %263 = vector.extract_strided_slice %259 {offsets = [0, 0], sizes = [32, 1], strides = [1, 1]} : vector<32x2xf32> to vector<32x1xf32>
    %264 = vector.broadcast %263 : vector<32x1xf32> to vector<32x128xf32>
    %265 = vector.broadcast %7 : vector<1x128xf32> to vector<32x128xf32>
    %266 = arith.mulf %264, %265 : vector<32x128xf32>
    %267 = arith.addf %256, %266 : vector<32x128xf32>
    %268 = vector.extract_strided_slice %259 {offsets = [0, 1], sizes = [32, 1], strides = [1, 1]} : vector<32x2xf32> to vector<32x1xf32>
    %269 = vector.broadcast %268 : vector<32x1xf32> to vector<32x128xf32>
    %270 = vector.broadcast %11 : vector<1x128xf32> to vector<32x128xf32>
    %271 = arith.mulf %269, %270 : vector<32x128xf32>
    %272 = arith.addf %267, %271 : vector<32x128xf32>
    %c0_56 = arith.constant 0 : index
    %c143 = arith.constant 143 : index
    %273 = vector.load %arg1[%c0_56, %c143] : memref<32x152xf32, #tpu.memory_space<vmem>>, vector<32x2xf32>
    %274 = vector.extract_strided_slice %273 {offsets = [0, 0], sizes = [32, 1], strides = [1, 1]} : vector<32x2xf32> to vector<32x1xf32>
    %275 = vector.broadcast %274 : vector<32x1xf32> to vector<32x128xf32>
    %276 = vector.broadcast %15 : vector<1x128xf32> to vector<32x128xf32>
    %277 = arith.mulf %275, %276 : vector<32x128xf32>
    %278 = arith.addf %272, %277 : vector<32x128xf32>
    %279 = vector.extract_strided_slice %273 {offsets = [0, 1], sizes = [32, 1], strides = [1, 1]} : vector<32x2xf32> to vector<32x1xf32>
    %280 = vector.broadcast %279 : vector<32x1xf32> to vector<32x128xf32>
    %281 = vector.broadcast %19 : vector<1x128xf32> to vector<32x128xf32>
    %282 = arith.mulf %280, %281 : vector<32x128xf32>
    %283 = arith.addf %278, %282 : vector<32x128xf32>
    %c0_57 = arith.constant 0 : index
    %c0_58 = arith.constant 0 : index
    %284 = vector.load %arg3[%c0_57, %c0_58] : memref<128x512xf32, #tpu.memory_space<vmem>>, vector<128x512xf32>
    %cst_59 = arith.constant dense<0.000000e+00> : vector<32x512xf32>
    %285 = tpu.matmul %283, %284, %cst_59 {dimension_numbers = #tpu.dot_dimension_numbers<[1], [0], [0], [1], [0, 0, 1, 1], [], []>} : vector<32x128xf32>, vector<128x512xf32>, vector<32x512xf32> -> vector<32x512xf32>
    %286 = vector.extract_strided_slice %285 {offsets = [0, 0], sizes = [32, 128], strides = [1, 1]} : vector<32x512xf32> to vector<32x128xf32>
    %287 = arith.negf %286 : vector<32x128xf32>
    %288 = math.exp %287 : vector<32x128xf32>
    %cst_60 = arith.constant 1.000000e+00 : f32
    %289 = vector.broadcast %cst_60 : f32 to vector<32x128xf32>
    %290 = arith.addf %289, %288 : vector<32x128xf32>
    %291 = arith.divf %289, %290 : vector<32x128xf32>
    %292 = vector.extract_strided_slice %285 {offsets = [0, 256], sizes = [32, 128], strides = [1, 1]} : vector<32x512xf32> to vector<32x128xf32>
    %293 = vector.extract_strided_slice %285 {offsets = [0, 128], sizes = [32, 128], strides = [1, 1]} : vector<32x512xf32> to vector<32x128xf32>
    %294 = arith.mulf %291, %293 : vector<32x128xf32>
    %295 = arith.addf %292, %294 : vector<32x128xf32>
    %296 = math.tanh %295 : vector<32x128xf32>
    %297 = vector.extract_strided_slice %285 {offsets = [0, 384], sizes = [32, 128], strides = [1, 1]} : vector<32x512xf32> to vector<32x128xf32>
    %298 = arith.negf %297 : vector<32x128xf32>
    %299 = math.exp %298 : vector<32x128xf32>
    %cst_61 = arith.constant 1.000000e+00 : f32
    %300 = vector.broadcast %cst_61 : f32 to vector<32x128xf32>
    %301 = arith.addf %300, %299 : vector<32x128xf32>
    %302 = arith.divf %300, %301 : vector<32x128xf32>
    %303 = arith.subf %283, %296 : vector<32x128xf32>
    %304 = arith.mulf %302, %303 : vector<32x128xf32>
    %305 = arith.addf %296, %304 : vector<32x128xf32>
    %c0_62 = arith.constant 0 : index
    %c0_63 = arith.constant 0 : index
    %306 = vector.load %arg4[%c0_62, %c0_63] : memref<128x2xf32, #tpu.memory_space<vmem>>, vector<128x2xf32>
    %cst_64 = arith.constant dense<0.000000e+00> : vector<32x2xf32>
    %307 = tpu.matmul %305, %306, %cst_64 {dimension_numbers = #tpu.dot_dimension_numbers<[1], [0], [0], [1], [0, 0, 1, 1], [], []>} : vector<32x128xf32>, vector<128x2xf32>, vector<32x2xf32> -> vector<32x2xf32>
    %308 = arith.addf %259, %307 : vector<32x2xf32>
    %309 = vector.broadcast %26 : vector<1x2xf32> to vector<32x2xf32>
    %310 = arith.addf %308, %309 : vector<32x2xf32>
    %c0_65 = arith.constant 0 : index
    %c10 = arith.constant 10 : index
    %311 = vector.load %arg5[%c0_65, %c10] : memref<32x12xf32, #tpu.memory_space<vmem>>, vector<32x2xf32>
    tpu.vector_store %arg5[%c0_65, %c10], %310 {strides = array<i32>} : memref<32x12xf32, #tpu.memory_space<vmem>>, vector<32x2xf32>,
    return
  }
  func.func @transform_0(%arg0: i32) -> (i32, i32) {
    %c0_i32 = arith.constant 0 : i32
    %c0_i32_0 = arith.constant 0 : i32
    return %arg0, %c0_i32 : i32, i32
  }
  func.func @transform_1(%arg0: i32) -> (i32, i32) {
    %c0_i32 = arith.constant 0 : i32
    %c0_i32_0 = arith.constant 0 : i32
    %c0_i32_1 = arith.constant 0 : i32
    return %c0_i32, %c0_i32_0 : i32, i32
  }
  func.func @transform_2(%arg0: i32) -> (i32, i32) {
    %c0_i32 = arith.constant 0 : i32
    %c0_i32_0 = arith.constant 0 : i32
    %c0_i32_1 = arith.constant 0 : i32
    return %c0_i32, %c0_i32_0 : i32, i32
  }
  func.func @transform_3(%arg0: i32) -> (i32, i32) {
    %c0_i32 = arith.constant 0 : i32
    %c0_i32_0 = arith.constant 0 : i32
    %c0_i32_1 = arith.constant 0 : i32
    return %c0_i32, %c0_i32_0 : i32, i32
  }
  func.func @transform_4(%arg0: i32) -> (i32, i32) {
    %c0_i32 = arith.constant 0 : i32
    %c0_i32_0 = arith.constant 0 : i32
    return %arg0, %c0_i32 : i32, i32
  }
}

</mosaic_0001>

<bundles_post_ra>
// kernel: wp_grurefine_forward.1
= control target key start
LH: loop header
LB: loop body
LE: loop exit
PB: predicated region body
PF: predicated region fallthrough
CT: control target
= control target key end

     0   :  { %s4441_s15 = smov 0   ;;  %s7020_s0 = inlined_call_operand.vmem [shape: f32[64,152], index: 0, kind: input, shape index: {}]   ;;  %s7021_s1 = inlined_call_operand.vmem [shape: f32[152,128], index: 1, kind: input, shape index: {}]   ;;  %s7022_s2 = inlined_call_operand.vmem [shape: f32[128,512], index: 2, kind: input, shape index: {}]   ;;  %s7023_s3 = inlined_call_operand.vmem [shape: f32[128,2], index: 3, kind: input, shape index: {}]   ;;  %s7024_s4 = inlined_call_operand.vmem [shape: f32[64,12], index: 4, kind: output, shape index: {}]  }
   0x1 LB: > { %s3631_s16 = sadd.s32 4294967295, %s4394_s15   ;;  %p3635_p0 = scmp.ge.s32.totalorder %s4394_s15, 1  ;;  %s4394_s15 = sphi %s4441_s15, %s14_s15  }
   0x2   : > { %p164_p1 = scmp.lt.s32.totalorder %s4394_s15, 3 }
   0x4   : > { %p165_p2 = pnand %p3635_p0, %p164_p1 }
   0x6   : > { %168 = sbr.rel (%p165_p2) target bundleno = 3786 (0xeca), region = 36 }
   0xb   : > { %v227_v0 = vld [vmem:[%s7021_s1 + $0x78] sm:$0xff]  ;;  %s3636_s19 = sshll.u32 %s3631_s16, 2  ;;  %v7025_v1 = vmov 0.0   ;;  %v226_v2 = vld [vmem:[%s7021_s1 + $0x70] sm:$0xff]  ;;  %v4397_v3 = vmov 5   ;;  %v225_v4 = vld [vmem:[%s7021_s1 + $0x68] sm:$0xff]  ;;  %v231_v63 = vlaneseq }
   0xc   : > { %282 = vmatprep.subr.mxu0 %v7025_v1  ;;  %p192_p3 = scmp.lt.s32.totalorder %s3636_s19, 7  ;;  %519 = vmatprep.mubr.f32.mxu1 %v7025_v1  ;;  %v224_v5 = vld [vmem:[%s7021_s1 + $0x60] sm:$0xff]  ;;  %vm273_vm0 = vcmask 195584   ;;  %v4476_v6 = vld [vmem:[%s7022_s2 + $0x1e8] sm:$0xff]  ;;  %v223_v7 = vld [vmem:[%s7021_s1 + $0x58] sm:$0xff]  ;;  %v4398_v15 = vmov 6  }
   0xd   : > { %283 = vmatpush1.msra.mxu0 %v227_v0  ;;  %4077 = vset.pattern.permute.xlu0 %v4397_v3  ;;  %v4491_v9 = vld [vmem:[%s7022_s2 + $0x1e0] sm:$0xff]  ;;  %v222_v10 = vld [vmem:[%s7021_s1 + $0x50] sm:$0xff]  ;;  %v4504_v12 = vld [vmem:[%s7022_s2 + $0x1c8] sm:$0xff]  ;;  %vm810_vm4 = vcmask 15360   ;;  %s4411_s11 = smov 2   ;;  %s4413_s12 = smov 6  }
   0xe   : > { %284 = vmatprep.subr.mxu0 %v7025_v1  ;;  %s7376_s19 = smov (!%p192_p3, %s3636_s19), 7  ;;  %4079 = vset.pattern.permute.xlu1 %v4397_v3  ;;  %v221_v13 = vld [vmem:[%s7021_s1 + $0x48] sm:$0xff]  ;;  %v220_v14 = vld [vmem:[%s7021_s1 + $0x40] sm:$0xff]  ;;  %v219_v17 = vld [vmem:[%s7021_s1 + $0x38] sm:$0xff]  ;;  %vm1362_vm7 = vcmask 31760   ;;  %vm1914_vm8 = vcmask 48160  }
   0xf   : > { %285 = vmatpush1.msra.mxu0 %v226_v2  ;;  %s3700_s26 = sshll.u32 %s7376_s19, 4  ;;  %455 = vmatprep.subr.mxu1 %v4476_v6  ;;  %v4521_v16 = vld [vmem:[%s7022_s2 + $0x1c0] sm:$0xff]  ;;  %v4531_v18 = vld [vmem:[%s7022_s2 + $0x1a8] sm:$0xff]  ;;  %v218_v19 = vld [vmem:[%s7021_s1 + $0x30] sm:$0xff]  ;;  %v4764_v2 = vand.u32 127, %v231_v63  ;;  %s3640_s10 = sshll.u32 %s7376_s19, 3 }
  0x10   : > { %286 = vmatprep.subr.mxu0 %v7025_v1  ;;  %s4471_s29 = scalar_lea.vmem %s7020_s0, %s3700_s26  ;;  %456 = vmatpush1.msra.mxu1 %v4491_v9  ;;  %v217_v21 = vld [vmem:[%s7021_s1 + $0x28] sm:$0xff]  ;;  %v4550_v22 = vld [vmem:[%s7022_s2 + $0x1a0] sm:$0xff]  ;;  %v215_v26 = vld [vmem:[%s7021_s1 + $0x18] sm:$0xff]  ;;  %s5209_s13 = scalar_lea.vmem %s7024_s4, %s3640_s10  ;;  %vm2466_vm9 = vcmask 64560   ;;  %vm3018_vm10 = vcmask 80960   ;;  %vm3570_vm11 = vcmask 97360  }
  0x11   : > { %287 = vmatpush1.msra.mxu0 %v225_v4  ;;  %v4483_v8 = vld [vmem:[%s4471_s29 + $0x8] sm:$0xff]  ;;  %v4498_v11 = vld [vmem:[%s4471_s29 + $0x18] sm:$0xff]  ;;  %457 = vmatprep.subr.mxu1 %v4504_v12  ;;  %v216_v23 = vld [vmem:[%s7021_s1 + $0x20] sm:$0xff]  ;;  %7163 = vst [vmem:[#allocation3_spill] sm:$0xff] %v4764_v2  ;;  %vm239_vm1 = vcmp.eq.s32.totalorder %v4764_v2, 68  ;;  %vm242_vm2 = vcmp.eq.s32.totalorder %v4764_v2, 69 }
  0x12   : > { %288 = vmatprep.subr.mxu0 %v7025_v1  ;;  %3646 = vmatprep.mubr.msk.f32.mxu0 %vm273_vm0, %v4483_v8  ;;  %v4538_v20 = vld [vmem:[%s4471_s29 + $0x28] sm:$0xff]  ;;  %v4557_v24 = vld [vmem:[%s4471_s29 + $0x38] sm:$0xff]  ;;  %v4574_v27 = vld [vmem:[%s7022_s2 + $0x180] sm:$0xff]  ;;  %s4414_s19 = smov 8   ;;  %s4415_s14 = smov 10  }
  0x13   : > { %289 = vmatpush1.msra.mxu0 %v224_v5  ;;  %251 = vperm.xlu0 %4077, %v4483_v8   ;;  %7162 = vst [vmem:[#allocation2_spill] sm:$0xff] %v4557_v24  ;;  %v4563_v25 = vld [vmem:[%s7022_s2 + $0x188] sm:$0xff]  ;;  %v214_v29 = vld [vmem:[%s7021_s1 + $0x10] sm:$0xff]  ;;  %v4590_v30 = vld [vmem:[%s7022_s2 + $0x160] sm:$0xff]  ;;  %v4769_v5 = vsel %vm239_vm1, 1.0, %v7025_v1 }
  0x14   : > { %290 = vmatprep.subr.mxu0 %v7025_v1  ;;  %256 = vperm.xlu1 %4079, %v4498_v11   ;;  %v4580_v28 = vld [vmem:[%s7022_s2 + $0x168] sm:$0xff]  ;;  %v4606_v33 = vld [vmem:[%s7022_s2 + $0x140] sm:$0xff]  ;;  %v230_v38 = vld [vmem:[%s7021_s1 + $0x90] sm:$0xff]  ;;  %7164 = vst [vmem:[#allocation4_spill] sm:$0xff] %v4769_v5 }
  0x15   : > { %291 = vmatpush1.msra.mxu0 %v223_v7  ;;  %458 = vmatpush1.msra.mxu1 %v4521_v16  ;;  %v4596_v31 = vld [vmem:[%s7022_s2 + $0x148] sm:$0xff]  ;;  %v212_v35 = vld [vmem:[%s7021_s1] sm:$0xff]  ;;  %v206_v51 = vld [vmem:[%s4471_s29 + $0x10] sm:$0xff]  ;;  %v4772_v7 = vsel %vm242_vm2, 1.0, %v7025_v1 }
  0x16   : > { %292 = vmatprep.subr.mxu0 %v7025_v1  ;;  %459 = vmatprep.subr.mxu1 %v4531_v18  ;;  %v213_v32 = vld [vmem:[%s7021_s1 + $0x8] sm:$0xff]  ;;  %v4622_v36 = vld [vmem:[%s7022_s2 + $0x120] sm:$0xff]  ;;  %v210_v58 = vld [vmem:[%s4471_s29 + $0x30] sm:$0xff]  ;;  %7165 = vst [vmem:[#allocation5_spill] sm:$0xff] %v4772_v7 }
  0x17   : > { %293 = vmatpush1.msra.mxu0 %v222_v10  ;;  %4078 = vset.pattern.permute.xlu0 %v4398_v15  ;;  %v4612_v34 = vld [vmem:[%s7022_s2 + $0x128] sm:$0xff]  ;;  %v4638_v39 = vld [vmem:[%s7022_s2 + $0x100] sm:$0xff]  ;;  %v4761_v62 = vld [vmem:[%s7022_s2 + $0x1f8] sm:$0xff] }
  0x18   : > { %294 = vmatprep.subr.mxu0 %v7025_v1  ;;  %368 = vperm.xlu0 %4078, %v4483_v8   ;;  %v4628_v37 = vld [vmem:[%s7022_s2 + $0x108] sm:$0xff]  ;;  %v4654_v42 = vld [vmem:[%s7022_s2 + $0xe0] sm:$0xff]  ;;  %v4937_v2 = vld [vmem:[%s7022_s2 + $0x78] sm:$0xff] }
  0x19   : > { %295 = vmatpush1.msra.mxu0 %v221_v13  ;;  %4080 = vset.pattern.permute.xlu1 %v4398_v15  ;;  %v4644_v40 = vld [vmem:[%s7022_s2 + $0xe8] sm:$0xff]  ;;  %v228_v44 = vld [vmem:[%s7021_s1 + $0x80] sm:$0xff]  ;;  %7171 = vst [vmem:[#allocation11_spill] sm:$0xff] %v4937_v2 }
  0x1a   : > { %296 = vmatprep.subr.mxu0 %v7025_v1  ;;  %372 = vperm.xlu1 %4080, %v4498_v11   ;;  %v229_v41 = vld [vmem:[%s7021_s1 + $0x88] sm:$0xff]  ;;  %v4670_v45 = vld [vmem:[%s7022_s2 + $0xc0] sm:$0xff] }
  0x1b   : > { %297 = vmatpush1.msra.mxu0 %v220_v14  ;;  %460 = vmatpush1.msra.mxu1 %v4550_v22  ;;  %v4660_v43 = vld [vmem:[%s7022_s2 + $0xc8] sm:$0xff]  ;;  %v204_v46 = vld [vmem:[%s4471_s29] sm:$0xff] }
  0x1c   : > { %298 = vmatprep.subr.mxu0 %v7025_v1  ;;  %376 = vperm.xlu0 %4078, %v4538_v20   ;;  %v4677_v47 = vld [vmem:[%s7022_s2 + $0xa8] sm:$0xff]  ;;  %v4684_v48 = vld [vmem:[%s7022_s2 + $0xa0] sm:$0xff] }
  0x1d   : > { %299 = vmatpush1.msra.mxu0 %v219_v17  ;;  %461 = vmatprep.subr.mxu1 %v4563_v25  ;;  %v4690_v49 = vld [vmem:[%s7022_s2 + $0x88] sm:$0xff]  ;;  %v4696_v50 = vld [vmem:[%s7022_s2 + $0x80] sm:$0xff] }
  0x1e   : > { %300 = vmatprep.subr.mxu0 %v7025_v1  ;;  %4081 = vset.pattern.permute.xlu1 %v4397_v3  ;;  %v4705_v52 = vld [vmem:[%s7022_s2 + $0x68] sm:$0xff]  ;;  %v4711_v53 = vld [vmem:[%s7022_s2 + $0x60] sm:$0xff] }
  0x1f   : > { %301 = vmatpush1.msra.mxu0 %v218_v19  ;;  %261 = vperm.xlu1 %4081, %v4538_v20   ;;  %v4717_v54 = vld [vmem:[%s7022_s2 + $0x48] sm:$0xff]  ;;  %v4723_v55 = vld [vmem:[%s7022_s2 + $0x40] sm:$0xff] }
  0x20   : > { %302 = vmatprep.subr.mxu0 %v7025_v1  ;;  %380 = vperm.xlu0 %4078, %v4557_v24   ;;  %v208_v56 = vld [vmem:[%s4471_s29 + $0x20] sm:$0xff]  ;;  %v4732_v57 = vld [vmem:[%s7022_s2 + $0x28] sm:$0xff] }
  0x21   : > { %303 = vmatpush1.msra.mxu0 %v217_v21  ;;  %462 = vmatpush1.msra.mxu1 %v4574_v27  ;;  %v4743_v59 = vld [vmem:[%s7022_s2 + $0x20] sm:$0xff]  ;;  %v4749_v60 = vld [vmem:[%s7022_s2 + $0x8] sm:$0xff] }
  0x22   : > { %304 = vmatprep.subr.mxu0 %v7025_v1  ;;  %463 = vmatprep.subr.mxu1 %v4580_v28  ;;  %v4755_v61 = vld [vmem:[%s7022_s2] sm:$0xff] }
  0x23   : > { %305 = vmatpush1.msra.mxu0 %v216_v23  ;;  %266 = vperm.xlu1 %4081, %v4557_v24  }
  0x24   : > { %306 = vmatprep.subr.mxu0 %v7025_v1  ;;  %464 = vmatpush1.msra.mxu1 %v4590_v30 }
  0x25   : > { %307 = vmatpush1.msra.mxu0 %v215_v26  ;;  %465 = vmatprep.subr.mxu1 %v4596_v31 }
  0x26   : > { %308 = vmatprep.subr.mxu0 %v7025_v1  ;;  %466 = vmatpush1.msra.mxu1 %v4606_v33 }
  0x27   : > { %309 = vmatpush1.msra.mxu0 %v214_v29  ;;  %467 = vmatprep.subr.mxu1 %v4612_v34 }
  0x28   : > { %310 = vmatprep.subr.mxu0 %v7025_v1  ;;  %468 = vmatpush1.msra.mxu1 %v4622_v36 }
  0x29   : > { %311 = vmatpush1.msra.mxu0 %v213_v32  ;;  %469 = vmatprep.subr.mxu1 %v4628_v37  ;;  %v4783_v32 = vld [vmem:[%s7022_s2 + $0x1f0] sm:$0xff] }
  0x2a   : > { %312 = vmatprep.subr.mxu0 %v7025_v1  ;;  %470 = vmatpush1.msra.mxu1 %v4638_v39 }
  0x2b   : > { %313 = vmatpush1.msra.mxu0 %v212_v35  ;;  %471 = vmatprep.subr.mxu1 %v4644_v40 }
  0x2c   : > { %340 = vmatprep.subr.mxu0 %v7025_v1  ;;  %472 = vmatpush1.msra.mxu1 %v4654_v42 }
  0x2d   : > { %341 = vmatpush2.msra.mxu0 %v230_v38  ;;  %473 = vmatprep.subr.mxu1 %v4660_v43 }
  0x2e   : > { %342 = vmatprep.subr.mxu0 %v7025_v1  ;;  %474 = vmatpush1.msra.mxu1 %v4670_v45 }
  0x2f   : > { %343 = vmatpush2.msra.mxu0 %v229_v41  ;;  %475 = vmatprep.subr.mxu1 %v4677_v47  ;;  %v4788_v41 = vld [vmem:[%s7022_s2 + $0x1d8] sm:$0xff] }
  0x30   : > { %344 = vmatprep.subr.mxu0 %v7025_v1  ;;  %476 = vmatpush1.msra.mxu1 %v4684_v48 }
  0x31   : > { %345 = vmatpush2.msra.mxu0 %v228_v44  ;;  %477 = vmatprep.subr.mxu1 %v4690_v49 }
  0x32   : > { %347 = vmatmul.mubr.f32.vlgmr.msra.gmra.mxu0 %v204_v46  ;;  %478 = vmatpush1.msra.mxu1 %v4696_v50 }
  0x33   : > { %3647 = vmatprep.mubr.msk.f32.mxu0 %vm273_vm0, %v4498_v11  ;;  %479 = vmatprep.subr.mxu1 %v4705_v52 }
  0x34   : > { %480 = vmatpush1.msra.mxu1 %v4711_v53 }
  0x35   : > { %481 = vmatprep.subr.mxu1 %v4717_v54 }
  0x36   : > { %352 = vmatmul.mubr.f32.gmra.mxu0 %v206_v51  ;;  %482 = vmatpush1.msra.mxu1 %v4723_v55  ;;  %v4795_v51 = vld [vmem:[%s7022_s2 + $0x1d0] sm:$0xff] }
  0x37   : > { %3648 = vmatprep.mubr.msk.f32.mxu0 %vm273_vm0, %v4538_v20  ;;  %483 = vmatprep.subr.mxu1 %v4732_v57 }
  0x38   : > { %484 = vmatpush1.msra.mxu1 %v4743_v59 }
  0x39   : > { %485 = vmatprep.subr.mxu1 %v4749_v60 }
  0x3a   : > { %357 = vmatmul.mubr.f32.gmra.mxu0 %v208_v56  ;;  %486 = vmatpush1.msra.mxu1 %v4755_v61 }
  0x3b   : > { %3649 = vmatprep.mubr.msk.f32.mxu0 %vm273_vm0, %v4557_v24  ;;  %544 = vmatprep.subr.mxu1 %v4761_v62  ;;  %v4931_v24 = vld [vmem:[%s7022_s2 + $0x90] sm:$0xff] }
  0x3c   : > { %7170 = vst [vmem:[#allocation10_spill] sm:$0xff] %v4931_v24 }
  0x3e   : > { %362 = vmatmul.mubr.f32.gmra.mxu0 %v210_v58  ;;  %v4802_v58 = vld [vmem:[%s7022_s2 + $0x1b8] sm:$0xff] }
  0x8e   : > { %v252_v3 = vpop.permute.xlu0 %251 }
  0x8f   : > { %v257_v0 = vpop.permute.xlu1 %256  ;;  %v269_v13 = vmul.f32 %v4769_v5, %v252_v3  ;;  %v4810_v3 = vld [vmem:[%s7022_s2 + $0x1b0] sm:$0xff] }
  0x90   : > { %v270_v19 = vmul.f32 %v4769_v5, %v257_v0 }
  0x93   : > { %v369_v10 = vpop.permute.xlu0 %368 }
  0x94   : > { %v383_v14 = vmul.f32 %v4772_v7, %v369_v10  ;;  %v4816_v10 = vld [vmem:[%s7022_s2 + $0x198] sm:$0xff] }
  0x95   : > { %v373_v4 = vpop.permute.xlu1 %372 }
  0x96   : > { %v384_v29 = vmul.f32 %v4772_v7, %v373_v4 }
  0x97   : > { %v377_v35 = vpop.permute.xlu0 %376 }
  0x9a   : > { %v262_v17 = vpop.permute.xlu1 %261 }
  0x9b   : > { %v271_v46 = vmul.f32 %v4769_v5, %v262_v17  ;;  %v4825_v17 = vld [vmem:[%s7022_s2 + $0x190] sm:$0xff] }
  0x9e   : > { %v267_v63 = vpop.permute.xlu1 %266 }
  0xf2   : > { %v348_v15 = vpop.f32.mrf.mxu0 }
  0xf3   : > { %v349_v21 = vadd.f32 %v348_v15, %v269_v13  ;;  %v385_v13 = vmul.f32 %v4772_v7, %v377_v35  ;;  %v272_v15 = vmul.f32 %v4769_v5, %v267_v63  ;;  %v4840_v35 = vld [vmem:[%s7022_s2 + $0x170] sm:$0xff]  ;;  %v4925_v5 = vld [vmem:[%s7022_s2 + $0x98] sm:$0xff] }
  0xf4   : > { %v350_v23 = vpop.f32.mrf.mxu0  ;;  %v4854_v63 = vld [vmem:[%s7022_s2 + $0x150] sm:$0xff]  ;;  %7169 = vst [vmem:[#allocation9_spill] sm:$0xff] %v4925_v5 }
  0xf5   : > { %v4777_v26 = vadd.f32 %v383_v14, %v349_v21  ;;  %v4832_v23 = vld [vmem:[%s7022_s2 + $0x178] sm:$0xff] }
  0xf6   : > { %v353_v38 = vpop.f32.mrf.mxu0 }
  0xf7   : > { %v354_v44 = vadd.f32 %v353_v38, %v270_v19  ;;  %520 = vmatmul.mubr.f32.vlgmr.msra.gmra.mxu1 %v4777_v26  ;;  %v381_v19 = vpop.permute.xlu0 %380 }
  0xf8   : > { %545 = vmatpush1.msra.mxu1 %v4783_v32  ;;  %v355_v56 = vpop.f32.mrf.mxu0  ;;  %525 = vmatprep.mubr.f32.mxu1 %v7025_v1 }
  0xf9   : > { %v4804_v0 = vadd.f32 %v384_v29, %v354_v44  ;;  %546 = vmatprep.subr.mxu1 %v4788_v41  ;;  %v4846_v44 = vld [vmem:[%s7022_s2 + $0x158] sm:$0xff] }
  0xfa   : > { %547 = vmatpush1.msra.mxu1 %v4795_v51  ;;  %v358_v4 = vpop.f32.mrf.mxu0 }
  0xfb   : > { %v359_v14 = vadd.f32 %v358_v4, %v271_v46  ;;  %548 = vmatprep.subr.mxu1 %v4802_v58  ;;  %526 = vmatmul.mubr.f32.gmra.mxu1 %v4804_v0  ;;  %v386_v46 = vmul.f32 %v4772_v7, %v381_v19  ;;  %v4861_v4 = vld [vmem:[%s7022_s2 + $0x138] sm:$0xff]  ;;  %v4919_v7 = vld [vmem:[%s7022_s2 + $0xb0] sm:$0xff] }
  0xfc   : > { %549 = vmatpush1.msra.mxu1 %v4810_v3  ;;  %v360_v21 = vpop.f32.mrf.mxu0  ;;  %531 = vmatprep.mubr.f32.mxu1 %v7025_v1  ;;  %v4875_v19 = vld [vmem:[%s7022_s2 + $0x118] sm:$0xff]  ;;  %7168 = vst [vmem:[#allocation8_spill] sm:$0xff] %v4919_v7 }
  0xfd   : > { %v4834_v29 = vadd.f32 %v385_v13, %v359_v14  ;;  %550 = vmatprep.subr.mxu1 %v4816_v10  ;;  %v4882_v21 = vld [vmem:[%s7022_s2 + $0x110] sm:$0xff] }
  0xfe   : > { %551 = vmatpush1.msra.mxu1 %v4825_v17  ;;  %v363_v38 = vpop.f32.mrf.mxu0 }
  0xff   : > { %v364_v56 = vadd.f32 %v363_v38, %v272_v15  ;;  %552 = vmatprep.subr.mxu1 %v4832_v23  ;;  %532 = vmatmul.mubr.f32.gmra.mxu1 %v4834_v29  ;;  %v4869_v15 = vld [vmem:[%s7022_s2 + $0x130] sm:$0xff]  ;;  %v4888_v38 = vld [vmem:[%s7022_s2 + $0xf8] sm:$0xff] }
 0x100   : > { %553 = vmatpush1.msra.mxu1 %v4840_v35  ;;  %537 = vmatprep.mubr.f32.mxu1 %v7025_v1  ;;  %v365_v13 = vpop.f32.mrf.mxu0 }
 0x101   : > { %v4863_v14 = vadd.f32 %v386_v46, %v364_v56  ;;  %554 = vmatprep.subr.mxu1 %v4846_v44  ;;  %v4895_v46 = vld [vmem:[%s7022_s2 + $0xf0] sm:$0xff]  ;;  %v4901_v56 = vld [vmem:[%s7022_s2 + $0xd8] sm:$0xff] }
 0x102   : > { %555 = vmatpush1.msra.mxu1 %v4854_v63  ;;  %v4907_v13 = vld [vmem:[%s7022_s2 + $0xd0] sm:$0xff] }
 0x103   : > { %556 = vmatprep.subr.mxu1 %v4861_v4  ;;  %538 = vmatmul.mubr.f32.gmra.mxu1 %v4863_v14  ;;  %7166 = vst [vmem:[#allocation6_spill] sm:$0xff] %v4907_v13 }
 0x104   : > { %557 = vmatpush1.msra.mxu1 %v4869_v15  ;;  %608 = vmatprep.mubr.f32.mxu1 %v7025_v1  ;;  %v4913_v1 = vld [vmem:[%s7022_s2 + $0xb8] sm:$0xff] }
 0x105   : > { %558 = vmatprep.subr.mxu1 %v4875_v19  ;;  %7167 = vst [vmem:[#allocation7_spill] sm:$0xff] %v4913_v1 }
 0x106   : > { %559 = vmatpush1.msra.mxu1 %v4882_v21 }
 0x107   : > { %560 = vmatprep.subr.mxu1 %v4888_v38 }
 0x108   : > { %561 = vmatpush1.msra.mxu1 %v4895_v46 }
 0x109   : > { %562 = vmatprep.subr.mxu1 %v4901_v56 }
 0x10a   : > { %563 = vmatpush1.msra.mxu1 %v4907_v13  ;;  %v4943_v13 = vld [vmem:[%s7022_s2 + $0x70] sm:$0xff] }
 0x10b   : > { %564 = vmatprep.subr.mxu1 %v4913_v1  ;;  %7172 = vst [vmem:[#allocation12_spill] sm:$0xff] %v4943_v13  ;;  %v4949_v1 = vld [vmem:[%s7022_s2 + $0x58] sm:$0xff] }
 0x10c   : > { %565 = vmatpush1.msra.mxu1 %v4919_v7  ;;  %v4955_v7 = vld [vmem:[%s7022_s2 + $0x50] sm:$0xff] }
 0x10d   : > { %566 = vmatprep.subr.mxu1 %v4925_v5  ;;  %7173 = vst [vmem:[#allocation13_spill] sm:$0xff] %v4955_v7  ;;  %v4961_v5 = vld [vmem:[%s7022_s2 + $0x38] sm:$0xff] }
 0x10e   : > { %567 = vmatpush1.msra.mxu1 %v4931_v24  ;;  %v4967_v24 = vld [vmem:[%s7022_s2 + $0x30] sm:$0xff] }
 0x10f   : > { %568 = vmatprep.subr.mxu1 %v4937_v2  ;;  %v4973_v2 = vld [vmem:[%s7022_s2 + $0x18] sm:$0xff] }
 0x110   : > { %569 = vmatpush1.msra.mxu1 %v4943_v13  ;;  %v4979_v13 = vld [vmem:[%s7022_s2 + $0x10] sm:$0xff] }
 0x111   : > { %570 = vmatprep.subr.mxu1 %v4949_v1 }
 0x112   : > { %571 = vmatpush1.msra.mxu1 %v4955_v7  ;;  %v7174_v7 = vmov 0.0  }
 0x113   : > { %572 = vmatprep.subr.mxu1 %v4961_v5 }
 0x114   : > { %573 = vmatpush1.msra.mxu1 %v4967_v24 }
 0x115   : > { %574 = vmatprep.subr.mxu1 %v4973_v2 }
 0x116   : > { %575 = vmatpush1.msra.mxu1 %v4979_v13 }
 0x117   : > { %609 = vmatmul.mubr.f32.vlgmr.msra.gmra.mxu1 %v4777_v26  ;;  %987 = vmatprep.subr.mxu1 %v4476_v6  ;;  %v5027_v6 = vld [vmem:[%s7023_s3 + $0x78] sm:$0xff] }
 0x118   : > { %614 = vmatprep.mubr.f32.mxu1 %v7174_v7  ;;  %988 = vmatpush1.msra.mxu1 %v4491_v9  ;;  %v5035_v9 = vld [vmem:[%s7023_s3 + $0x70] sm:$0xff] }
 0x119   : > { %989 = vmatprep.subr.mxu1 %v4504_v12  ;;  %3821 = vmatprep.subr.mxu0 %v5027_v6  ;;  %v5042_v12 = vld [vmem:[%s7023_s3 + $0x68] sm:$0xff] }
 0x11a   : > { %990 = vmatpush1.msra.mxu1 %v4521_v16  ;;  %3822 = vmatpush3.msra.mxu0 %v5027_v6  ;;  %v5049_v16 = vld [vmem:[%s7023_s3 + $0x60] sm:$0xff] }
 0x11b   : > { %615 = vmatmul.mubr.f32.gmra.mxu1 %v4804_v0  ;;  %991 = vmatprep.subr.mxu1 %v4531_v18  ;;  %v5056_v18 = vld [vmem:[%s7023_s3 + $0x58] sm:$0xff] }
 0x11c   : > { %620 = vmatprep.mubr.f32.mxu1 %v7174_v7  ;;  %992 = vmatpush1.msra.mxu1 %v4550_v22  ;;  %v5063_v22 = vld [vmem:[%s7023_s3 + $0x50] sm:$0xff] }
 0x11d   : > { %993 = vmatprep.subr.mxu1 %v4563_v25  ;;  %3823 = vmatprep.subr.mxu0 %v5035_v9  ;;  %v5070_v25 = vld [vmem:[%s7023_s3 + $0x48] sm:$0xff] }
 0x11e   : > { %994 = vmatpush1.msra.mxu1 %v4574_v27  ;;  %3824 = vmatpush3.msra.mxu0 %v5035_v9  ;;  %v5077_v27 = vld [vmem:[%s7023_s3 + $0x40] sm:$0xff] }
 0x11f   : > { %621 = vmatmul.mubr.f32.gmra.mxu1 %v4834_v29  ;;  %995 = vmatprep.subr.mxu1 %v4580_v28  ;;  %v5084_v28 = vld [vmem:[%s7023_s3 + $0x38] sm:$0xff] }
 0x120   : > { %626 = vmatprep.mubr.f32.mxu1 %v7174_v7  ;;  %996 = vmatpush1.msra.mxu1 %v4590_v30  ;;  %v5091_v30 = vld [vmem:[%s7023_s3 + $0x30] sm:$0xff] }
 0x121   : > { %997 = vmatprep.subr.mxu1 %v4596_v31  ;;  %3825 = vmatprep.subr.mxu0 %v5042_v12  ;;  %v5098_v31 = vld [vmem:[%s7023_s3 + $0x28] sm:$0xff] }
 0x122   : > { %998 = vmatpush1.msra.mxu1 %v4606_v33  ;;  %3826 = vmatpush3.msra.mxu0 %v5042_v12  ;;  %7175 = vst [vmem:[#allocation14_spill] sm:$0xff] %v5098_v31  ;;  %v5105_v33 = vld [vmem:[%s7023_s3 + $0x20] sm:$0xff] }
 0x123   : > { %627 = vmatmul.mubr.f32.gmra.mxu1 %v4863_v14  ;;  %999 = vmatprep.subr.mxu1 %v4612_v34  ;;  %7176 = vst [vmem:[#allocation15_spill] sm:$0xff] %v5105_v33  ;;  %v5111_v34 = vld [vmem:[%s7023_s3 + $0x18] sm:$0xff] }
 0x124   : > { %1000 = vmatpush1.msra.mxu1 %v4622_v36  ;;  %1051 = vmatprep.mubr.f32.mxu1 %v7174_v7  ;;  %7177 = vst [vmem:[#allocation16_spill] sm:$0xff] %v5111_v34  ;;  %v5117_v36 = vld [vmem:[%s7023_s3 + $0x10] sm:$0xff] }
 0x125   : > { %1001 = vmatprep.subr.mxu1 %v4628_v37  ;;  %3827 = vmatprep.subr.mxu0 %v5049_v16  ;;  %7178 = vst [vmem:[#allocation17_spill] sm:$0xff] %v5117_v36  ;;  %v5124_v37 = vld [vmem:[%s7023_s3 + $0x8] sm:$0xff] }
 0x126   : > { %1002 = vmatpush1.msra.mxu1 %v4638_v39  ;;  %3828 = vmatpush3.msra.mxu0 %v5049_v16  ;;  %7179 = vst [vmem:[#allocation18_spill] sm:$0xff] %v5124_v37  ;;  %v5132_v39 = vld [vmem:[%s7023_s3] sm:$0xff] }
 0x127   : > { %1003 = vmatprep.subr.mxu1 %v4644_v40  ;;  %3829 = vmatprep.subr.mxu0 %v5056_v18  ;;  %7180 = vst [vmem:[#allocation19_spill] sm:$0xff] %v5132_v39  ;;  %v7043_v40 = vmov 7  }
 0x128   : > { %1004 = vmatpush1.msra.mxu1 %v4654_v42  ;;  %3830 = vmatpush3.msra.mxu0 %v5056_v18  ;;  %v7044_v42 = vmov 8  }
 0x129   : > { %1005 = vmatprep.subr.mxu1 %v4660_v43  ;;  %3831 = vmatprep.subr.mxu0 %v5063_v22  ;;  %v7046_v43 = vmov 1  }
 0x12a   : > { %1006 = vmatpush1.msra.mxu1 %v4670_v45  ;;  %3832 = vmatpush3.msra.mxu0 %v5063_v22  ;;  %v7048_v45 = vmov 0  }
 0x12b   : > { %1007 = vmatprep.subr.mxu1 %v4677_v47  ;;  %3833 = vmatprep.subr.mxu0 %v5070_v25 }
 0x12c   : > { %1008 = vmatpush1.msra.mxu1 %v4684_v48  ;;  %3834 = vmatpush3.msra.mxu0 %v5070_v25 }
 0x12d   : > { %1009 = vmatprep.subr.mxu1 %v4690_v49  ;;  %3835 = vmatprep.subr.mxu0 %v5077_v27 }
 0x12e   : > { %1010 = vmatpush1.msra.mxu1 %v4696_v50  ;;  %3836 = vmatpush3.msra.mxu0 %v5077_v27 }
 0x12f   : > { %1011 = vmatprep.subr.mxu1 %v4705_v52  ;;  %3837 = vmatprep.subr.mxu0 %v5084_v28 }
 0x130   : > { %1012 = vmatpush1.msra.mxu1 %v4711_v53  ;;  %3838 = vmatpush3.msra.mxu0 %v5084_v28 }
 0x131   : > { %1013 = vmatprep.subr.mxu1 %v4717_v54  ;;  %3839 = vmatprep.subr.mxu0 %v5091_v30 }
 0x132   : > { %1014 = vmatpush1.msra.mxu1 %v4723_v55  ;;  %3840 = vmatpush3.msra.mxu0 %v5091_v30 }
 0x133   : > { %1015 = vmatprep.subr.mxu1 %v4732_v57  ;;  %3841 = vmatprep.subr.mxu0 %v5098_v31 }
 0x134   : > { %1016 = vmatpush1.msra.mxu1 %v4743_v59  ;;  %3842 = vmatpush3.msra.mxu0 %v5098_v31 }
 0x135   : > { %1017 = vmatprep.subr.mxu1 %v4749_v60  ;;  %3843 = vmatprep.subr.mxu0 %v5105_v33 }
 0x136   : > { %1018 = vmatpush1.msra.mxu1 %v4755_v61  ;;  %3844 = vmatpush3.msra.mxu0 %v5105_v33 }
 0x137   : > { %3859 = vmatprep.subr.mxu1 %v5027_v6  ;;  %3845 = vmatprep.subr.mxu0 %v5111_v34 }
 0x138   : > { %3846 = vmatpush3.msra.mxu0 %v5111_v34  ;;  %4082 = vset.pattern.permute.xlu1 %v7043_v40 }
 0x139   : > { %3847 = vmatprep.subr.mxu0 %v5117_v36  ;;  %4085 = vset.pattern.permute.xlu0 %v7044_v42 }
 0x13a   : > { %3848 = vmatpush3.msra.mxu0 %v5117_v36  ;;  %873 = vperm.xlu1 %4082, %v4483_v8  }
 0x13b   : > { %3849 = vmatprep.subr.mxu0 %v5124_v37  ;;  %904 = vperm.xlu0 %4085, %v4498_v11  }
 0x13c   : > { %3850 = vmatpush3.msra.mxu0 %v5124_v37 }
 0x13d   : > { %3851 = vmatprep.subr.mxu0 %v5132_v39 }
 0x13e   : > { %3852 = vmatpush3.msra.mxu0 %v5132_v39  ;;  %4083 = vset.pattern.permute.xlu1 %v7044_v42 }
 0x13f   : > { %1076 = vmatprep.subr.mxu0 %v4761_v62  ;;  %4087 = vset.pattern.permute.xlu0 %v7046_v43 }
 0x140   : > { %900 = vperm.xlu1 %4083, %v4483_v8  }
 0x144   : > { %4084 = vset.pattern.permute.xlu1 %v7043_v40 }
 0x145   : > { %878 = vperm.xlu1 %4084, %v4498_v11  }
 0x149   : > { %883 = vperm.xlu1 %4084, %v4538_v20  }
 0x14d   : > { %4086 = vset.pattern.permute.xlu1 %v7048_v45 }
 0x1b7   : > { %v521_v47 = vpop.f32.mrf.mxu1 }
 0x1b8   : > { %v3650_v48 = vmul.f32 -1.442695, %v521_v47 }
 0x1b9   : > { %v523_v49 = vpop.f32.mrf.mxu1 }
 0x1ba   : > { %4146 = vpow2.f32 %v3650_v48 }
 0x1bb   : > { %v527_v50 = vpop.f32.mrf.mxu1 }
 0x1bc   : > { %v3651_v52 = vmul.f32 -1.442695, %v527_v50 }
 0x1bd   : > { %v529_v53 = vpop.f32.mrf.mxu1 }
 0x1be   : > { %4148 = vpow2.f32 %v3651_v52 }
 0x1bf   : > { %v533_v54 = vpop.f32.mrf.mxu1 }
 0x1c0   : > { %v3652_v55 = vmul.f32 -1.442695, %v533_v54 }
 0x1c1   : > { %v535_v8 = vpop.f32.mrf.mxu1 }
 0x1c2   : > { %4150 = vpow2.f32 %v3652_v55 }
 0x1c3   : > { %v539_v57 = vpop.f32.mrf.mxu1 }
 0x1c4   : > { %v3653_v59 = vmul.f32 -1.442695, %v539_v57 }
 0x1c5   : > { %v541_v48 = vpop.f32.mrf.mxu1 }
 0x1c6   : > { %4152 = vpow2.f32 %v3653_v59 }
 0x1c7   : > { %v4147_v11 = vpop.eup %4146 }
 0x1c8   : > { %v645_v60 = vadd.f32 1.0, %v4147_v11 }
 0x1ca   : > { %4154 = vrcp.f32 %v645_v60 }
 0x1cb   : > { %v4149_v61 = vpop.eup %4148 }
 0x1cc   : > { %v646_v62 = vadd.f32 1.0, %v4149_v61 }
 0x1ce   : > { %4156 = vrcp.f32 %v646_v62 }
 0x1cf   : > { %v4151_v40 = vpop.eup %4150 }
 0x1d0   : > { %v647_v47 = vadd.f32 1.0, %v4151_v40 }
 0x1d2   : > { %4158 = vrcp.f32 %v647_v47 }
 0x1d3   : > { %v4153_v42 = vpop.eup %4152 }
 0x1d4   : > { %v648_v43 = vadd.f32 1.0, %v4153_v42 }
 0x1d6   : > { %4160 = vrcp.f32 %v648_v43 }
 0x1d7   : > { %v610_v50 = vpop.f32.mrf.mxu1  ;;  %v4155_v55 = vpop.eup %4154 }
 0x1d8   : > { %v657_v39 = vmul.f32 %v4155_v55, %v523_v49 }
 0x1d9   : > { %v612_v52 = vpop.f32.mrf.mxu1 }
 0x1da   : > { %v3654_v54 = vmul.f32 -1.442695, %v612_v52  ;;  %v661_v36 = vadd.f32 %v657_v39, %v610_v50 }
 0x1db   : > { %v616_v45 = vpop.f32.mrf.mxu1  ;;  %v4157_v60 = vpop.eup %4156 }
 0x1dc   : > { %4162 = vpow2.f32 %v3654_v54  ;;  %v658_v37 = vmul.f32 %v4157_v60, %v529_v53 }
 0x1dd   : > { %v618_v57 = vpop.f32.mrf.mxu1 }
 0x1de   : > { %v3655_v59 = vmul.f32 -1.442695, %v618_v57  ;;  %v662_v43 = vadd.f32 %v658_v37, %v616_v45 }
 0x1df   : > { %v622_v11 = vpop.f32.mrf.mxu1  ;;  %v4159_v34 = vpop.eup %4158 }
 0x1e0   : > { %4164 = vpow2.f32 %v3655_v59  ;;  %v659_v52 = vmul.f32 %v4159_v34, %v535_v8 }
 0x1e1   : > { %v624_v61 = vpop.f32.mrf.mxu1 }
 0x1e2   : > { %v3656_v62 = vmul.f32 -1.442695, %v624_v61  ;;  %v663_v49 = vadd.f32 %v659_v52, %v622_v11 }
 0x1e3   : > { %v628_v40 = vpop.f32.mrf.mxu1  ;;  %v4161_v33 = vpop.eup %4160 }
 0x1e4   : > { %4166 = vpow2.f32 %v3656_v62  ;;  %v660_v31 = vmul.f32 %v4161_v33, %v541_v48 }
 0x1e5   : > { %v630_v42 = vpop.f32.mrf.mxu1  ;;  %4168 = vtanh.f32 %v661_v36 }
 0x1e6   : > { %v3657_v47 = vmul.f32 -1.442695, %v630_v42  ;;  %v664_v53 = vadd.f32 %v660_v31, %v628_v40 }
 0x1e8   : > { %4170 = vpow2.f32 %v3657_v47 }
 0x1e9   : > { %v4163_v54 = vpop.eup %4162  ;;  %4172 = vtanh.f32 %v662_v43 }
 0x1ea   : > { %v681_v57 = vadd.f32 1.0, %v4163_v54 }
 0x1ec   : > { %4174 = vrcp.f32 %v681_v57 }
 0x1ed   : > { %v4165_v55 = vpop.eup %4164  ;;  %4176 = vtanh.f32 %v663_v49  ;;  %v874_v49 = vpop.permute.xlu1 %873 }
 0x1ee   : > { %v682_v59 = vadd.f32 1.0, %v4165_v55 }
 0x1f0   : > { %4178 = vrcp.f32 %v682_v59 }
 0x1f1   : > { %v4167_v39 = vpop.eup %4166  ;;  %4180 = vtanh.f32 %v664_v53  ;;  %v901_v55 = vpop.permute.xlu1 %900 }
 0x1f2   : > { %v683_v50 = vadd.f32 1.0, %v4167_v39  ;;  %v4169_v60 = vpop.eup %4168  ;;  %v905_v53 = vpop.permute.xlu0 %904 }
 0x1f3   : > { %v693_v45 = vsub.f32 %v4777_v26, %v4169_v60 }
 0x1f4   : > { %4182 = vrcp.f32 %v683_v50 }
 0x1f5   : > { %v4171_v34 = vpop.eup %4170  ;;  %v879_v59 = vpop.permute.xlu1 %878 }
 0x1f6   : > { %v684_v36 = vadd.f32 1.0, %v4171_v34  ;;  %v4173_v37 = vpop.eup %4172 }
 0x1f7   : > { %v694_v11 = vsub.f32 %v4804_v0, %v4173_v37 }
 0x1f8   : > { %4184 = vrcp.f32 %v684_v36 }
 0x1f9   : > { %v4175_v33 = vpop.eup %4174  ;;  %v884_v39 = vpop.permute.xlu1 %883 }
 0x1fa   : > { %v697_v8 = vmul.f32 %v4175_v33, %v693_v45  ;;  %v4177_v48 = vpop.eup %4176 }
 0x1fb   : > { %v695_v47 = vsub.f32 %v4834_v29, %v4177_v48 }
 0x1fc   : > { %v5151_v61 = vadd.f32 %v4169_v60, %v697_v8 }
 0x1fd   : > { %v4179_v31 = vpop.eup %4178 }
 0x1fe   : > { %3853 = vmatprep.mubr.f32.mxu0 %v5151_v61  ;;  %v698_v62 = vmul.f32 %v4179_v31, %v694_v11  ;;  %v4181_v40 = vpop.eup %4180 }
 0x1ff   : > { %v696_v0 = vsub.f32 %v4863_v14, %v4181_v40  ;;  %v7191_v14 = vmov 0  }
 0x200   : > { %v5154_v42 = vadd.f32 %v4173_v37, %v698_v62 }
 0x201   : > { %v4183_v52 = vpop.eup %4182 }
 0x202   : > { %3854 = vmatmul.mubr.f32.vlgmr.msra.gmra.mxu0 %v5154_v42  ;;  %v699_v26 = vmul.f32 %v4183_v52, %v695_v47 }
 0x203   : > { %1077 = vmatpush1.msra.mxu0 %v4783_v32  ;;  %v7181_v32 = vld [vmem:[#allocation6_spill] sm:$0xff] }
 0x204   : > { %v5159_v43 = vadd.f32 %v4177_v48, %v699_v26  ;;  %1078 = vmatprep.subr.mxu0 %v4788_v41  ;;  %v7182_v41 = vld [vmem:[#allocation7_spill] sm:$0xff] }
 0x205   : > { %v4185_v54 = vpop.eup %4184  ;;  %1079 = vmatpush1.msra.mxu0 %v4795_v51  ;;  %v7183_v51 = vld [vmem:[#allocation8_spill] sm:$0xff] }
 0x206   : > { %3856 = vmatprep.mubr.f32.mxu0 %v5159_v43  ;;  %v700_v57 = vmul.f32 %v4185_v54, %v696_v0  ;;  %1080 = vmatprep.subr.mxu0 %v4802_v58  ;;  %v7184_v58 = vld [vmem:[#allocation9_spill] sm:$0xff] }
 0x207   : > { %1081 = vmatpush1.msra.mxu0 %v4810_v3  ;;  %v7185_v3 = vld [vmem:[#allocation10_spill] sm:$0xff]  ;;  %v7197_v54 = vld [vmem:[#allocation5_spill] sm:$0xff] }
 0x208   : > { %v5167_v29 = vadd.f32 %v4181_v40, %v700_v57  ;;  %1082 = vmatprep.subr.mxu0 %v4816_v10  ;;  %v7186_v10 = vld [vmem:[#allocation11_spill] sm:$0xff]  ;;  %v7196_v40 = vld [vmem:[#allocation4_spill] sm:$0xff]  ;;  %v915_v57 = vmul.f32 %v7197_v54, %v901_v55 }
 0x209   : > { %1083 = vmatpush1.msra.mxu0 %v4825_v17  ;;  %v7187_v17 = vld [vmem:[#allocation12_spill] sm:$0xff]  ;;  %v891_v47 = vmul.f32 %v7196_v40, %v874_v49 }
 0x20a   : > { %3857 = vmatmul.mubr.f32.gmra.mxu0 %v5167_v29  ;;  %1084 = vmatprep.subr.mxu0 %v4832_v23  ;;  %v7188_v23 = vld [vmem:[#allocation13_spill] sm:$0xff] }
 0x20b   : > { %1085 = vmatpush1.msra.mxu0 %v4840_v35  ;;  %1140 = vmatprep.mubr.f32.mxu0 %v7174_v7  ;;  %v7189_v35 = vld [vmem:[#allocation3_spill] sm:$0xff] }
 0x20c   : > { %1086 = vmatprep.subr.mxu0 %v4846_v44  ;;  %vm245_vm3 = vcmp.eq.s32.totalorder %v7189_v35, 0  ;;  %vm233_vm5 = vcmp.eq.s32.totalorder %v7189_v35, 66  ;;  %vm236_vm6 = vcmp.eq.s32.totalorder %v7189_v35, 67 }
 0x20d   : > { %1087 = vmatpush1.msra.mxu0 %v4854_v63  ;;  %v3645_v44 = vsel %vm245_vm3, 1.0, %v7174_v7  ;;  %v5250_v50 = vsel %vm233_vm5, 1.0, %v7174_v7  ;;  %v5255_v36 = vsel %vm236_vm6, 1.0, %v7174_v7 }
 0x20e   : > { %1088 = vmatprep.subr.mxu0 %v4861_v4  ;;  %v5200_v63 = vmul.f32 -1.3, %v3645_v44 }
 0x20f   : > { %1089 = vmatpush1.msra.mxu0 %v4869_v15 }
 0x210   : > { %1090 = vmatprep.subr.mxu0 %v4875_v19  ;;  %7190 = vst [vmem:[#allocation6_spill] sm:$0xff] %v5200_v63 }
 0x211   : > { %1091 = vmatpush1.msra.mxu0 %v4882_v21 }
 0x212   : > { %1092 = vmatprep.subr.mxu0 %v4888_v38  ;;  %v7192_v38 = vmov 1  }
 0x213   : > { %1093 = vmatpush1.msra.mxu0 %v4895_v46  ;;  %v7193_v46 = vmov 8  }
 0x214   : > { %1094 = vmatprep.subr.mxu0 %v4901_v56  ;;  %v7194_v56 = vld [vmem:[#allocation2_spill] sm:$0xff] }
 0x215   : > { %1095 = vmatpush1.msra.mxu0 %v7181_v32  ;;  %v892_v32 = vmul.f32 %v7196_v40, %v879_v59 }
 0x216   : > { %1096 = vmatprep.subr.mxu0 %v7182_v41 }
 0x217   : > { %1097 = vmatpush1.msra.mxu0 %v7183_v51 }
 0x218   : > { %1098 = vmatprep.subr.mxu0 %v7184_v58 }
 0x219   : > { %1099 = vmatpush1.msra.mxu0 %v7185_v3 }
 0x21a   : > { %1100 = vmatprep.subr.mxu0 %v7186_v10 }
 0x21b   : > { %1101 = vmatpush1.msra.mxu0 %v7187_v17  ;;  %v916_v17 = vmul.f32 %v7197_v54, %v905_v53 }
 0x21c   : > { %1102 = vmatprep.subr.mxu0 %v4949_v1 }
 0x21d   : > { %1103 = vmatpush1.msra.mxu0 %v7188_v23  ;;  %v893_v23 = vmul.f32 %v7196_v40, %v884_v39  ;;  %v7062_v39 = vmov 10  }
 0x21e   : > { %1104 = vmatprep.subr.mxu0 %v4961_v5 }
 0x21f   : > { %1105 = vmatpush1.msra.mxu0 %v4967_v24 }
 0x220   : > { %1106 = vmatprep.subr.mxu0 %v4973_v2 }
 0x221   : > { %1107 = vmatpush1.msra.mxu0 %v4979_v13  ;;  %v7195_v13 = vmov 7  }
 0x2c2   : > { %v5202_v4 = vpop.f32.mrf.mxu0 }
 0x2c3   : > { %848 = vperm.xlu0 %4087, %v5202_v4   ;;  %822 = vperm.xlu1 %4086, %v5202_v4   ;;  %v807_v2 = vadd.f32 %v5202_v4, %v5200_v63 }
 0x2c4   : > { %v5211_v1 = vpop.f32.mrf.mxu0 }
 0x2c5   : > { %v806_v24 = vadd.f32 %v5211_v1, %v5200_v63  ;;  %812 = vst.msk [vmem:[%s5209_s13 + $0x8] sm:$0xff] %vm810_vm4, %v807_v2 }
 0x2c7   : > { %811 = vst.msk [vmem:[%s5209_s13] sm:$0xff] %vm810_vm4, %v806_v24  ;;  %844 = vperm.xlu0 %4087, %v5211_v1   ;;  %817 = vperm.xlu1 %4086, %v5211_v1  }
 0x2ca   : > { %v5223_v5 = vpop.f32.mrf.mxu0 }
 0x2cb   : > { %832 = vperm.xlu1 %4086, %v5223_v5   ;;  %4088 = vset.pattern.permute.xlu0 %v7191_v14  ;;  %v809_v21 = vadd.f32 %v5223_v5, %v5200_v63 }
 0x2cc   : > { %v5227_v15 = vpop.f32.mrf.mxu0 }
 0x2cd   : > { %v808_v19 = vadd.f32 %v5227_v15, %v5200_v63  ;;  %827 = vperm.xlu0 %4088, %v5227_v15   ;;  %814 = vst.msk [vmem:[%s5209_s13 + $0x18] sm:$0xff] %vm810_vm4, %v809_v21  ;;  %v5635_v63 = vld [vmem:[%s7022_s2 + $0xb0] sm:$0xff] }
 0x2ce   : > { %7227 = vst [vmem:[#allocation26_spill] sm:$0xff] %v5635_v63 }
 0x2cf   : > { %813 = vst.msk [vmem:[%s5209_s13 + $0x10] sm:$0xff] %vm810_vm4, %v808_v19  ;;  %4090 = vset.pattern.permute.xlu1 %v7192_v38 }
 0x2d0   : > { %852 = vperm.xlu1 %4090, %v5227_v15  }
 0x2d1   : > { %4089 = vset.pattern.permute.xlu0 %v7192_v38 }
 0x2d2   : > { %856 = vperm.xlu0 %4089, %v5223_v5  }
 0x2d4   : > { %4091 = vset.pattern.permute.xlu1 %v7193_v46 }
 0x2d5   : > { %908 = vperm.xlu1 %4091, %v4538_v20  }
 0x2d6   : > { %4093 = vset.pattern.permute.xlu0 %v7193_v46 }
 0x2d7   : > { %912 = vperm.xlu0 %4093, %v7194_v56  }
 0x2d9   : > { %4092 = vset.pattern.permute.xlu1 %v7195_v13 }
 0x2da   : > { %888 = vperm.xlu1 %4092, %v7194_v56  }
 0x2db   : > { %4095 = vset.pattern.permute.xlu0 %v7062_v39 }
 0x33e   : > { %v849_v60 = vpop.permute.xlu0 %848  ;;  %v823_v20 = vpop.permute.xlu1 %822 }
 0x33f   : > { %v836_v34 = vmul.f32 %v5250_v50, %v823_v20  ;;  %v860_v48 = vmul.f32 %v5255_v36, %v849_v60  ;;  %v5338_v60 = vld [vmem:[%s4471_s29 + $0x18] sm:$0xff]  ;;  %v5341_v20 = vld [vmem:[%s4471_s29 + $0x28] sm:$0xff] }
 0x340   : > { %7204 = vst [vmem:[#allocation7_spill] sm:$0xff] %v5341_v20 }
 0x341   : > { %v840_v33 = vadd.f32 %v836_v34, %v5154_v42 }
 0x342   : > { %v845_v37 = vpop.permute.xlu0 %844  ;;  %v818_v45 = vpop.permute.xlu1 %817 }
 0x343   : > { %v835_v8 = vmul.f32 %v5250_v50, %v818_v45  ;;  %v859_v11 = vmul.f32 %v5255_v36, %v845_v37  ;;  %v864_v52 = vadd.f32 %v860_v48, %v840_v33 }
 0x345   : > { %v839_v31 = vadd.f32 %v835_v8, %v5151_v61  ;;  %v896_v10 = vadd.f32 %v892_v32, %v864_v52 }
 0x346   : > { %v833_v62 = vpop.permute.xlu1 %832 }
 0x347   : > { %v863_v26 = vadd.f32 %v859_v11, %v839_v31  ;;  %v5276_v24 = vadd.f32 %v916_v17, %v896_v10 }
 0x348   : > { %v828_v0 = vpop.permute.xlu0 %827 }
 0x349   : > { %v895_v41 = vadd.f32 %v891_v47, %v863_v26  ;;  %v837_v42 = vmul.f32 %v5250_v50, %v828_v0 }
 0x34b   : > { %v5266_v51 = vadd.f32 %v915_v57, %v895_v41  ;;  %v841_v58 = vadd.f32 %v837_v42, %v5159_v43  ;;  %v853_v3 = vpop.permute.xlu1 %852  ;;  %v838_v43 = vmul.f32 %v5250_v50, %v833_v62 }
 0x34c   : > { %v861_v61 = vmul.f32 %v5255_v36, %v853_v3 }
 0x34d   : > { %1052 = vmatmul.mubr.f32.vlgmr.msra.gmra.mxu1 %v5266_v51  ;;  %1141 = vmatmul.mubr.f32.vlgmr.msra.gmra.mxu0 %v5266_v51  ;;  %v857_v44 = vpop.permute.xlu0 %856  ;;  %v842_v13 = vadd.f32 %v838_v43, %v5167_v29 }
 0x34e   : > { %v865_v35 = vadd.f32 %v861_v61, %v841_v58  ;;  %1057 = vmatprep.mubr.f32.mxu1 %v7174_v7  ;;  %1146 = vmatprep.mubr.f32.mxu0 %v7174_v7  ;;  %v862_v46 = vmul.f32 %v5255_v36, %v857_v44 }
 0x34f   : > { %3860 = vmatpush3.msra.mxu1 %v5027_v6 }
 0x350   : > { %v909_v2 = vpop.permute.xlu1 %908  ;;  %v897_v19 = vadd.f32 %v893_v23, %v865_v35  ;;  %3861 = vmatprep.subr.mxu1 %v5035_v9  ;;  %v866_v55 = vadd.f32 %v862_v46, %v842_v13 }
 0x351   : > { %v917_v21 = vmul.f32 %v7197_v54, %v909_v2  ;;  %1058 = vmatmul.mubr.f32.gmra.mxu1 %v5276_v24  ;;  %1147 = vmatmul.mubr.f32.gmra.mxu0 %v5276_v24 }
 0x352   : > { %1063 = vmatprep.mubr.f32.mxu1 %v7174_v7  ;;  %1152 = vmatprep.mubr.f32.mxu0 %v7174_v7  ;;  %v913_v6 = vpop.permute.xlu0 %912 }
 0x353   : > { %v5287_v56 = vadd.f32 %v917_v21, %v897_v19  ;;  %3862 = vmatpush3.msra.mxu1 %v5035_v9  ;;  %v918_v53 = vmul.f32 %v7197_v54, %v913_v6 }
 0x354   : > { %3863 = vmatprep.subr.mxu1 %v5042_v12 }
 0x355   : > { %v889_v49 = vpop.permute.xlu1 %888  ;;  %1064 = vmatmul.mubr.f32.gmra.mxu1 %v5287_v56  ;;  %1153 = vmatmul.mubr.f32.gmra.mxu0 %v5287_v56 }
 0x356   : > { %v894_v59 = vmul.f32 %v7196_v40, %v889_v49  ;;  %1069 = vmatprep.mubr.f32.mxu1 %v7174_v7  ;;  %1158 = vmatprep.mubr.f32.mxu0 %v7174_v7 }
 0x357   : > { %3864 = vmatpush3.msra.mxu1 %v5042_v12  ;;  %v7198_v12 = vld [vmem:[#allocation14_spill] sm:$0xff] }
 0x358   : > { %v898_v9 = vadd.f32 %v894_v59, %v866_v55  ;;  %3865 = vmatprep.subr.mxu1 %v5049_v16 }
 0x359   : > { %3866 = vmatpush3.msra.mxu1 %v5049_v16  ;;  %v7199_v16 = vld [vmem:[#allocation15_spill] sm:$0xff] }
 0x35a   : > { %v5301_v29 = vadd.f32 %v918_v53, %v898_v9  ;;  %3867 = vmatprep.subr.mxu1 %v5056_v18 }
 0x35b   : > { %3868 = vmatpush3.msra.mxu1 %v5056_v18  ;;  %v7200_v18 = vld [vmem:[#allocation16_spill] sm:$0xff] }
 0x35c   : > { %1070 = vmatmul.mubr.f32.gmra.mxu1 %v5301_v29  ;;  %1159 = vmatmul.mubr.f32.gmra.mxu0 %v5301_v29 }
 0x35d   : > { %3869 = vmatprep.subr.mxu1 %v5063_v22  ;;  %1603 = vmatprep.mubr.f32.mxu0 %v7174_v7 }
 0x35e   : > { %3870 = vmatpush3.msra.mxu1 %v5063_v22  ;;  %v7201_v22 = vld [vmem:[#allocation17_spill] sm:$0xff] }
 0x35f   : > { %3871 = vmatprep.subr.mxu1 %v5070_v25 }
 0x360   : > { %3872 = vmatpush3.msra.mxu1 %v5070_v25  ;;  %v7202_v25 = vld [vmem:[#allocation18_spill] sm:$0xff] }
 0x361   : > { %3873 = vmatprep.subr.mxu1 %v5077_v27 }
 0x362   : > { %3874 = vmatpush3.msra.mxu1 %v5077_v27  ;;  %v7203_v27 = vld [vmem:[#allocation19_spill] sm:$0xff] }
 0x363   : > { %3875 = vmatprep.subr.mxu1 %v5084_v28 }
 0x364   : > { %3876 = vmatpush3.msra.mxu1 %v5084_v28  ;;  %v5331_v28 = vld [vmem:[%s4471_s29 + $0x8] sm:$0xff] }
 0x365   : > { %3877 = vmatprep.subr.mxu1 %v5091_v30  ;;  %1452 = vperm.xlu0 %4095, %v5331_v28  }
 0x366   : > { %3878 = vmatpush3.msra.mxu1 %v5091_v30  ;;  %v7063_v30 = vmov 9  }
 0x367   : > { %3879 = vmatprep.subr.mxu1 %v7198_v12  ;;  %4094 = vset.pattern.permute.xlu1 %v7063_v30 }
 0x368   : > { %3880 = vmatpush3.msra.mxu1 %v7198_v12  ;;  %1425 = vperm.xlu1 %4094, %v5331_v28  }
 0x369   : > { %3881 = vmatprep.subr.mxu1 %v7199_v16  ;;  %4097 = vset.pattern.permute.xlu0 %v7063_v30 }
 0x36a   : > { %3882 = vmatpush3.msra.mxu1 %v7199_v16  ;;  %1435 = vperm.xlu0 %4097, %v5341_v20  }
 0x36b   : > { %3883 = vmatprep.subr.mxu1 %v7200_v18 }
 0x36c   : > { %3884 = vmatpush3.msra.mxu1 %v7200_v18  ;;  %1430 = vperm.xlu1 %4094, %v5338_v60  }
 0x36d   : > { %3885 = vmatprep.subr.mxu1 %v7201_v22 }
 0x36e   : > { %3886 = vmatpush3.msra.mxu1 %v7201_v22  ;;  %4098 = vset.pattern.permute.xlu0 %v7191_v14 }
 0x36f   : > { %3887 = vmatprep.subr.mxu1 %v7202_v25 }
 0x370   : > { %3888 = vmatpush3.msra.mxu1 %v7202_v25  ;;  %4096 = vset.pattern.permute.xlu1 %v7062_v39  ;;  %v5625_v39 = vld [vmem:[%s7022_s2 + $0xa0] sm:$0xff] }
 0x371   : > { %3889 = vmatprep.subr.mxu1 %v7203_v27  ;;  %1456 = vperm.xlu1 %4096, %v5338_v60  }
 0x372   : > { %3890 = vmatpush3.msra.mxu1 %v7203_v27 }
 0x375   : > { %4099 = vset.pattern.permute.xlu1 %v7192_v38 }
 0x40d   : > { %v1053_v34 = vpop.f32.mrf.mxu1  ;;  %v1142_v37 = vpop.f32.mrf.mxu0 }
 0x40e   : > { %v3658_v45 = vmul.f32 -1.442695, %v1053_v34 }
 0x40f   : > { %v1055_v33 = vpop.f32.mrf.mxu1  ;;  %v1144_v8 = vpop.f32.mrf.mxu0 }
 0x410   : > { %4186 = vpow2.f32 %v3658_v45  ;;  %v3662_v0 = vmul.f32 -1.442695, %v1144_v8 }
 0x411   : > { %v1059_v48 = vpop.f32.mrf.mxu1  ;;  %v1148_v62 = vpop.f32.mrf.mxu0 }
 0x412   : > { %v3659_v11 = vmul.f32 -1.442695, %v1059_v48 }
 0x413   : > { %v1061_v31 = vpop.f32.mrf.mxu1  ;;  %v1150_v26 = vpop.f32.mrf.mxu0 }
 0x414   : > { %4188 = vpow2.f32 %v3659_v11  ;;  %v3663_v10 = vmul.f32 -1.442695, %v1150_v26 }
 0x415   : > { %v1065_v47 = vpop.f32.mrf.mxu1  ;;  %v1154_v32 = vpop.f32.mrf.mxu0 }
 0x416   : > { %v3660_v52 = vmul.f32 -1.442695, %v1065_v47 }
 0x417   : > { %v1067_v57 = vpop.f32.mrf.mxu1  ;;  %v1156_v61 = vpop.f32.mrf.mxu0 }
 0x418   : > { %4190 = vpow2.f32 %v3660_v52  ;;  %v3664_v35 = vmul.f32 -1.442695, %v1156_v61 }
 0x419   : > { %4192 = vpow2.f32 %v3662_v0 }
 0x41c   : > { %v1071_v41 = vpop.f32.mrf.mxu1  ;;  %v1160_v44 = vpop.f32.mrf.mxu0 }
 0x41d   : > { %v4187_v42 = vpop.eup %4186  ;;  %v3661_v58 = vmul.f32 -1.442695, %v1071_v41 }
 0x41e   : > { %v1177_v3 = vadd.f32 1.0, %v4187_v42  ;;  %v1162_v19 = vpop.f32.mrf.mxu0  ;;  %v1073_v11 = vpop.f32.mrf.mxu1 }
 0x41f   : > { %4194 = vpow2.f32 %v3661_v58  ;;  %v3665_v21 = vmul.f32 -1.442695, %v1162_v19  ;;  %v5375_v19 = vld [vmem:[%s7022_s2 + $0x1f8] sm:$0xff] }
 0x420   : > { %4196 = vrcp.f32 %v1177_v3  ;;  %1628 = vmatprep.subr.mxu1 %v5375_v19 }
 0x421   : > { %v4189_v17 = vpop.eup %4188  ;;  %4198 = vpow2.f32 %v3663_v10 }
 0x422   : > { %v1178_v23 = vadd.f32 1.0, %v4189_v17 }
 0x424   : > { %4200 = vrcp.f32 %v1178_v23 }
 0x425   : > { %v4191_v43 = vpop.eup %4190  ;;  %4202 = vpow2.f32 %v3664_v35 }
 0x426   : > { %v1179_v2 = vadd.f32 1.0, %v4191_v43  ;;  %v4193_v46 = vpop.eup %4192 }
 0x427   : > { %v1213_v9 = vadd.f32 1.0, %v4193_v46  ;;  %v5392_v46 = vld [vmem:[%s7022_s2 + $0x1c8] sm:$0xff] }
 0x428   : > { %4204 = vrcp.f32 %v1179_v2 }
 0x429   : > { %4206 = vpow2.f32 %v3665_v21  ;;  %v5387_v21 = vld [vmem:[%s7022_s2 + $0x1f0] sm:$0xff] }
 0x42a   : > { %7205 = vst [vmem:[#allocation8_spill] sm:$0xff] %v5387_v21 }
 0x42c   : > { %v4195_v6 = vpop.eup %4194 }
 0x42d   : > { %v4197_v13 = vpop.eup %4196  ;;  %v1180_v49 = vadd.f32 1.0, %v4195_v6  ;;  %v5397_v6 = vld [vmem:[%s7022_s2 + $0x1d8] sm:$0xff] }
 0x42e   : > { %v1189_v55 = vmul.f32 %v4197_v13, %v1055_v33  ;;  %v4199_v59 = vpop.eup %4198  ;;  %7206 = vst [vmem:[#allocation9_spill] sm:$0xff] %v5397_v6  ;;  %v5404_v13 = vld [vmem:[%s7022_s2 + $0x1c0] sm:$0xff] }
 0x42f   : > { %4208 = vrcp.f32 %v1180_v49  ;;  %v1214_v25 = vadd.f32 1.0, %v4199_v59  ;;  %v5409_v49 = vld [vmem:[%s7022_s2 + $0x1d0] sm:$0xff]  ;;  %v5421_v59 = vld [vmem:[%s7022_s2 + $0x1b8] sm:$0xff] }
 0x430   : > { %v1193_v53 = vadd.f32 %v1189_v55, %v1142_v37  ;;  %7207 = vst [vmem:[#allocation10_spill] sm:$0xff] %v5409_v49  ;;  %v5414_v55 = vld [vmem:[%s7022_s2 + $0x1a8] sm:$0xff]  ;;  %7208 = vst [vmem:[#allocation11_spill] sm:$0xff] %v5421_v59 }
 0x431   : > { %v4201_v12 = vpop.eup %4200 }
 0x432   : > { %4210 = vtanh.f32 %v1193_v53  ;;  %v1190_v16 = vmul.f32 %v4201_v12, %v1061_v31  ;;  %v4203_v18 = vpop.eup %4202  ;;  %v5426_v53 = vld [vmem:[%s7022_s2 + $0x1a0] sm:$0xff]  ;;  %v5438_v12 = vld [vmem:[%s7022_s2 + $0x188] sm:$0xff] }
 0x433   : > { %4212 = vrcp.f32 %v1213_v9  ;;  %v1215_v8 = vadd.f32 1.0, %v4203_v18  ;;  %v5431_v9 = vld [vmem:[%s7022_s2 + $0x1b0] sm:$0xff]  ;;  %v5450_v18 = vld [vmem:[%s7022_s2 + $0x180] sm:$0xff] }
 0x434   : > { %v1194_v22 = vadd.f32 %v1190_v16, %v1148_v62  ;;  %7209 = vst [vmem:[#allocation12_spill] sm:$0xff] %v5431_v9  ;;  %v5443_v16 = vld [vmem:[%s7022_s2 + $0x198] sm:$0xff] }
 0x435   : > { %v4205_v27 = vpop.eup %4204  ;;  %7210 = vst [vmem:[#allocation13_spill] sm:$0xff] %v5443_v16 }
 0x436   : > { %4214 = vtanh.f32 %v1194_v22  ;;  %v1191_v34 = vmul.f32 %v4205_v27, %v1067_v57  ;;  %v4207_v33 = vpop.eup %4206  ;;  %v5455_v22 = vld [vmem:[%s7022_s2 + $0x190] sm:$0xff]  ;;  %v5467_v27 = vld [vmem:[%s7022_s2 + $0x178] sm:$0xff] }
 0x437   : > { %4216 = vrcp.f32 %v1214_v25  ;;  %v1216_v26 = vadd.f32 1.0, %v4207_v33  ;;  %7211 = vst [vmem:[#allocation3_spill] sm:$0xff] %v5455_v22  ;;  %v5462_v25 = vld [vmem:[%s7022_s2 + $0x168] sm:$0xff]  ;;  %7212 = vst [vmem:[#allocation2_spill] sm:$0xff] %v5467_v27  ;;  %v5491_v33 = vld [vmem:[%s7022_s2 + $0x158] sm:$0xff] }
 0x438   : > { %v1195_v45 = vadd.f32 %v1191_v34, %v1154_v32  ;;  %v5474_v34 = vld [vmem:[%s7022_s2 + $0x160] sm:$0xff]  ;;  %7214 = vst [vmem:[#allocation5_spill] sm:$0xff] %v5491_v33 }
 0x43a   : > { %4218 = vtanh.f32 %v1195_v45  ;;  %v5479_v45 = vld [vmem:[%s7022_s2 + $0x170] sm:$0xff] }
 0x43b   : > { %4220 = vrcp.f32 %v1215_v8  ;;  %7213 = vst [vmem:[#allocation4_spill] sm:$0xff] %v5479_v45  ;;  %v5486_v8 = vld [vmem:[%s7022_s2 + $0x148] sm:$0xff] }
 0x43c   : > { %v4209_v48 = vpop.eup %4208 }
 0x43d   : > { %v1192_v37 = vmul.f32 %v4209_v48, %v1073_v11  ;;  %v5498_v48 = vld [vmem:[%s7022_s2 + $0x140] sm:$0xff]  ;;  %v5503_v11 = vld [vmem:[%s7022_s2 + $0x150] sm:$0xff] }
 0x43e   : > { %7215 = vst [vmem:[#allocation14_spill] sm:$0xff] %v5503_v11 }
 0x43f   : > { %v4211_v47 = vpop.eup %4210  ;;  %v1196_v52 = vadd.f32 %v1192_v37, %v1160_v44  ;;  %v5510_v37 = vld [vmem:[%s7022_s2 + $0x128] sm:$0xff] }
 0x440   : > { %v1225_v31 = vsub.f32 %v5266_v51, %v4211_v47  ;;  %v4213_v0 = vpop.eup %4212 }
 0x441   : > { %4222 = vtanh.f32 %v1196_v52  ;;  %v5522_v52 = vld [vmem:[%s7022_s2 + $0x120] sm:$0xff] }
 0x442   : > { %v1229_v62 = vmul.f32 %v4213_v0, %v1225_v31  ;;  %4224 = vrcp.f32 %v1216_v26  ;;  %v5527_v26 = vld [vmem:[%s7022_s2 + $0x130] sm:$0xff]  ;;  %v5538_v31 = vld [vmem:[%s7022_s2 + $0x108] sm:$0xff]  ;;  %v5543_v0 = vld [vmem:[%s7022_s2 + $0x118] sm:$0xff] }
 0x443   : > { %v4215_v41 = vpop.eup %4214  ;;  %7217 = vst [vmem:[#allocation16_spill] sm:$0xff] %v5527_v26  ;;  %7218 = vst [vmem:[#allocation17_spill] sm:$0xff] %v5543_v0 }
 0x444   : > { %v5351_v57 = vadd.f32 %v4211_v47, %v1229_v62  ;;  %v1226_v32 = vsub.f32 %v5276_v24, %v4215_v41  ;;  %v4217_v42 = vpop.eup %4216  ;;  %v5515_v47 = vld [vmem:[%s7022_s2 + $0x138] sm:$0xff]  ;;  %v5550_v62 = vld [vmem:[%s7022_s2 + $0x100] sm:$0xff] }
 0x445   : > { %7216 = vst [vmem:[#allocation15_spill] sm:$0xff] %v5515_v47 }
 0x446   : > { %3891 = vmatprep.mubr.f32.mxu1 %v5351_v57  ;;  %v1230_v58 = vmul.f32 %v4217_v42, %v1226_v32  ;;  %v5562_v42 = vld [vmem:[%s7022_s2 + $0xe8] sm:$0xff] }
 0x447   : > { %v4219_v3 = vpop.eup %4218 }
 0x448   : > { %v5355_v10 = vadd.f32 %v4215_v41, %v1230_v58  ;;  %v1227_v61 = vsub.f32 %v5287_v56, %v4219_v3  ;;  %v4221_v17 = vpop.eup %4220  ;;  %v5370_v56 = vld [vmem:[%s7022_s2 + $0x1e8] sm:$0xff]  ;;  %v5555_v41 = vld [vmem:[%s7022_s2 + $0x110] sm:$0xff]  ;;  %v5567_v58 = vld [vmem:[%s7022_s2 + $0xf8] sm:$0xff] }
 0x449   : > { %1539 = vmatprep.subr.mxu0 %v5370_v56  ;;  %7219 = vst [vmem:[#allocation18_spill] sm:$0xff] %v5555_v41  ;;  %7220 = vst [vmem:[#allocation19_spill] sm:$0xff] %v5567_v58 }
 0x44a   : > { %3892 = vmatmul.mubr.f32.vlgmr.msra.gmra.mxu1 %v5355_v10  ;;  %v1231_v51 = vmul.f32 %v4221_v17, %v1227_v61  ;;  %v5577_v61 = vld [vmem:[%s7022_s2 + $0xe0] sm:$0xff]  ;;  %v5582_v17 = vld [vmem:[%s7022_s2 + $0xf0] sm:$0xff] }
 0x44b   : > { %1629 = vmatpush1.msra.mxu1 %v5387_v21  ;;  %7222 = vst [vmem:[#allocation21_spill] sm:$0xff] %v5582_v17 }
 0x44c   : > { %v5359_v23 = vadd.f32 %v4219_v3, %v1231_v51  ;;  %1630 = vmatprep.subr.mxu1 %v5397_v6  ;;  %v5594_v51 = vld [vmem:[%s7022_s2 + $0xd8] sm:$0xff] }
 0x44d   : > { %1631 = vmatpush1.msra.mxu1 %v5409_v49  ;;  %7223 = vst [vmem:[#allocation22_spill] sm:$0xff] %v5594_v51 }
 0x44e   : > { %v4223_v35 = vpop.eup %4222  ;;  %3894 = vmatprep.mubr.f32.mxu1 %v5359_v23  ;;  %1632 = vmatprep.subr.mxu1 %v5421_v59 }
 0x44f   : > { %v1228_v24 = vsub.f32 %v5301_v29, %v4223_v35  ;;  %v4225_v44 = vpop.eup %4224  ;;  %v5380_v29 = vld [vmem:[%s7022_s2 + $0x1e0] sm:$0xff]  ;;  %1633 = vmatpush1.msra.mxu1 %v5431_v9 }
 0x450   : > { %1540 = vmatpush1.msra.mxu0 %v5380_v29  ;;  %1634 = vmatprep.subr.mxu1 %v5443_v16 }
 0x451   : > { %v1232_v43 = vmul.f32 %v4225_v44, %v1228_v24  ;;  %1541 = vmatprep.subr.mxu0 %v5392_v46  ;;  %1635 = vmatpush1.msra.mxu1 %v5455_v22  ;;  %v5601_v24 = vld [vmem:[%s7022_s2 + $0xc0] sm:$0xff]  ;;  %v5606_v44 = vld [vmem:[%s7022_s2 + $0xd0] sm:$0xff] }
 0x452   : > { %1542 = vmatpush1.msra.mxu0 %v5404_v13  ;;  %1636 = vmatprep.subr.mxu1 %v5467_v27  ;;  %7224 = vst [vmem:[#allocation23_spill] sm:$0xff] %v5606_v44 }
 0x453   : > { %v5363_v2 = vadd.f32 %v4223_v35, %v1232_v43  ;;  %1543 = vmatprep.subr.mxu0 %v5414_v55  ;;  %1637 = vmatpush1.msra.mxu1 %v5479_v45  ;;  %v5613_v43 = vld [vmem:[%s7022_s2 + $0xa8] sm:$0xff] }
 0x454   : > { %1544 = vmatpush1.msra.mxu0 %v5426_v53  ;;  %1638 = vmatprep.subr.mxu1 %v5491_v33  ;;  %v1453_v33 = vpop.permute.xlu0 %1452 }
 0x455   : > { %3895 = vmatmul.mubr.f32.gmra.mxu1 %v5363_v2  ;;  %1545 = vmatprep.subr.mxu0 %v5438_v12 }
 0x456   : > { %1692 = vmatprep.mubr.f32.mxu1 %v7174_v7  ;;  %1546 = vmatpush1.msra.mxu0 %v5450_v18 }
 0x457   : > { %1547 = vmatprep.subr.mxu0 %v5462_v25  ;;  %1639 = vmatpush1.msra.mxu1 %v5503_v11  ;;  %v7240_v11 = vmov 9  }
 0x458   : > { %1548 = vmatpush1.msra.mxu0 %v5474_v34  ;;  %1640 = vmatprep.subr.mxu1 %v5515_v47  ;;  %v5726_v47 = vld [vmem:[%s7022_s2 + $0x38] sm:$0xff]  ;;  %v1436_v45 = vpop.permute.xlu0 %1435 }
 0x459   : > { %1549 = vmatprep.subr.mxu0 %v5486_v8  ;;  %1641 = vmatpush1.msra.mxu1 %v5527_v26  ;;  %v5709_v26 = vld [vmem:[%s7022_s2 + $0x50] sm:$0xff]  ;;  %7235 = vst [vmem:[#allocation34_spill] sm:$0xff] %v5726_v47 }
 0x45a   : > { %1550 = vmatpush1.msra.mxu0 %v5498_v48  ;;  %1642 = vmatprep.subr.mxu1 %v5543_v0  ;;  %7233 = vst [vmem:[#allocation32_spill] sm:$0xff] %v5709_v26 }
 0x45b   : > { %1551 = vmatprep.subr.mxu0 %v5510_v37  ;;  %1643 = vmatpush1.msra.mxu1 %v5555_v41  ;;  %v5702_v41 = vld [vmem:[%s7022_s2 + $0x40] sm:$0xff] }
 0x45c   : > { %1552 = vmatpush1.msra.mxu0 %v5522_v52  ;;  %1644 = vmatprep.subr.mxu1 %v5567_v58 }
 0x45d   : > { %1553 = vmatprep.subr.mxu0 %v5538_v31  ;;  %1645 = vmatpush1.msra.mxu1 %v5582_v17  ;;  %v5678_v17 = vld [vmem:[%s7022_s2 + $0x60] sm:$0xff] }
 0x45e   : > { %1554 = vmatpush1.msra.mxu0 %v5550_v62  ;;  %1646 = vmatprep.subr.mxu1 %v5594_v51  ;;  %v5671_v51 = vld [vmem:[%s7022_s2 + $0x78] sm:$0xff] }
 0x45f   : > { %1555 = vmatprep.subr.mxu0 %v5562_v42  ;;  %1647 = vmatpush1.msra.mxu1 %v5606_v44  ;;  %v5664_v44 = vld [vmem:[%s7022_s2 + $0x68] sm:$0xff]  ;;  %7230 = vst [vmem:[#allocation29_spill] sm:$0xff] %v5671_v51 }
 0x460   : > { %1556 = vmatpush1.msra.mxu0 %v5577_v61 }
 0x50a   : > { %v3893_v32 = vpop.f32.mrf.mxu1 }
 0x50b   : > { %v5570_v3 = vadd.f32 %v3893_v32, %v5202_v4  ;;  %v5589_v4 = vld [vmem:[%s7022_s2 + $0xc8] sm:$0xff]  ;;  %v5618_v32 = vld [vmem:[%s7022_s2 + $0xb8] sm:$0xff] }
 0x50c   : > { %v1319_v35 = vpop.f32.mrf.mxu1  ;;  %1557 = vmatprep.subr.mxu0 %v5589_v4  ;;  %7225 = vst [vmem:[#allocation24_spill] sm:$0xff] %v5618_v32  ;;  %1648 = vmatprep.subr.mxu1 %v5618_v32  ;;  %v5659_v32 = vld [vmem:[%s7022_s2 + $0x90] sm:$0xff] }
 0x50d   : > { %7221 = vst [vmem:[#allocation20_spill] sm:$0xff] %v5570_v3  ;;  %1400 = vperm.xlu1 %4099, %v5570_v3   ;;  %1374 = vperm.xlu0 %4098, %v5570_v3   ;;  %v5628_v30 = vadd.f32 %v1319_v35, %v5211_v1  ;;  %v5640_v3 = vld [vmem:[%s7022_s2 + $0x88] sm:$0xff]  ;;  %v5647_v1 = vld [vmem:[%s7022_s2 + $0x98] sm:$0xff]  ;;  %v5652_v35 = vld [vmem:[%s7022_s2 + $0x80] sm:$0xff] }
 0x50e   : > { %1558 = vmatpush1.msra.mxu0 %v5601_v24  ;;  %7228 = vst [vmem:[#allocation27_spill] sm:$0xff] %v5647_v1  ;;  %7229 = vst [vmem:[#allocation28_spill] sm:$0xff] %v5659_v32  ;;  %1649 = vmatpush1.msra.mxu1 %v5635_v63  ;;  %v5685_v63 = vld [vmem:[%s7022_s2 + $0x70] sm:$0xff] }
 0x50f   : > { %7226 = vst [vmem:[#allocation25_spill] sm:$0xff] %v5628_v30  ;;  %1559 = vmatprep.subr.mxu0 %v5613_v43  ;;  %1650 = vmatprep.subr.mxu1 %v5647_v1  ;;  %7231 = vst [vmem:[#allocation30_spill] sm:$0xff] %v5685_v63  ;;  %v5690_v1 = vld [vmem:[%s7022_s2 + $0x48] sm:$0xff] }
 0x510   : > { %1560 = vmatpush1.msra.mxu0 %v5625_v39  ;;  %1651 = vmatpush1.msra.mxu1 %v5659_v32  ;;  %v5697_v32 = vld [vmem:[%s7022_s2 + $0x58] sm:$0xff] }
 0x511   : > { %4100 = vset.pattern.permute.xlu1 %v7191_v14  ;;  %4105 = vset.pattern.permute.xlu0 %v7192_v38  ;;  %7232 = vst [vmem:[#allocation31_spill] sm:$0xff] %v5697_v32 }
 0x512   : > { %1369 = vperm.xlu1 %4100, %v5628_v30   ;;  %1561 = vmatprep.subr.mxu0 %v5640_v3 }
 0x513   : > { %1562 = vmatpush1.msra.mxu0 %v5652_v35  ;;  %1652 = vmatprep.subr.mxu1 %v5671_v51 }
 0x514   : > { %1563 = vmatprep.subr.mxu0 %v5664_v44  ;;  %1653 = vmatpush1.msra.mxu1 %v5685_v63  ;;  %v5765_v63 = vld [vmem:[%s7022_s2] sm:$0xff] }
 0x515   : > { %v3896_v58 = vpop.f32.mrf.mxu1  ;;  %1564 = vmatpush1.msra.mxu0 %v5678_v17  ;;  %1654 = vmatprep.subr.mxu1 %v5697_v32  ;;  %v5741_v32 = vld [vmem:[%s7022_s2 + $0x30] sm:$0xff] }
 0x516   : > { %4101 = vset.pattern.permute.xlu1 %v7192_v38  ;;  %1565 = vmatprep.subr.mxu0 %v5690_v1  ;;  %7237 = vst [vmem:[#allocation36_spill] sm:$0xff] %v5741_v32 }
 0x517   : > { %1396 = vperm.xlu1 %4101, %v5628_v30   ;;  %v1329_v0 = vpop.f32.mrf.mxu1  ;;  %v5719_v30 = vld [vmem:[%s7022_s2 + $0x28] sm:$0xff]  ;;  %1566 = vmatpush1.msra.mxu0 %v5702_v41 }
 0x518   : > { %v5712_v51 = vadd.f32 %v1329_v0, %v5227_v15  ;;  %v5729_v15 = vadd.f32 %v3896_v58, %v5223_v5  ;;  %1655 = vmatpush1.msra.mxu1 %v5709_v26  ;;  %v5736_v0 = vld [vmem:[%s7022_s2 + $0x20] sm:$0xff]  ;;  %1567 = vmatprep.subr.mxu0 %v5719_v30  ;;  %v5748_v5 = vld [vmem:[%s7022_s2 + $0x8] sm:$0xff]  ;;  %v5752_v58 = vld [vmem:[%s4471_s29 + $0x38] sm:$0xff] }
 0x519   : > { %7238 = vst [vmem:[#allocation37_spill] sm:$0xff] %v5752_v58  ;;  %1656 = vmatprep.subr.mxu1 %v5726_v47  ;;  %v5758_v26 = vld [vmem:[%s7022_s2 + $0x18] sm:$0xff]  ;;  %1568 = vmatpush1.msra.mxu0 %v5736_v0  ;;  %v5772_v47 = vld [vmem:[%s7022_s2 + $0x10] sm:$0xff] }
 0x51a   : > { %7234 = vst [vmem:[#allocation33_spill] sm:$0xff] %v5712_v51  ;;  %7236 = vst [vmem:[#allocation35_spill] sm:$0xff] %v5729_v15  ;;  %1404 = vperm.xlu0 %4105, %v5712_v51   ;;  %1657 = vmatpush1.msra.mxu1 %v5741_v32  ;;  %v1426_v32 = vpop.permute.xlu1 %1425 }
 0x51b   : > { %4102 = vset.pattern.permute.xlu1 %v7191_v14  ;;  %7239 = vst [vmem:[#allocation38_spill] sm:$0xff] %v5758_v26  ;;  %1569 = vmatprep.subr.mxu0 %v5748_v5  ;;  %7241 = vst [vmem:[#allocation39_spill] sm:$0xff] %v5772_v47  ;;  %v1443_v59 = vmul.f32 %v7196_v40, %v1426_v32 }
 0x51c   : > { %1384 = vperm.xlu1 %4102, %v5729_v15   ;;  %1658 = vmatprep.subr.mxu1 %v5758_v26 }
 0x51d   : > { %1570 = vmatpush1.msra.mxu0 %v5765_v63  ;;  %1659 = vmatpush1.msra.mxu1 %v5772_v47 }
 0x51e   : > { %4106 = vset.pattern.permute.xlu0 %v7240_v11  ;;  %2091 = vmatprep.subr.mxu1 %v5370_v56  ;;  %v7242_v11 = vmov 10   ;;  %v1431_v26 = vpop.permute.xlu1 %1430 }
 0x51f   : > { %1440 = vperm.xlu0 %4106, %v5752_v58   ;;  %v1444_v21 = vmul.f32 %v7196_v40, %v1431_v26 }
 0x520   : > { %1379 = vperm.xlu1 %4102, %v5712_v51  }
 0x522   : > { %v1457_v51 = vpop.permute.xlu1 %1456 }
 0x524   : > { %4103 = vset.pattern.permute.xlu1 %v7192_v38 }
 0x525   : > { %1408 = vperm.xlu1 %4103, %v5729_v15  }
 0x529   : > { %4104 = vset.pattern.permute.xlu1 %v7242_v11 }
 0x52a   : > { %1460 = vperm.xlu1 %4104, %v5341_v20  }
 0x52e   : > { %1464 = vperm.xlu1 %4104, %v5752_v58  }
 0x588   : > { %v1401_v27 = vpop.permute.xlu1 %1400  ;;  %v1375_v22 = vpop.permute.xlu0 %1374 }
 0x589   : > { %v1388_v47 = vmul.f32 %v5250_v50, %v1375_v22  ;;  %v1412_v11 = vmul.f32 %v5255_v36, %v1401_v27  ;;  %v1467_v22 = vmul.f32 %v7197_v54, %v1453_v33 }
 0x58b   : > { %v1392_v15 = vadd.f32 %v1388_v47, %v5355_v10  ;;  %v1468_v47 = vmul.f32 %v7197_v54, %v1457_v51 }
 0x58d   : > { %v1370_v56 = vpop.permute.xlu1 %1369  ;;  %v1416_v49 = vadd.f32 %v1412_v11, %v1392_v15 }
 0x58e   : > { %v1387_v38 = vmul.f32 %v5250_v50, %v1370_v56 }
 0x58f   : > { %v1448_v10 = vadd.f32 %v1444_v21, %v1416_v49 }
 0x590   : > { %v1391_v9 = vadd.f32 %v1387_v38, %v5351_v57 }
 0x592   : > { %v1397_v16 = vpop.permute.xlu1 %1396 }
 0x593   : > { %v1411_v58 = vmul.f32 %v5255_v36, %v1397_v16  ;;  %v5802_v16 = vadd.f32 %v1468_v47, %v1448_v10 }
 0x595   : > { %v1415_v6 = vadd.f32 %v1411_v58, %v1391_v9  ;;  %v1405_v9 = vpop.permute.xlu0 %1404 }
 0x596   : > { %v1413_v21 = vmul.f32 %v5255_v36, %v1405_v9 }
 0x597   : > { %v1447_v14 = vadd.f32 %v1443_v59, %v1415_v6  ;;  %v1385_v20 = vpop.permute.xlu1 %1384  ;;  %v1445_v59 = vmul.f32 %v7196_v40, %v1436_v45  ;;  %v5898_v45 = vld [vmem:[%s7023_s3 + $0x50] sm:$0xff] }
 0x598   : > { %v1390_v6 = vmul.f32 %v5250_v50, %v1385_v20 }
 0x599   : > { %v5794_v56 = vadd.f32 %v1467_v22, %v1447_v14 }
 0x59a   : > { %v1394_v27 = vadd.f32 %v1390_v6, %v5363_v2 }
 0x59b   : > { %1604 = vmatmul.mubr.f32.vlgmr.msra.gmra.mxu0 %v5794_v56  ;;  %1693 = vmatmul.mubr.f32.vlgmr.msra.gmra.mxu1 %v5794_v56  ;;  %v1380_v38 = vpop.permute.xlu1 %1379 }
 0x59c   : > { %v1389_v57 = vmul.f32 %v5250_v50, %v1380_v38  ;;  %1609 = vmatprep.mubr.f32.mxu0 %v7174_v7  ;;  %1698 = vmatprep.mubr.f32.mxu1 %v7174_v7 }
 0x59d   : > { %2092 = vmatpush1.msra.mxu1 %v5380_v29 }
 0x59e   : > { %v1393_v14 = vadd.f32 %v1389_v57, %v5359_v23  ;;  %2093 = vmatprep.subr.mxu1 %v5392_v46  ;;  %v1441_v46 = vpop.permute.xlu0 %1440 }
 0x59f   : > { %1610 = vmatmul.mubr.f32.gmra.mxu0 %v5802_v16  ;;  %1699 = vmatmul.mubr.f32.gmra.mxu1 %v5802_v16 }
 0x5a0   : > { %v1409_v49 = vpop.permute.xlu1 %1408  ;;  %1615 = vmatprep.mubr.f32.mxu0 %v7174_v7  ;;  %1704 = vmatprep.mubr.f32.mxu1 %v7174_v7  ;;  %v1417_v29 = vadd.f32 %v1413_v21, %v1393_v14 }
 0x5a1   : > { %2094 = vmatpush1.msra.mxu1 %v5404_v13  ;;  %v1414_v23 = vmul.f32 %v5255_v36, %v1409_v49  ;;  %v1446_v13 = vmul.f32 %v7196_v40, %v1441_v46 }
 0x5a2   : > { %2095 = vmatprep.subr.mxu1 %v5414_v55  ;;  %v1449_v26 = vadd.f32 %v1445_v59, %v1417_v29 }
 0x5a3   : > { %2096 = vmatpush1.msra.mxu1 %v5426_v53  ;;  %v1418_v33 = vadd.f32 %v1414_v23, %v1394_v27 }
 0x5a4   : > { %2097 = vmatprep.subr.mxu1 %v5438_v12 }
 0x5a5   : > { %v1461_v20 = vpop.permute.xlu1 %1460  ;;  %2098 = vmatpush1.msra.mxu1 %v5450_v18  ;;  %v1450_v53 = vadd.f32 %v1446_v13, %v1418_v33 }
 0x5a6   : > { %v1469_v51 = vmul.f32 %v7197_v54, %v1461_v20  ;;  %2099 = vmatprep.subr.mxu1 %v5462_v25  ;;  %v5884_v25 = vld [vmem:[%s7023_s3 + $0x60] sm:$0xff] }
 0x5a7   : > { %2100 = vmatpush1.msra.mxu1 %v5474_v34  ;;  %v5891_v34 = vld [vmem:[%s7023_s3 + $0x58] sm:$0xff] }
 0x5a8   : > { %v5825_v55 = vadd.f32 %v1469_v51, %v1449_v26  ;;  %2101 = vmatprep.subr.mxu1 %v5486_v8  ;;  %v5905_v8 = vld [vmem:[%s7023_s3 + $0x48] sm:$0xff] }
 0x5a9   : > { %v1465_v2 = vpop.permute.xlu1 %1464  ;;  %2102 = vmatpush1.msra.mxu1 %v5498_v48  ;;  %v5912_v48 = vld [vmem:[%s7023_s3 + $0x40] sm:$0xff] }
 0x5aa   : > { %v1470_v12 = vmul.f32 %v7197_v54, %v1465_v2  ;;  %1616 = vmatmul.mubr.f32.gmra.mxu0 %v5825_v55  ;;  %1705 = vmatmul.mubr.f32.gmra.mxu1 %v5825_v55 }
 0x5ab   : > { %1621 = vmatprep.mubr.f32.mxu0 %v7174_v7  ;;  %1710 = vmatprep.mubr.f32.mxu1 %v7174_v7 }
 0x5ac   : > { %v5834_v18 = vadd.f32 %v1470_v12, %v1450_v53  ;;  %2103 = vmatprep.subr.mxu1 %v5510_v37  ;;  %v5919_v37 = vld [vmem:[%s7023_s3 + $0x38] sm:$0xff] }
 0x5ad   : > { %2104 = vmatpush1.msra.mxu1 %v5522_v52  ;;  %v5926_v52 = vld [vmem:[%s7023_s3 + $0x30] sm:$0xff] }
 0x5ae   : > { %1622 = vmatmul.mubr.f32.gmra.mxu0 %v5834_v18  ;;  %1711 = vmatmul.mubr.f32.gmra.mxu1 %v5834_v18 }
 0x5af   : > { %2105 = vmatprep.subr.mxu1 %v5538_v31  ;;  %2155 = vmatprep.mubr.f32.mxu1 %v7174_v7  ;;  %v5933_v31 = vld [vmem:[%s7023_s3 + $0x28] sm:$0xff] }
 0x5b0   : > { %2106 = vmatpush1.msra.mxu1 %v5550_v62  ;;  %v5940_v62 = vld [vmem:[%s7023_s3 + $0x20] sm:$0xff] }
 0x5b1   : > { %2107 = vmatprep.subr.mxu1 %v5562_v42  ;;  %v5954_v42 = vld [vmem:[%s7023_s3 + $0x10] sm:$0xff] }
 0x5b2   : > { %2108 = vmatpush1.msra.mxu1 %v5577_v61  ;;  %v5967_v61 = vld [vmem:[%s7023_s3] sm:$0xff] }
 0x5b3   : > { %2109 = vmatprep.subr.mxu1 %v5589_v4  ;;  %v4406_v4 = vmov 11  }
 0x5b4   : > { %2110 = vmatpush1.msra.mxu1 %v5601_v24  ;;  %4107 = vset.pattern.permute.xlu0 %v4406_v4  ;;  %v7243_v24 = vld [vmem:[#allocation7_spill] sm:$0xff] }
 0x5b5   : > { %2111 = vmatprep.subr.mxu1 %v5613_v43  ;;  %1977 = vperm.xlu0 %4107, %v5331_v28  }
 0x5b6   : > { %2112 = vmatpush1.msra.mxu1 %v5625_v39  ;;  %v5862_v39 = vld [vmem:[%s7023_s3 + $0x78] sm:$0xff] }
 0x5b7   : > { %2113 = vmatprep.subr.mxu1 %v5640_v3  ;;  %3897 = vmatprep.subr.mxu0 %v5862_v39  ;;  %v5961_v3 = vld [vmem:[%s7023_s3 + $0x8] sm:$0xff] }
 0x5b8   : > { %2114 = vmatpush1.msra.mxu1 %v5652_v35  ;;  %3898 = vmatpush3.msra.mxu0 %v5862_v39 }
 0x5b9   : > { %2115 = vmatprep.subr.mxu1 %v5664_v44 }
 0x5ba   : > { %2116 = vmatpush1.msra.mxu1 %v5678_v17  ;;  %v4405_v17 = vmov 12  }
 0x5bb   : > { %2117 = vmatprep.subr.mxu1 %v5690_v1  ;;  %4108 = vset.pattern.permute.xlu1 %v4405_v17 }
 0x5bc   : > { %2118 = vmatpush1.msra.mxu1 %v5702_v41  ;;  %v5947_v41 = vld [vmem:[%s7023_s3 + $0x18] sm:$0xff]  ;;  %2004 = vperm.xlu1 %4108, %v5331_v28  }
 0x5bd   : > { %2119 = vmatprep.subr.mxu1 %v5719_v30  ;;  %v5870_v30 = vld [vmem:[%s7023_s3 + $0x70] sm:$0xff]  ;;  %4110 = vset.pattern.permute.xlu0 %v4405_v17 }
 0x5be   : > { %2120 = vmatpush1.msra.mxu1 %v5736_v0  ;;  %3899 = vmatprep.subr.mxu0 %v5870_v30 }
 0x5bf   : > { %2121 = vmatprep.subr.mxu1 %v5748_v5  ;;  %3900 = vmatpush3.msra.mxu0 %v5870_v30 }
 0x5c0   : > { %2122 = vmatpush1.msra.mxu1 %v5765_v63  ;;  %v5877_v63 = vld [vmem:[%s7023_s3 + $0x68] sm:$0xff]  ;;  %4109 = vset.pattern.permute.xlu1 %v4406_v4 }
 0x5c1   : > { %3935 = vmatprep.subr.mxu1 %v5862_v39  ;;  %3901 = vmatprep.subr.mxu0 %v5877_v63 }
 0x5c2   : > { %3902 = vmatpush3.msra.mxu0 %v5877_v63  ;;  %1982 = vperm.xlu1 %4109, %v5338_v60  }
 0x5c3   : > { %3903 = vmatprep.subr.mxu0 %v5884_v25  ;;  %2008 = vperm.xlu0 %4110, %v5338_v60  }
 0x5c4   : > { %3904 = vmatpush3.msra.mxu0 %v5884_v25 }
 0x5c5   : > { %3905 = vmatprep.subr.mxu0 %v5891_v34 }
 0x5c6   : > { %3906 = vmatpush3.msra.mxu0 %v5891_v34  ;;  %1987 = vperm.xlu1 %4109, %v7243_v24  }
 0x5c7   : > { %3907 = vmatprep.subr.mxu0 %v5898_v45 }
 0x5c8   : > { %3908 = vmatpush3.msra.mxu0 %v5898_v45 }
 0x5c9   : > { %3909 = vmatprep.subr.mxu0 %v5905_v8 }
 0x5ca   : > { %3910 = vmatpush3.msra.mxu0 %v5905_v8 }
 0x5cb   : > { %3911 = vmatprep.subr.mxu0 %v5912_v48 }
 0x5cc   : > { %3912 = vmatpush3.msra.mxu0 %v5912_v48 }
 0x5cd   : > { %3913 = vmatprep.subr.mxu0 %v5919_v37 }
 0x5ce   : > { %3914 = vmatpush3.msra.mxu0 %v5919_v37 }
 0x5cf   : > { %3915 = vmatprep.subr.mxu0 %v5926_v52 }
 0x5d0   : > { %3916 = vmatpush3.msra.mxu0 %v5926_v52 }
 0x5d1   : > { %3917 = vmatprep.subr.mxu0 %v5933_v31 }
 0x5d2   : > { %3918 = vmatpush3.msra.mxu0 %v5933_v31 }
 0x5d3   : > { %3919 = vmatprep.subr.mxu0 %v5940_v62 }
 0x5d4   : > { %3920 = vmatpush3.msra.mxu0 %v5940_v62 }
 0x5d5   : > { %3921 = vmatprep.subr.mxu0 %v5947_v41 }
 0x5d6   : > { %3922 = vmatpush3.msra.mxu0 %v5947_v41 }
 0x5d7   : > { %3923 = vmatprep.subr.mxu0 %v5954_v42 }
 0x5d8   : > { %3924 = vmatpush3.msra.mxu0 %v5954_v42 }
 0x5d9   : > { %3925 = vmatprep.subr.mxu0 %v5961_v3 }
 0x5da   : > { %3926 = vmatpush3.msra.mxu0 %v5961_v3 }
 0x5db   : > { %3927 = vmatprep.subr.mxu0 %v5967_v61 }
 0x5dc   : > { %3928 = vmatpush3.msra.mxu0 %v5967_v61 }
 0x5dd   : > { %2180 = vmatprep.subr.mxu0 %v5375_v19  ;;  %v7244_v19 = vmov 0  }
 0x5de   : > { %4113 = vset.pattern.permute.xlu0 %v7244_v19  ;;  %4111 = vset.pattern.permute.xlu1 %v7244_v19 }
 0x65b   : > { %v1605_v44 = vpop.f32.mrf.mxu0  ;;  %v1694_v32 = vpop.f32.mrf.mxu1 }
 0x65c   : > { %v3666_v43 = vmul.f32 -1.442695, %v1605_v44 }
 0x65d   : > { %v1607_v1 = vpop.f32.mrf.mxu0  ;;  %v1696_v15 = vpop.f32.mrf.mxu1 }
 0x65e   : > { %4226 = vpow2.f32 %v3666_v43  ;;  %v3670_v5 = vmul.f32 -1.442695, %v1696_v15 }
 0x65f   : > { %v1611_v28 = vpop.f32.mrf.mxu0  ;;  %v1700_v0 = vpop.f32.mrf.mxu1 }
 0x660   : > { %v3667_v35 = vmul.f32 -1.442695, %v1611_v28 }
 0x661   : > { %v1613_v58 = vpop.f32.mrf.mxu0  ;;  %v1702_v11 = vpop.f32.mrf.mxu1 }
 0x662   : > { %4228 = vpow2.f32 %v3667_v35  ;;  %v3671_v38 = vmul.f32 -1.442695, %v1702_v11 }
 0x663   : > { %4230 = vpow2.f32 %v3670_v5 }
 0x66a   : > { %v1617_v60 = vpop.f32.mrf.mxu0  ;;  %v1706_v57 = vpop.f32.mrf.mxu1 }
 0x66b   : > { %v4227_v22 = vpop.eup %4226  ;;  %v3668_v10 = vmul.f32 -1.442695, %v1617_v60 }
 0x66c   : > { %v1729_v47 = vadd.f32 1.0, %v4227_v22  ;;  %v1619_v9 = vpop.f32.mrf.mxu0  ;;  %v1708_v29 = vpop.f32.mrf.mxu1 }
 0x66d   : > { %4232 = vpow2.f32 %v3668_v10  ;;  %v3672_v46 = vmul.f32 -1.442695, %v1708_v29 }
 0x66e   : > { %4234 = vrcp.f32 %v1729_v47  ;;  %v1623_v14 = vpop.f32.mrf.mxu0  ;;  %v1712_v23 = vpop.f32.mrf.mxu1 }
 0x66f   : > { %v4229_v21 = vpop.eup %4228  ;;  %v3669_v6 = vmul.f32 -1.442695, %v1623_v14  ;;  %4236 = vpow2.f32 %v3671_v38 }
 0x670   : > { %v1730_v49 = vadd.f32 1.0, %v4229_v21  ;;  %v1714_v59 = vpop.f32.mrf.mxu1  ;;  %v4231_v27 = vpop.eup %4230 }
 0x671   : > { %4238 = vpow2.f32 %v3669_v6  ;;  %v3673_v26 = vmul.f32 -1.442695, %v1714_v59  ;;  %v1765_v24 = vadd.f32 1.0, %v4231_v27  ;;  %v1625_v38 = vpop.f32.mrf.mxu0 }
 0x672   : > { %4240 = vrcp.f32 %v1730_v49 }
 0x673   : > { %4242 = vpow2.f32 %v3672_v46 }
 0x67a   : > { %v4233_v20 = vpop.eup %4232 }
 0x67b   : > { %v4235_v33 = vpop.eup %4234  ;;  %v1731_v13 = vadd.f32 1.0, %v4233_v20  ;;  %v7246_v20 = vld [vmem:[#allocation9_spill] sm:$0xff] }
 0x67c   : > { %v1741_v51 = vmul.f32 %v4235_v33, %v1607_v1  ;;  %v4237_v2 = vpop.eup %4236 }
 0x67d   : > { %4244 = vrcp.f32 %v1731_v13  ;;  %v1766_v15 = vadd.f32 1.0, %v4237_v2  ;;  %v7248_v13 = vld [vmem:[#allocation11_spill] sm:$0xff]  ;;  %v7250_v2 = vld [vmem:[#allocation13_spill] sm:$0xff] }
 0x67e   : > { %v4239_v53 = vpop.eup %4238  ;;  %v1745_v12 = vadd.f32 %v1741_v51, %v1694_v32  ;;  %4246 = vpow2.f32 %v3673_v26  ;;  %v7249_v26 = vld [vmem:[#allocation12_spill] sm:$0xff] }
 0x67f   : > { %v4241_v44 = vpop.eup %4240  ;;  %v1732_v43 = vadd.f32 1.0, %v4239_v53 }
 0x680   : > { %4248 = vtanh.f32 %v1745_v12  ;;  %v1742_v28 = vmul.f32 %v4241_v44, %v1613_v58  ;;  %v4243_v5 = vpop.eup %4242  ;;  %v7251_v12 = vld [vmem:[#allocation3_spill] sm:$0xff]  ;;  %v7252_v44 = vld [vmem:[#allocation2_spill] sm:$0xff] }
 0x681   : > { %4250 = vrcp.f32 %v1732_v43  ;;  %v1767_v47 = vadd.f32 1.0, %v4243_v5  ;;  %v7254_v5 = vld [vmem:[#allocation5_spill] sm:$0xff] }
 0x682   : > { %4252 = vrcp.f32 %v1765_v24  ;;  %v1746_v35 = vadd.f32 %v1742_v28, %v1700_v0 }
 0x684   : > { %4254 = vtanh.f32 %v1746_v35  ;;  %v7253_v35 = vld [vmem:[#allocation4_spill] sm:$0xff] }
 0x685   : > { %4256 = vrcp.f32 %v1766_v15 }
 0x68a   : > { %v4245_v11 = vpop.eup %4244 }
 0x68b   : > { %v1743_v1 = vmul.f32 %v4245_v11, %v1619_v9  ;;  %v4247_v60 = vpop.eup %4246  ;;  %v7255_v11 = vld [vmem:[#allocation14_spill] sm:$0xff] }
 0x68c   : > { %v1768_v29 = vadd.f32 1.0, %v4247_v60 }
 0x68d   : > { %v4249_v22 = vpop.eup %4248  ;;  %v1747_v10 = vadd.f32 %v1743_v1, %v1706_v57  ;;  %v7256_v1 = vld [vmem:[#allocation15_spill] sm:$0xff] }
 0x68e   : > { %v4251_v32 = vpop.eup %4250  ;;  %v1777_v14 = vsub.f32 %v5794_v56, %v4249_v22  ;;  %v7245_v56 = vld [vmem:[#allocation8_spill] sm:$0xff] }
 0x68f   : > { %v4253_v21 = vpop.eup %4252  ;;  %4258 = vtanh.f32 %v1747_v10  ;;  %v1744_v58 = vmul.f32 %v4251_v32, %v1625_v38  ;;  %v7258_v10 = vld [vmem:[#allocation17_spill] sm:$0xff]  ;;  %v7262_v38 = vld [vmem:[#allocation22_spill] sm:$0xff] }
 0x690   : > { %v1781_v6 = vmul.f32 %v4253_v21, %v1777_v14  ;;  %4260 = vrcp.f32 %v1767_v47  ;;  %v7260_v47 = vld [vmem:[#allocation19_spill] sm:$0xff]  ;;  %v7261_v32 = vld [vmem:[#allocation21_spill] sm:$0xff]  ;;  %v7264_v21 = vld [vmem:[#allocation24_spill] sm:$0xff] }
 0x691   : > { %v4255_v49 = vpop.eup %4254  ;;  %v1748_v0 = vadd.f32 %v1744_v58, %v1712_v23  ;;  %v7247_v23 = vld [vmem:[#allocation10_spill] sm:$0xff]  ;;  %v7263_v14 = vld [vmem:[#allocation23_spill] sm:$0xff] }
 0x692   : > { %v5985_v46 = vadd.f32 %v4249_v22, %v1781_v6  ;;  %v1778_v9 = vsub.f32 %v5802_v16, %v4255_v49  ;;  %v4257_v59 = vpop.eup %4256  ;;  %v7257_v22 = vld [vmem:[#allocation16_spill] sm:$0xff]  ;;  %v7265_v58 = vld [vmem:[#allocation26_spill] sm:$0xff]  ;;  %v7266_v6 = vld [vmem:[#allocation27_spill] sm:$0xff] }
 0x693   : > { %4262 = vtanh.f32 %v1748_v0  ;;  %v7268_v0 = vld [vmem:[#allocation29_spill] sm:$0xff] }
 0x694   : > { %3929 = vmatprep.mubr.f32.mxu0 %v5985_v46  ;;  %v1782_v57 = vmul.f32 %v4257_v59, %v1778_v9  ;;  %4264 = vrcp.f32 %v1768_v29  ;;  %v7269_v29 = vld [vmem:[#allocation30_spill] sm:$0xff]  ;;  %v7270_v9 = vld [vmem:[#allocation31_spill] sm:$0xff]  ;;  %v7271_v59 = vld [vmem:[#allocation32_spill] sm:$0xff] }
 0x696   : > { %v5989_v27 = vadd.f32 %v4255_v49, %v1782_v57  ;;  %v7267_v49 = vld [vmem:[#allocation28_spill] sm:$0xff]  ;;  %v7272_v57 = vld [vmem:[#allocation34_spill] sm:$0xff] }
 0x698   : > { %3930 = vmatmul.mubr.f32.vlgmr.msra.gmra.mxu0 %v5989_v27 }
 0x699   : > { %2181 = vmatpush1.msra.mxu0 %v7245_v56  ;;  %v7273_v56 = vld [vmem:[#allocation36_spill] sm:$0xff] }
 0x69a   : > { %2182 = vmatprep.subr.mxu0 %v7246_v20  ;;  %v7274_v20 = vld [vmem:[#allocation38_spill] sm:$0xff] }
 0x69b   : > { %2183 = vmatpush1.msra.mxu0 %v7247_v23  ;;  %v7275_v23 = vld [vmem:[#allocation39_spill] sm:$0xff] }
 0x69c   : > { %v4259_v33 = vpop.eup %4258  ;;  %2184 = vmatprep.subr.mxu0 %v7248_v13  ;;  %v7276_v13 = vld [vmem:[#allocation20_spill] sm:$0xff] }
 0x69d   : > { %v1779_v16 = vsub.f32 %v5825_v55, %v4259_v33  ;;  %2185 = vmatpush1.msra.mxu0 %v7249_v26  ;;  %v4261_v51 = vpop.eup %4260 }
 0x69e   : > { %2186 = vmatprep.subr.mxu0 %v7250_v2 }
 0x69f   : > { %v1783_v53 = vmul.f32 %v4261_v51, %v1779_v16  ;;  %2187 = vmatpush1.msra.mxu0 %v7251_v12  ;;  %v7278_v51 = vld [vmem:[#allocation25_spill] sm:$0xff] }
 0x6a0   : > { %v4263_v24 = vpop.eup %4262  ;;  %2188 = vmatprep.subr.mxu0 %v7252_v44 }
 0x6a1   : > { %v6001_v43 = vadd.f32 %v4259_v33, %v1783_v53  ;;  %v1780_v28 = vsub.f32 %v5834_v18, %v4263_v24  ;;  %2189 = vmatpush1.msra.mxu0 %v7253_v35  ;;  %v4265_v15 = vpop.eup %4264  ;;  %v7259_v18 = vld [vmem:[#allocation18_spill] sm:$0xff]  ;;  %v7280_v53 = vmov 1   ;;  %v7283_v35 = vld [vmem:[#allocation33_spill] sm:$0xff] }
 0x6a2   : > { %2190 = vmatprep.subr.mxu0 %v7254_v5  ;;  %v4386_v5 = vld [vmem:[%s4471_s29 + $0x28] sm:$0xff] }
 0x6a3   : > { %3932 = vmatprep.mubr.f32.mxu0 %v6001_v43  ;;  %v1784_v55 = vmul.f32 %v4265_v15, %v1780_v28  ;;  %2191 = vmatpush1.msra.mxu0 %v7255_v11  ;;  %v2005_v11 = vpop.permute.xlu1 %2004 }
 0x6a4   : > { %2192 = vmatprep.subr.mxu0 %v7256_v1 }
 0x6a5   : > { %v6009_v60 = vadd.f32 %v4263_v24, %v1784_v55  ;;  %2193 = vmatpush1.msra.mxu0 %v7257_v22  ;;  %v7281_v24 = vld [vmem:[#allocation35_spill] sm:$0xff]  ;;  %v7285_v55 = vld [vmem:[#allocation37_spill] sm:$0xff]  ;;  %v1978_v22 = vpop.permute.xlu0 %1977 }
 0x6a6   : > { %2194 = vmatprep.subr.mxu0 %v7258_v10 }
 0x6a7   : > { %3933 = vmatmul.mubr.f32.gmra.mxu0 %v6009_v60  ;;  %v1983_v1 = vpop.permute.xlu1 %1982 }
 0x6a8   : > { %2195 = vmatpush1.msra.mxu0 %v7259_v18  ;;  %2244 = vmatprep.mubr.f32.mxu0 %v7174_v7 }
 0x6a9   : > { %2196 = vmatprep.subr.mxu0 %v7260_v47  ;;  %v2009_v18 = vpop.permute.xlu0 %2008 }
 0x6aa   : > { %2197 = vmatpush1.msra.mxu0 %v7261_v32 }
 0x6ab   : > { %2198 = vmatprep.subr.mxu0 %v7262_v38  ;;  %v1988_v10 = vpop.permute.xlu1 %1987 }
 0x6ac   : > { %2199 = vmatpush1.msra.mxu0 %v7263_v14 }
 0x6ad   : > { %2200 = vmatprep.subr.mxu0 %v7264_v21 }
 0x6ae   : > { %2201 = vmatpush1.msra.mxu0 %v7265_v58 }
 0x6af   : > { %2202 = vmatprep.subr.mxu0 %v7266_v6 }
 0x6b0   : > { %2203 = vmatpush1.msra.mxu0 %v7267_v49 }
 0x6b1   : > { %2204 = vmatprep.subr.mxu0 %v7268_v0  ;;  %v1995_v0 = vmul.f32 %v7196_v40, %v1978_v22 }
 0x6b2   : > { %2205 = vmatpush1.msra.mxu0 %v7269_v29 }
 0x6b3   : > { %2206 = vmatprep.subr.mxu0 %v7270_v9 }
 0x6b4   : > { %2207 = vmatpush1.msra.mxu0 %v7271_v59  ;;  %v2019_v59 = vmul.f32 %v7197_v54, %v2005_v11  ;;  %v1997_v11 = vmul.f32 %v7196_v40, %v1988_v10 }
 0x6b5   : > { %2208 = vmatprep.subr.mxu0 %v7272_v57  ;;  %v1996_v57 = vmul.f32 %v7196_v40, %v1983_v1 }
 0x6b6   : > { %2209 = vmatpush1.msra.mxu0 %v7273_v56 }
 0x6b7   : > { %2210 = vmatprep.subr.mxu0 %v7274_v20 }
 0x6b8   : > { %2211 = vmatpush1.msra.mxu0 %v7275_v23 }
 0x758   : > { %v3931_v33 = vpop.f32.mrf.mxu0 }
 0x759   : > { %v6033_v16 = vadd.f32 %v3931_v33, %v7276_v13  ;;  %v6431_v13 = vld [vmem:[%s7022_s2 + $0xa0] sm:$0xff] }
 0x75a   : > { %v1871_v26 = vpop.f32.mrf.mxu0 }
 0x75b   : > { %7277 = vst [vmem:[#allocation7_spill] sm:$0xff] %v6033_v16  ;;  %v6036_v2 = vadd.f32 %v1871_v26, %v7278_v51  ;;  %1926 = vperm.xlu1 %4111, %v6033_v16  }
 0x75d   : > { %7279 = vst [vmem:[#allocation8_spill] sm:$0xff] %v6036_v2  ;;  %1921 = vperm.xlu0 %4113, %v6036_v2  }
 0x75f   : > { %4112 = vset.pattern.permute.xlu1 %v7280_v53 }
 0x760   : > { %1952 = vperm.xlu1 %4112, %v6033_v16  }
 0x764   : > { %1948 = vperm.xlu1 %4112, %v6036_v2  }
 0x767   : > { %v3934_v12 = vpop.f32.mrf.mxu0 }
 0x768   : > { %v6044_v44 = vadd.f32 %v3934_v12, %v7281_v24  ;;  %4114 = vset.pattern.permute.xlu1 %v7244_v19  ;;  %v6424_v24 = vld [vmem:[%s7022_s2 + $0xb8] sm:$0xff] }
 0x769   : > { %v1881_v28 = vpop.f32.mrf.mxu0  ;;  %7308 = vst [vmem:[#allocation31_spill] sm:$0xff] %v6424_v24 }
 0x76a   : > { %7282 = vst [vmem:[#allocation9_spill] sm:$0xff] %v6044_v44  ;;  %v6048_v15 = vadd.f32 %v1881_v28, %v7283_v35  ;;  %1936 = vperm.xlu1 %4114, %v6044_v44   ;;  %v6441_v35 = vld [vmem:[%s7022_s2 + $0xb0] sm:$0xff] }
 0x76b   : > { %7310 = vst [vmem:[#allocation34_spill] sm:$0xff] %v6441_v35 }
 0x76c   : > { %7284 = vst [vmem:[#allocation10_spill] sm:$0xff] %v6048_v15  ;;  %1931 = vperm.xlu0 %4113, %v6048_v15  }
 0x76e   : > { %4116 = vset.pattern.permute.xlu1 %v7280_v53 }
 0x76f   : > { %1956 = vperm.xlu1 %4116, %v6048_v15  }
 0x770   : > { %4115 = vset.pattern.permute.xlu0 %v7280_v53 }
 0x771   : > { %1960 = vperm.xlu0 %4115, %v6044_v44  }
 0x773   : > { %4117 = vset.pattern.permute.xlu1 %v4405_v17 }
 0x774   : > { %2012 = vperm.xlu1 %4117, %v4386_v5  }
 0x775   : > { %4119 = vset.pattern.permute.xlu0 %v4405_v17 }
 0x776   : > { %2016 = vperm.xlu0 %4119, %v7285_v55  }
 0x778   : > { %4118 = vset.pattern.permute.xlu1 %v4406_v4 }
 0x779   : > { %1992 = vperm.xlu1 %4118, %v7285_v55  }
 0x7d6   : > { %v1927_v47 = vpop.permute.xlu1 %1926 }
 0x7d7   : > { %v1940_v14 = vmul.f32 %v5250_v50, %v1927_v47 }
 0x7d8   : > { %v1922_v32 = vpop.permute.xlu0 %1921 }
 0x7d9   : > { %v1939_v21 = vmul.f32 %v5250_v50, %v1922_v32  ;;  %v1944_v6 = vadd.f32 %v1940_v14, %v5989_v27  ;;  %v2020_v27 = vmul.f32 %v7197_v54, %v2009_v18 }
 0x7db   : > { %v1953_v38 = vpop.permute.xlu1 %1952  ;;  %v1943_v4 = vadd.f32 %v1939_v21, %v5985_v46 }
 0x7dc   : > { %v1964_v17 = vmul.f32 %v5255_v36, %v1953_v38 }
 0x7de   : > { %v1968_v29 = vadd.f32 %v1964_v17, %v1944_v6 }
 0x7df   : > { %v1949_v58 = vpop.permute.xlu1 %1948 }
 0x7e0   : > { %v1963_v49 = vmul.f32 %v5255_v36, %v1949_v58  ;;  %v2000_v23 = vadd.f32 %v1996_v57, %v1968_v29 }
 0x7e2   : > { %v1967_v9 = vadd.f32 %v1963_v49, %v1943_v4  ;;  %v6080_v5 = vadd.f32 %v2020_v27, %v2000_v23 }
 0x7e4   : > { %v1999_v56 = vadd.f32 %v1995_v0, %v1967_v9 }
 0x7e5   : > { %v1937_v20 = vpop.permute.xlu1 %1936 }
 0x7e6   : > { %v6071_v33 = vadd.f32 %v2019_v59, %v1999_v56 }
 0x7e7   : > { %v1932_v26 = vpop.permute.xlu0 %1931 }
 0x7e8   : > { %v1941_v46 = vmul.f32 %v5250_v50, %v1932_v26  ;;  %2156 = vmatmul.mubr.f32.vlgmr.msra.gmra.mxu1 %v6071_v33  ;;  %2245 = vmatmul.mubr.f32.vlgmr.msra.gmra.mxu0 %v6071_v33 }
 0x7e9   : > { %2161 = vmatprep.mubr.f32.mxu1 %v7174_v7  ;;  %2250 = vmatprep.mubr.f32.mxu0 %v7174_v7 }
 0x7ea   : > { %v1945_v12 = vadd.f32 %v1941_v46, %v6001_v43  ;;  %v1957_v28 = vpop.permute.xlu1 %1956  ;;  %3936 = vmatpush3.msra.mxu1 %v5862_v39  ;;  %v1942_v39 = vmul.f32 %v5250_v50, %v1937_v20 }
 0x7eb   : > { %v1965_v55 = vmul.f32 %v5255_v36, %v1957_v28  ;;  %3937 = vmatprep.subr.mxu1 %v5870_v30 }
 0x7ec   : > { %2162 = vmatmul.mubr.f32.gmra.mxu1 %v6080_v5  ;;  %2251 = vmatmul.mubr.f32.gmra.mxu0 %v6080_v5  ;;  %v1961_v43 = vpop.permute.xlu0 %1960 }
 0x7ed   : > { %v1969_v1 = vadd.f32 %v1965_v55, %v1945_v12  ;;  %2167 = vmatprep.mubr.f32.mxu1 %v7174_v7  ;;  %2256 = vmatprep.mubr.f32.mxu0 %v7174_v7  ;;  %v1966_v10 = vmul.f32 %v5255_v36, %v1961_v43 }
 0x7ee   : > { %3938 = vmatpush3.msra.mxu1 %v5870_v30  ;;  %v1946_v30 = vadd.f32 %v1942_v39, %v6009_v60 }
 0x7ef   : > { %v2001_v22 = vadd.f32 %v1997_v11, %v1969_v1  ;;  %v2013_v18 = vpop.permute.xlu1 %2012  ;;  %3939 = vmatprep.subr.mxu1 %v5877_v63 }
 0x7f0   : > { %v2021_v47 = vmul.f32 %v7197_v54, %v2013_v18  ;;  %3940 = vmatpush3.msra.mxu1 %v5877_v63  ;;  %v1970_v21 = vadd.f32 %v1966_v10, %v1946_v30 }
 0x7f1   : > { %3941 = vmatprep.subr.mxu1 %v5884_v25  ;;  %v2017_v38 = vpop.permute.xlu0 %2016 }
 0x7f2   : > { %v6097_v32 = vadd.f32 %v2021_v47, %v2001_v22  ;;  %3942 = vmatpush3.msra.mxu1 %v5884_v25  ;;  %v2022_v17 = vmul.f32 %v7197_v54, %v2017_v38 }
 0x7f3   : > { %3943 = vmatprep.subr.mxu1 %v5891_v34 }
 0x7f4   : > { %2168 = vmatmul.mubr.f32.gmra.mxu1 %v6097_v32  ;;  %2257 = vmatmul.mubr.f32.gmra.mxu0 %v6097_v32  ;;  %v1993_v14 = vpop.permute.xlu1 %1992 }
 0x7f5   : > { %v1998_v63 = vmul.f32 %v7196_v40, %v1993_v14  ;;  %2173 = vmatprep.mubr.f32.mxu1 %v7174_v7  ;;  %2262 = vmatprep.mubr.f32.mxu0 %v7174_v7 }
 0x7f6   : > { %3944 = vmatpush3.msra.mxu1 %v5891_v34  ;;  %v6137_v34 = vld [vmem:[%s4471_s29 + $0x8] sm:$0xff] }
 0x7f7   : > { %v2002_v25 = vadd.f32 %v1998_v63, %v1970_v21  ;;  %3945 = vmatprep.subr.mxu1 %v5898_v45 }
 0x7f8   : > { %3946 = vmatpush3.msra.mxu1 %v5898_v45  ;;  %v7111_v45 = vmov 13  }
 0x7f9   : > { %v6111_v60 = vadd.f32 %v2022_v17, %v2002_v25  ;;  %3947 = vmatprep.subr.mxu1 %v5905_v8  ;;  %4120 = vset.pattern.permute.xlu1 %v7111_v45 }
 0x7fa   : > { %3948 = vmatpush3.msra.mxu1 %v5905_v8  ;;  %v7110_v8 = vmov 14   ;;  %2529 = vperm.xlu1 %4120, %v6137_v34  }
 0x7fb   : > { %2174 = vmatmul.mubr.f32.gmra.mxu1 %v6111_v60  ;;  %2263 = vmatmul.mubr.f32.gmra.mxu0 %v6111_v60 }
 0x7fc   : > { %3949 = vmatprep.subr.mxu1 %v5912_v48  ;;  %2707 = vmatprep.mubr.f32.mxu0 %v7174_v7 }
 0x7fd   : > { %3950 = vmatpush3.msra.mxu1 %v5912_v48  ;;  %4121 = vset.pattern.permute.xlu0 %v7110_v8  ;;  %v6144_v48 = vld [vmem:[%s4471_s29 + $0x18] sm:$0xff] }
 0x7fe   : > { %3951 = vmatprep.subr.mxu1 %v5919_v37  ;;  %2556 = vperm.xlu0 %4121, %v6137_v34   ;;  %7286 = vst [vmem:[#allocation11_spill] sm:$0xff] %v6144_v48 }
 0x7ff   : > { %3952 = vmatpush3.msra.mxu1 %v5919_v37  ;;  %v6147_v37 = vld [vmem:[%s4471_s29 + $0x28] sm:$0xff]  ;;  %2534 = vperm.xlu1 %4120, %v6144_v48  }
 0x800   : > { %3953 = vmatprep.subr.mxu1 %v5926_v52  ;;  %7287 = vst [vmem:[#allocation12_spill] sm:$0xff] %v6147_v37 }
 0x801   : > { %3954 = vmatpush3.msra.mxu1 %v5926_v52 }
 0x802   : > { %3955 = vmatprep.subr.mxu1 %v5933_v31  ;;  %4123 = vset.pattern.permute.xlu0 %v7111_v45  ;;  %v6412_v45 = vld [vmem:[%s7022_s2 + $0xd0] sm:$0xff] }
 0x803   : > { %3956 = vmatpush3.msra.mxu1 %v5933_v31  ;;  %2539 = vperm.xlu0 %4123, %v6147_v37   ;;  %7307 = vst [vmem:[#allocation30_spill] sm:$0xff] %v6412_v45 }
 0x804   : > { %3957 = vmatprep.subr.mxu1 %v5940_v62  ;;  %4122 = vset.pattern.permute.xlu1 %v7110_v8  ;;  %v6407_v8 = vld [vmem:[%s7022_s2 + $0xc0] sm:$0xff] }
 0x805   : > { %3958 = vmatpush3.msra.mxu1 %v5940_v62  ;;  %2560 = vperm.xlu1 %4122, %v6144_v48  }
 0x806   : > { %3959 = vmatprep.subr.mxu1 %v5947_v41 }
 0x807   : > { %3960 = vmatpush3.msra.mxu1 %v5947_v41  ;;  %4124 = vset.pattern.permute.xlu0 %v7244_v19 }
 0x808   : > { %3961 = vmatprep.subr.mxu1 %v5954_v42 }
 0x809   : > { %3962 = vmatpush3.msra.mxu1 %v5954_v42  ;;  %4125 = vset.pattern.permute.xlu1 %v7280_v53 }
 0x80a   : > { %3963 = vmatprep.subr.mxu1 %v5961_v3 }
 0x80b   : > { %3964 = vmatpush3.msra.mxu1 %v5961_v3 }
 0x80c   : > { %3965 = vmatprep.subr.mxu1 %v5967_v61 }
 0x80d   : > { %3966 = vmatpush3.msra.mxu1 %v5967_v61 }
 0x8a8   : > { %v2157_v52 = vpop.f32.mrf.mxu1  ;;  %v2246_v62 = vpop.f32.mrf.mxu0 }
 0x8a9   : > { %v3674_v31 = vmul.f32 -1.442695, %v2157_v52 }
 0x8aa   : > { %v2159_v41 = vpop.f32.mrf.mxu1  ;;  %v2248_v61 = vpop.f32.mrf.mxu0 }
 0x8ab   : > { %4266 = vpow2.f32 %v3674_v31  ;;  %v3678_v0 = vmul.f32 -1.442695, %v2248_v61 }
 0x8ac   : > { %v2163_v42 = vpop.f32.mrf.mxu1  ;;  %v2252_v58 = vpop.f32.mrf.mxu0 }
 0x8ad   : > { %v3675_v3 = vmul.f32 -1.442695, %v2163_v42 }
 0x8ae   : > { %v2165_v6 = vpop.f32.mrf.mxu1  ;;  %v2254_v29 = vpop.f32.mrf.mxu0 }
 0x8af   : > { %4268 = vpow2.f32 %v3675_v3  ;;  %v3679_v57 = vmul.f32 -1.442695, %v2254_v29 }
 0x8b4   : > { %v2169_v4 = vpop.f32.mrf.mxu1  ;;  %v2258_v20 = vpop.f32.mrf.mxu0 }
 0x8b5   : > { %v3676_v49 = vmul.f32 -1.442695, %v2169_v4 }
 0x8b6   : > { %v2171_v56 = vpop.f32.mrf.mxu1  ;;  %v2260_v12 = vpop.f32.mrf.mxu0 }
 0x8b7   : > { %4270 = vpow2.f32 %v3676_v49  ;;  %v3680_v55 = vmul.f32 -1.442695, %v2260_v12 }
 0x8b8   : > { %v4267_v9 = vpop.eup %4266  ;;  %4272 = vpow2.f32 %v3678_v0 }
 0x8b9   : > { %v2281_v59 = vadd.f32 1.0, %v4267_v9 }
 0x8bb   : > { %4274 = vrcp.f32 %v2281_v59  ;;  %v2175_v23 = vpop.f32.mrf.mxu1  ;;  %v2264_v28 = vpop.f32.mrf.mxu0 }
 0x8bc   : > { %v4269_v26 = vpop.eup %4268  ;;  %v3677_v27 = vmul.f32 -1.442695, %v2175_v23  ;;  %4276 = vpow2.f32 %v3679_v57 }
 0x8bd   : > { %v2282_v46 = vadd.f32 1.0, %v4269_v26  ;;  %v2266_v43 = vpop.f32.mrf.mxu0  ;;  %v2177_v0 = vpop.f32.mrf.mxu1 }
 0x8be   : > { %4278 = vpow2.f32 %v3677_v27  ;;  %v3681_v18 = vmul.f32 -1.442695, %v2266_v43 }
 0x8bf   : > { %4280 = vrcp.f32 %v2282_v46 }
 0x8c0   : > { %4282 = vpow2.f32 %v3680_v55 }
 0x8c4   : > { %v4271_v11 = vpop.eup %4270 }
 0x8c5   : > { %v2283_v1 = vadd.f32 1.0, %v4271_v11  ;;  %v4273_v39 = vpop.eup %4272 }
 0x8c6   : > { %v2317_v14 = vadd.f32 1.0, %v4273_v39 }
 0x8c7   : > { %4284 = vrcp.f32 %v2283_v1 }
 0x8c8   : > { %v4275_v22 = vpop.eup %4274  ;;  %4286 = vpow2.f32 %v3681_v18  ;;  %v6181_v18 = vld [vmem:[%s7022_s2 + $0x1f8] sm:$0xff] }
 0x8c9   : > { %v2293_v47 = vmul.f32 %v4275_v22, %v2159_v41  ;;  %v4277_v10 = vpop.eup %4276  ;;  %2732 = vmatprep.subr.mxu1 %v6181_v18 }
 0x8ca   : > { %v2318_v52 = vadd.f32 1.0, %v4277_v10  ;;  %v6198_v10 = vld [vmem:[%s7022_s2 + $0x1c8] sm:$0xff] }
 0x8cb   : > { %v4279_v38 = vpop.eup %4278  ;;  %v2297_v30 = vadd.f32 %v2293_v47, %v2246_v62  ;;  %v6193_v47 = vld [vmem:[%s7022_s2 + $0x1f0] sm:$0xff] }
 0x8cc   : > { %v4281_v21 = vpop.eup %4280  ;;  %v2284_v63 = vadd.f32 1.0, %v4279_v38  ;;  %7288 = vst [vmem:[#allocation13_spill] sm:$0xff] %v6193_v47  ;;  %v6203_v38 = vld [vmem:[%s7022_s2 + $0x1d8] sm:$0xff] }
 0x8cd   : > { %4288 = vtanh.f32 %v2297_v30  ;;  %v2294_v17 = vmul.f32 %v4281_v21, %v2165_v6  ;;  %v4283_v31 = vpop.eup %4282  ;;  %7289 = vst [vmem:[#allocation3_spill] sm:$0xff] %v6203_v38  ;;  %v6210_v30 = vld [vmem:[%s7022_s2 + $0x1c0] sm:$0xff]  ;;  %v6220_v21 = vld [vmem:[%s7022_s2 + $0x1a8] sm:$0xff] }
 0x8ce   : > { %4290 = vrcp.f32 %v2284_v63  ;;  %v2319_v41 = vadd.f32 1.0, %v4283_v31  ;;  %v6227_v63 = vld [vmem:[%s7022_s2 + $0x1b8] sm:$0xff] }
 0x8cf   : > { %4292 = vrcp.f32 %v2317_v14  ;;  %v2298_v25 = vadd.f32 %v2294_v17, %v2252_v58  ;;  %v6215_v14 = vld [vmem:[%s7022_s2 + $0x1d0] sm:$0xff]  ;;  %7291 = vst [vmem:[#allocation4_spill] sm:$0xff] %v6227_v63  ;;  %v6232_v17 = vld [vmem:[%s7022_s2 + $0x1a0] sm:$0xff]  ;;  %v6249_v31 = vld [vmem:[%s7022_s2 + $0x198] sm:$0xff] }
 0x8d0   : > { %7290 = vst [vmem:[#allocation2_spill] sm:$0xff] %v6215_v14  ;;  %7293 = vst [vmem:[#allocation14_spill] sm:$0xff] %v6249_v31 }
 0x8d1   : > { %4294 = vtanh.f32 %v2298_v25  ;;  %v6237_v25 = vld [vmem:[%s7022_s2 + $0x1b0] sm:$0xff] }
 0x8d2   : > { %4296 = vrcp.f32 %v2318_v52  ;;  %7292 = vst [vmem:[#allocation5_spill] sm:$0xff] %v6237_v25  ;;  %v6244_v52 = vld [vmem:[%s7022_s2 + $0x188] sm:$0xff] }
 0x8d4   : > { %v4285_v42 = vpop.eup %4284 }
 0x8d5   : > { %v2295_v3 = vmul.f32 %v4285_v42, %v2171_v56  ;;  %v4287_v4 = vpop.eup %4286  ;;  %v6256_v42 = vld [vmem:[%s7022_s2 + $0x180] sm:$0xff] }
 0x8d6   : > { %v2320_v23 = vadd.f32 1.0, %v4287_v4  ;;  %v6280_v4 = vld [vmem:[%s7022_s2 + $0x160] sm:$0xff] }
 0x8d7   : > { %v2299_v61 = vadd.f32 %v2295_v3, %v2258_v20  ;;  %v6261_v3 = vld [vmem:[%s7022_s2 + $0x190] sm:$0xff] }
 0x8d8   : > { %7294 = vst [vmem:[#allocation15_spill] sm:$0xff] %v6261_v3 }
 0x8d9   : > { %4298 = vtanh.f32 %v2299_v61  ;;  %v6268_v61 = vld [vmem:[%s7022_s2 + $0x168] sm:$0xff] }
 0x8da   : > { %v4289_v62 = vpop.eup %4288  ;;  %4300 = vrcp.f32 %v2319_v41  ;;  %v6273_v41 = vld [vmem:[%s7022_s2 + $0x178] sm:$0xff] }
 0x8db   : > { %v4291_v49 = vpop.eup %4290  ;;  %v2329_v29 = vsub.f32 %v6071_v33, %v4289_v62  ;;  %7295 = vst [vmem:[#allocation16_spill] sm:$0xff] %v6273_v41 }
 0x8dc   : > { %v4293_v6 = vpop.eup %4292  ;;  %v2296_v9 = vmul.f32 %v4291_v49, %v2177_v0  ;;  %v6292_v49 = vld [vmem:[%s7022_s2 + $0x148] sm:$0xff]  ;;  %v6297_v0 = vld [vmem:[%s7022_s2 + $0x158] sm:$0xff] }
 0x8dd   : > { %v2333_v59 = vmul.f32 %v4293_v6, %v2329_v29  ;;  %7297 = vst [vmem:[#allocation18_spill] sm:$0xff] %v6297_v0  ;;  %v6304_v29 = vld [vmem:[%s7022_s2 + $0x140] sm:$0xff]  ;;  %v6309_v6 = vld [vmem:[%s7022_s2 + $0x150] sm:$0xff] }
 0x8de   : > { %v4295_v58 = vpop.eup %4294  ;;  %v2300_v57 = vadd.f32 %v2296_v9, %v2264_v28  ;;  %7298 = vst [vmem:[#allocation19_spill] sm:$0xff] %v6309_v6  ;;  %v6316_v9 = vld [vmem:[%s7022_s2 + $0x128] sm:$0xff] }
 0x8df   : > { %v6157_v26 = vadd.f32 %v4289_v62, %v2333_v59  ;;  %v2330_v56 = vsub.f32 %v6080_v5, %v4295_v58  ;;  %v4297_v20 = vpop.eup %4296  ;;  %v6285_v62 = vld [vmem:[%s7022_s2 + $0x170] sm:$0xff]  ;;  %v6321_v59 = vld [vmem:[%s7022_s2 + $0x138] sm:$0xff] }
 0x8e0   : > { %4302 = vtanh.f32 %v2300_v57  ;;  %7296 = vst [vmem:[#allocation17_spill] sm:$0xff] %v6285_v62  ;;  %7299 = vst [vmem:[#allocation21_spill] sm:$0xff] %v6321_v59  ;;  %v6333_v57 = vld [vmem:[%s7022_s2 + $0x130] sm:$0xff] }
 0x8e1   : > { %3967 = vmatprep.mubr.f32.mxu1 %v6157_v26  ;;  %v2334_v27 = vmul.f32 %v4297_v20, %v2330_v56  ;;  %4304 = vrcp.f32 %v2320_v23  ;;  %7300 = vst [vmem:[#allocation22_spill] sm:$0xff] %v6333_v57  ;;  %v6344_v23 = vld [vmem:[%s7022_s2 + $0x108] sm:$0xff]  ;;  %v6349_v56 = vld [vmem:[%s7022_s2 + $0x118] sm:$0xff]  ;;  %v6356_v20 = vld [vmem:[%s7022_s2 + $0x100] sm:$0xff] }
 0x8e2   : > { %7301 = vst [vmem:[#allocation23_spill] sm:$0xff] %v6349_v56 }
 0x8e3   : > { %v6161_v46 = vadd.f32 %v4295_v58, %v2334_v27  ;;  %v6328_v58 = vld [vmem:[%s7022_s2 + $0x120] sm:$0xff]  ;;  %v6361_v27 = vld [vmem:[%s7022_s2 + $0x110] sm:$0xff] }
 0x8e4   : > { %7302 = vst [vmem:[#allocation24_spill] sm:$0xff] %v6361_v27 }
 0x8e5   : > { %3968 = vmatmul.mubr.f32.vlgmr.msra.gmra.mxu1 %v6161_v46 }
 0x8e6   : > { %v4299_v33 = vpop.eup %4298  ;;  %2733 = vmatpush1.msra.mxu1 %v6193_v47 }
 0x8e7   : > { %v2331_v12 = vsub.f32 %v6097_v32, %v4299_v33  ;;  %v4301_v55 = vpop.eup %4300  ;;  %v6176_v32 = vld [vmem:[%s7022_s2 + $0x1e8] sm:$0xff]  ;;  %2734 = vmatprep.subr.mxu1 %v6203_v38 }
 0x8e8   : > { %2643 = vmatprep.subr.mxu0 %v6176_v32  ;;  %2735 = vmatpush1.msra.mxu1 %v6215_v14 }
 0x8e9   : > { %v2335_v28 = vmul.f32 %v4301_v55, %v2331_v12  ;;  %2736 = vmatprep.subr.mxu1 %v6227_v63  ;;  %v6368_v12 = vld [vmem:[%s7022_s2 + $0xe8] sm:$0xff]  ;;  %v6373_v55 = vld [vmem:[%s7022_s2 + $0xf8] sm:$0xff] }
 0x8ea   : > { %2737 = vmatpush1.msra.mxu1 %v6237_v25  ;;  %7303 = vst [vmem:[#allocation26_spill] sm:$0xff] %v6373_v55 }
 0x8eb   : > { %v6165_v11 = vadd.f32 %v4299_v33, %v2335_v28  ;;  %2738 = vmatprep.subr.mxu1 %v6249_v31 }
 0x8ec   : > { %2739 = vmatpush1.msra.mxu1 %v6261_v3 }
 0x8ed   : > { %v4303_v1 = vpop.eup %4302  ;;  %3970 = vmatprep.mubr.f32.mxu1 %v6165_v11  ;;  %2740 = vmatprep.subr.mxu1 %v6273_v41 }
 0x8ee   : > { %v2332_v5 = vsub.f32 %v6111_v60, %v4303_v1  ;;  %v4305_v43 = vpop.eup %4304  ;;  %v6186_v60 = vld [vmem:[%s7022_s2 + $0x1e0] sm:$0xff]  ;;  %2741 = vmatpush1.msra.mxu1 %v6285_v62 }
 0x8ef   : > { %2644 = vmatpush1.msra.mxu0 %v6186_v60  ;;  %2742 = vmatprep.subr.mxu1 %v6297_v0 }
 0x8f0   : > { %v2336_v39 = vmul.f32 %v4305_v43, %v2332_v5  ;;  %2645 = vmatprep.subr.mxu0 %v6198_v10  ;;  %2743 = vmatpush1.msra.mxu1 %v6309_v6  ;;  %v6388_v5 = vld [vmem:[%s7022_s2 + $0xf0] sm:$0xff]  ;;  %v6395_v43 = vld [vmem:[%s7022_s2 + $0xc8] sm:$0xff] }
 0x8f1   : > { %2646 = vmatpush1.msra.mxu0 %v6210_v30  ;;  %2744 = vmatprep.subr.mxu1 %v6321_v59  ;;  %7305 = vst [vmem:[#allocation28_spill] sm:$0xff] %v6388_v5 }
 0x8f2   : > { %v6169_v22 = vadd.f32 %v4303_v1, %v2336_v39  ;;  %2647 = vmatprep.subr.mxu0 %v6220_v21  ;;  %2745 = vmatpush1.msra.mxu1 %v6333_v57  ;;  %v6383_v1 = vld [vmem:[%s7022_s2 + $0xe0] sm:$0xff]  ;;  %v6400_v39 = vld [vmem:[%s7022_s2 + $0xd8] sm:$0xff] }
 0x8f3   : > { %2648 = vmatpush1.msra.mxu0 %v6232_v17  ;;  %2746 = vmatprep.subr.mxu1 %v6349_v56  ;;  %7306 = vst [vmem:[#allocation29_spill] sm:$0xff] %v6400_v39  ;;  %v6534_v57 = vld [vmem:[%s7022_s2 + $0x20] sm:$0xff] }
 0x8f4   : > { %3971 = vmatmul.mubr.f32.gmra.mxu1 %v6169_v22  ;;  %2649 = vmatprep.subr.mxu0 %v6244_v52 }
 0x8f5   : > { %2796 = vmatprep.mubr.f32.mxu1 %v7174_v7  ;;  %2650 = vmatpush1.msra.mxu0 %v6256_v42 }
 0x8f6   : > { %2651 = vmatprep.subr.mxu0 %v6268_v61  ;;  %2747 = vmatpush1.msra.mxu1 %v6361_v27  ;;  %v6515_v27 = vld [vmem:[%s7022_s2 + $0x50] sm:$0xff] }
 0x8f7   : > { %2652 = vmatpush1.msra.mxu0 %v6280_v4  ;;  %2748 = vmatprep.subr.mxu1 %v6373_v55  ;;  %v6508_v55 = vld [vmem:[%s7022_s2 + $0x40] sm:$0xff]  ;;  %7316 = vst [vmem:[#allocation41_spill] sm:$0xff] %v6515_v27 }
 0x8f8   : > { %2653 = vmatprep.subr.mxu0 %v6292_v49  ;;  %2749 = vmatpush1.msra.mxu1 %v6388_v5  ;;  %v6484_v5 = vld [vmem:[%s7022_s2 + $0x60] sm:$0xff] }
 0x8f9   : > { %2654 = vmatpush1.msra.mxu0 %v6304_v29  ;;  %2750 = vmatprep.subr.mxu1 %v6400_v39  ;;  %v6477_v39 = vld [vmem:[%s7022_s2 + $0x78] sm:$0xff] }
 0x8fa   : > { %2655 = vmatprep.subr.mxu0 %v6316_v9  ;;  %2751 = vmatpush1.msra.mxu1 %v6412_v45  ;;  %v6470_v45 = vld [vmem:[%s7022_s2 + $0x68] sm:$0xff]  ;;  %7313 = vst [vmem:[#allocation39_spill] sm:$0xff] %v6477_v39 }
 0x8fb   : > { %2656 = vmatpush1.msra.mxu0 %v6328_v58  ;;  %2752 = vmatprep.subr.mxu1 %v6424_v24  ;;  %v6465_v24 = vld [vmem:[%s7022_s2 + $0x90] sm:$0xff] }
 0x8fc   : > { %2657 = vmatprep.subr.mxu0 %v6344_v23  ;;  %7312 = vst [vmem:[#allocation38_spill] sm:$0xff] %v6465_v24  ;;  %2753 = vmatpush1.msra.mxu1 %v6441_v35  ;;  %v6491_v35 = vld [vmem:[%s7022_s2 + $0x70] sm:$0xff] }
 0x8fd   : > { %2658 = vmatpush1.msra.mxu0 %v6356_v20  ;;  %7314 = vst [vmem:[#allocation37_spill] sm:$0xff] %v6491_v35 }
 0x8fe   : > { %2659 = vmatprep.subr.mxu0 %v6368_v12 }
 0x8ff   : > { %2660 = vmatpush1.msra.mxu0 %v6383_v1 }
 0x900   : > { %2661 = vmatprep.subr.mxu0 %v6395_v43 }
 0x901   : > { %2662 = vmatpush1.msra.mxu0 %v6407_v8 }
 0x9a5   : > { %v3969_v33 = vpop.f32.mrf.mxu1 }
 0x9a6   : > { %v6376_v28 = vadd.f32 %v3969_v33, %v6033_v16  ;;  %v6419_v16 = vld [vmem:[%s7022_s2 + $0xa8] sm:$0xff] }
 0x9a7   : > { %v2423_v33 = vpop.f32.mrf.mxu1  ;;  %2663 = vmatprep.subr.mxu0 %v6419_v16 }
 0x9a8   : > { %7304 = vst [vmem:[#allocation27_spill] sm:$0xff] %v6376_v28  ;;  %2504 = vperm.xlu1 %4125, %v6376_v28   ;;  %2478 = vperm.xlu0 %4124, %v6376_v28   ;;  %v6434_v51 = vadd.f32 %v2423_v33, %v6036_v2  ;;  %v6446_v28 = vld [vmem:[%s7022_s2 + $0x88] sm:$0xff]  ;;  %v6453_v33 = vld [vmem:[%s7022_s2 + $0x98] sm:$0xff]  ;;  %v6458_v2 = vld [vmem:[%s7022_s2 + $0x80] sm:$0xff] }
 0x9a9   : > { %7311 = vst [vmem:[#allocation36_spill] sm:$0xff] %v6453_v33  ;;  %2664 = vmatpush1.msra.mxu0 %v6431_v13  ;;  %2754 = vmatprep.subr.mxu1 %v6453_v33  ;;  %v6496_v33 = vld [vmem:[%s7022_s2 + $0x48] sm:$0xff] }
 0x9aa   : > { %7309 = vst [vmem:[#allocation32_spill] sm:$0xff] %v6434_v51  ;;  %2665 = vmatprep.subr.mxu0 %v6446_v28  ;;  %2755 = vmatpush1.msra.mxu1 %v6465_v24  ;;  %v6503_v24 = vld [vmem:[%s7022_s2 + $0x58] sm:$0xff] }
 0x9ab   : > { %2666 = vmatpush1.msra.mxu0 %v6458_v2  ;;  %2756 = vmatprep.subr.mxu1 %v6477_v39  ;;  %7315 = vst [vmem:[#allocation40_spill] sm:$0xff] %v6503_v24  ;;  %v6520_v39 = vld [vmem:[%s7022_s2 + $0x28] sm:$0xff] }
 0x9ac   : > { %4126 = vset.pattern.permute.xlu1 %v7244_v19  ;;  %4131 = vset.pattern.permute.xlu0 %v7280_v53 }
 0x9ad   : > { %2473 = vperm.xlu1 %4126, %v6434_v51   ;;  %2667 = vmatprep.subr.mxu0 %v6470_v45 }
 0x9ae   : > { %2668 = vmatpush1.msra.mxu0 %v6484_v5  ;;  %2757 = vmatpush1.msra.mxu1 %v6491_v35  ;;  %v6544_v35 = vld [vmem:[%s7022_s2 + $0x30] sm:$0xff] }
 0x9af   : > { %2669 = vmatprep.subr.mxu0 %v6496_v33  ;;  %2758 = vmatprep.subr.mxu1 %v6503_v24  ;;  %7319 = vst [vmem:[#allocation44_spill] sm:$0xff] %v6544_v35  ;;  %v6549_v24 = vld [vmem:[%s7022_s2 + $0x8] sm:$0xff] }
 0x9b0   : > { %2670 = vmatpush1.msra.mxu0 %v6508_v55  ;;  %2759 = vmatpush1.msra.mxu1 %v6515_v27  ;;  %v6566_v27 = vld [vmem:[%s7022_s2] sm:$0xff] }
 0x9b1   : > { %4127 = vset.pattern.permute.xlu1 %v7280_v53  ;;  %2671 = vmatprep.subr.mxu0 %v6520_v39 }
 0x9b2   : > { %2500 = vperm.xlu1 %4127, %v6434_v51   ;;  %v6527_v51 = vld [vmem:[%s7022_s2 + $0x38] sm:$0xff]  ;;  %2672 = vmatpush1.msra.mxu0 %v6534_v57 }
 0x9b3   : > { %7317 = vst [vmem:[#allocation42_spill] sm:$0xff] %v6527_v51  ;;  %2760 = vmatprep.subr.mxu1 %v6527_v51  ;;  %v6571_v51 = vld [vmem:[%s7022_s2 + $0x10] sm:$0xff]  ;;  %2673 = vmatprep.subr.mxu0 %v6549_v24 }
 0x9b4   : > { %v3972_v56 = vpop.f32.mrf.mxu1  ;;  %7322 = vst [vmem:[#allocation47_spill] sm:$0xff] %v6571_v51  ;;  %2761 = vmatpush1.msra.mxu1 %v6544_v35  ;;  %2674 = vmatpush1.msra.mxu0 %v6566_v27  ;;  %v7325_v35 = vmov 14  }
 0x9b5   : > { %v6537_v59 = vadd.f32 %v3972_v56, %v6044_v44  ;;  %v6556_v56 = vld [vmem:[%s7022_s2 + $0x18] sm:$0xff] }
 0x9b6   : > { %4128 = vset.pattern.permute.xlu1 %v7244_v19  ;;  %v2433_v6 = vpop.f32.mrf.mxu1  ;;  %7320 = vst [vmem:[#allocation45_spill] sm:$0xff] %v6556_v56  ;;  %2762 = vmatprep.subr.mxu1 %v6556_v56  ;;  %v2557_v56 = vpop.permute.xlu0 %2556 }
 0x9b7   : > { %7318 = vst [vmem:[#allocation43_spill] sm:$0xff] %v6537_v59  ;;  %v6559_v44 = vadd.f32 %v2433_v6, %v6048_v15  ;;  %2488 = vperm.xlu1 %4128, %v6537_v59   ;;  %2763 = vmatpush1.msra.mxu1 %v6571_v51  ;;  %v6581_v6 = vld [vmem:[%s4471_s29 + $0x38] sm:$0xff]  ;;  %v7324_v15 = vmov 13   ;;  %v2530_v51 = vpop.permute.xlu1 %2529 }
 0x9b8   : > { %7323 = vst [vmem:[#allocation48_spill] sm:$0xff] %v6581_v6  ;;  %3195 = vmatprep.subr.mxu1 %v6176_v32  ;;  %v2547_v63 = vmul.f32 %v7196_v40, %v2530_v51 }
 0x9b9   : > { %7321 = vst [vmem:[#allocation46_spill] sm:$0xff] %v6559_v44  ;;  %2508 = vperm.xlu0 %4131, %v6559_v44  }
 0x9ba   : > { %v2540_v62 = vpop.permute.xlu0 %2539 }
 0x9bb   : > { %2483 = vperm.xlu1 %4128, %v6559_v44   ;;  %v2535_v44 = vpop.permute.xlu1 %2534 }
 0x9bc   : > { %v2548_v47 = vmul.f32 %v7196_v40, %v2535_v44 }
 0x9bd   : > { %4132 = vset.pattern.permute.xlu0 %v7324_v15 }
 0x9be   : > { %2544 = vperm.xlu0 %4132, %v6581_v6  }
 0x9bf   : > { %4129 = vset.pattern.permute.xlu1 %v7280_v53  ;;  %v2561_v0 = vpop.permute.xlu1 %2560 }
 0x9c0   : > { %2512 = vperm.xlu1 %4129, %v6537_v59  }
 0x9c4   : > { %4130 = vset.pattern.permute.xlu1 %v7325_v35 }
 0x9c5   : > { %2564 = vperm.xlu1 %4130, %v6147_v37  }
 0x9c9   : > { %2568 = vperm.xlu1 %4130, %v6581_v6  }
 0xa23   : > { %v2505_v32 = vpop.permute.xlu1 %2504  ;;  %v2479_v41 = vpop.permute.xlu0 %2478 }
 0xa24   : > { %v2492_v15 = vmul.f32 %v5250_v50, %v2479_v41  ;;  %v2516_v35 = vmul.f32 %v5255_v36, %v2505_v32  ;;  %v2571_v41 = vmul.f32 %v7197_v54, %v2557_v56 }
 0xa26   : > { %v2496_v59 = vadd.f32 %v2492_v15, %v6161_v46  ;;  %v2572_v46 = vmul.f32 %v7197_v54, %v2561_v0 }
 0xa28   : > { %v2474_v3 = vpop.permute.xlu1 %2473  ;;  %v2520_v14 = vadd.f32 %v2516_v35, %v2496_v59 }
 0xa29   : > { %v2491_v53 = vmul.f32 %v5250_v50, %v2474_v3 }
 0xa2a   : > { %v2552_v3 = vadd.f32 %v2548_v47, %v2520_v14 }
 0xa2b   : > { %v2495_v25 = vadd.f32 %v2491_v53, %v6157_v26 }
 0xa2c   : > { %v6608_v26 = vadd.f32 %v2572_v46, %v2552_v3 }
 0xa2d   : > { %v2501_v31 = vpop.permute.xlu1 %2500 }
 0xa2e   : > { %v2515_v6 = vmul.f32 %v5255_v36, %v2501_v31 }
 0xa30   : > { %v2519_v38 = vadd.f32 %v2515_v6, %v2495_v25 }
 0xa32   : > { %v2551_v19 = vadd.f32 %v2547_v63, %v2519_v38  ;;  %v2489_v37 = vpop.permute.xlu1 %2488  ;;  %v2549_v63 = vmul.f32 %v7196_v40, %v2540_v62  ;;  %v6725_v62 = vld [vmem:[%s7023_s3 + $0x38] sm:$0xff] }
 0xa33   : > { %v2494_v47 = vmul.f32 %v5250_v50, %v2489_v37 }
 0xa34   : > { %v6600_v48 = vadd.f32 %v2571_v41, %v2551_v19  ;;  %v2509_v44 = vpop.permute.xlu0 %2508 }
 0xa35   : > { %v2517_v38 = vmul.f32 %v5255_v36, %v2509_v44  ;;  %v2498_v37 = vadd.f32 %v2494_v47, %v6169_v22 }
 0xa36   : > { %2708 = vmatmul.mubr.f32.vlgmr.msra.gmra.mxu0 %v6600_v48  ;;  %2797 = vmatmul.mubr.f32.vlgmr.msra.gmra.mxu1 %v6600_v48  ;;  %v2484_v53 = vpop.permute.xlu1 %2483 }
 0xa37   : > { %v2493_v51 = vmul.f32 %v5250_v50, %v2484_v53  ;;  %2713 = vmatprep.mubr.f32.mxu0 %v7174_v7  ;;  %2802 = vmatprep.mubr.f32.mxu1 %v7174_v7 }
 0xa38   : > { %3196 = vmatpush1.msra.mxu1 %v6186_v60 }
 0xa39   : > { %v2497_v19 = vadd.f32 %v2493_v51, %v6165_v11  ;;  %3197 = vmatprep.subr.mxu1 %v6198_v10  ;;  %v2545_v10 = vpop.permute.xlu0 %2544 }
 0xa3a   : > { %2714 = vmatmul.mubr.f32.gmra.mxu0 %v6608_v26  ;;  %2803 = vmatmul.mubr.f32.gmra.mxu1 %v6608_v26 }
 0xa3b   : > { %v2513_v14 = vpop.permute.xlu1 %2512  ;;  %2719 = vmatprep.mubr.f32.mxu0 %v7174_v7  ;;  %2808 = vmatprep.mubr.f32.mxu1 %v7174_v7  ;;  %v2521_v60 = vadd.f32 %v2517_v38, %v2497_v19 }
 0xa3c   : > { %3198 = vmatpush1.msra.mxu1 %v6210_v30  ;;  %v2518_v11 = vmul.f32 %v5255_v36, %v2513_v14  ;;  %v2550_v30 = vmul.f32 %v7196_v40, %v2545_v10 }
 0xa3d   : > { %3199 = vmatprep.subr.mxu1 %v6220_v21  ;;  %v2553_v0 = vadd.f32 %v2549_v63, %v2521_v60 }
 0xa3e   : > { %3200 = vmatpush1.msra.mxu1 %v6232_v17  ;;  %v2522_v31 = vadd.f32 %v2518_v11, %v2498_v37 }
 0xa3f   : > { %3201 = vmatprep.subr.mxu1 %v6244_v52 }
 0xa40   : > { %v2565_v25 = vpop.permute.xlu1 %2564  ;;  %3202 = vmatpush1.msra.mxu1 %v6256_v42  ;;  %v2554_v17 = vadd.f32 %v2550_v30, %v2522_v31 }
 0xa41   : > { %v2573_v59 = vmul.f32 %v7197_v54, %v2565_v25  ;;  %3203 = vmatprep.subr.mxu1 %v6268_v61  ;;  %v6711_v61 = vld [vmem:[%s7023_s3 + $0x48] sm:$0xff] }
 0xa42   : > { %3204 = vmatpush1.msra.mxu1 %v6280_v4  ;;  %v6718_v4 = vld [vmem:[%s7023_s3 + $0x40] sm:$0xff] }
 0xa43   : > { %v6631_v21 = vadd.f32 %v2573_v59, %v2553_v0  ;;  %3205 = vmatprep.subr.mxu1 %v6292_v49  ;;  %v6732_v49 = vld [vmem:[%s7023_s3 + $0x30] sm:$0xff] }
 0xa44   : > { %v2569_v22 = vpop.permute.xlu1 %2568  ;;  %3206 = vmatpush1.msra.mxu1 %v6304_v29  ;;  %v6739_v29 = vld [vmem:[%s7023_s3 + $0x28] sm:$0xff] }
 0xa45   : > { %v2574_v52 = vmul.f32 %v7197_v54, %v2569_v22  ;;  %2720 = vmatmul.mubr.f32.gmra.mxu0 %v6631_v21  ;;  %2809 = vmatmul.mubr.f32.gmra.mxu1 %v6631_v21 }
 0xa46   : > { %2725 = vmatprep.mubr.f32.mxu0 %v7174_v7  ;;  %2814 = vmatprep.mubr.f32.mxu1 %v7174_v7 }
 0xa47   : > { %v6640_v42 = vadd.f32 %v2574_v52, %v2554_v17  ;;  %3207 = vmatprep.subr.mxu1 %v6316_v9  ;;  %v6746_v9 = vld [vmem:[%s7023_s3 + $0x20] sm:$0xff] }
 0xa48   : > { %3208 = vmatpush1.msra.mxu1 %v6328_v58  ;;  %v6753_v58 = vld [vmem:[%s7023_s3 + $0x18] sm:$0xff] }
 0xa49   : > { %2726 = vmatmul.mubr.f32.gmra.mxu0 %v6640_v42  ;;  %2815 = vmatmul.mubr.f32.gmra.mxu1 %v6640_v42 }
 0xa4a   : > { %3209 = vmatprep.subr.mxu1 %v6344_v23  ;;  %3259 = vmatprep.mubr.f32.mxu1 %v7174_v7  ;;  %v6767_v23 = vld [vmem:[%s7023_s3 + $0x8] sm:$0xff] }
 0xa4b   : > { %3210 = vmatpush1.msra.mxu1 %v6356_v20  ;;  %v6773_v20 = vld [vmem:[%s7023_s3] sm:$0xff] }
 0xa4c   : > { %3211 = vmatprep.subr.mxu1 %v6368_v12  ;;  %v4410_v12 = vmov 15  }
 0xa4d   : > { %3212 = vmatpush1.msra.mxu1 %v6383_v1  ;;  %4133 = vset.pattern.permute.xlu0 %v4410_v12 }
 0xa4e   : > { %3213 = vmatprep.subr.mxu1 %v6395_v43  ;;  %3081 = vperm.xlu0 %4133, %v6137_v34  }
 0xa4f   : > { %3214 = vmatpush1.msra.mxu1 %v6407_v8  ;;  %v6704_v8 = vld [vmem:[%s7023_s3 + $0x50] sm:$0xff] }
 0xa50   : > { %3215 = vmatprep.subr.mxu1 %v6419_v16  ;;  %v6676_v16 = vld [vmem:[%s7023_s3 + $0x70] sm:$0xff] }
 0xa51   : > { %3216 = vmatpush1.msra.mxu1 %v6431_v13  ;;  %v6668_v13 = vld [vmem:[%s7023_s3 + $0x78] sm:$0xff] }
 0xa52   : > { %3217 = vmatprep.subr.mxu1 %v6446_v28  ;;  %3973 = vmatprep.subr.mxu0 %v6668_v13  ;;  %v7327_v28 = vld [vmem:[#allocation12_spill] sm:$0xff] }
 0xa53   : > { %3218 = vmatpush1.msra.mxu1 %v6458_v2  ;;  %3974 = vmatpush3.msra.mxu0 %v6668_v13  ;;  %v6683_v2 = vld [vmem:[%s7023_s3 + $0x68] sm:$0xff] }
 0xa54   : > { %3219 = vmatprep.subr.mxu1 %v6470_v45  ;;  %3975 = vmatprep.subr.mxu0 %v6676_v16  ;;  %v6697_v45 = vld [vmem:[%s7023_s3 + $0x58] sm:$0xff] }
 0xa55   : > { %3220 = vmatpush1.msra.mxu1 %v6484_v5  ;;  %3976 = vmatpush3.msra.mxu0 %v6676_v16 }
 0xa56   : > { %3221 = vmatprep.subr.mxu1 %v6496_v33  ;;  %3977 = vmatprep.subr.mxu0 %v6683_v2 }
 0xa57   : > { %3222 = vmatpush1.msra.mxu1 %v6508_v55  ;;  %3978 = vmatpush3.msra.mxu0 %v6683_v2  ;;  %v7326_v55 = vld [vmem:[#allocation11_spill] sm:$0xff] }
 0xa58   : > { %3223 = vmatprep.subr.mxu1 %v6520_v39 }
 0xa59   : > { %3224 = vmatpush1.msra.mxu1 %v6534_v57  ;;  %v6760_v57 = vld [vmem:[%s7023_s3 + $0x10] sm:$0xff] }
 0xa5a   : > { %3225 = vmatprep.subr.mxu1 %v6549_v24  ;;  %v6690_v24 = vld [vmem:[%s7023_s3 + $0x60] sm:$0xff] }
 0xa5b   : > { %3226 = vmatpush1.msra.mxu1 %v6566_v27  ;;  %3979 = vmatprep.subr.mxu0 %v6690_v24  ;;  %v4409_v27 = vmov 16  }
 0xa5c   : > { %4011 = vmatprep.subr.mxu1 %v6668_v13  ;;  %3980 = vmatpush3.msra.mxu0 %v6690_v24 }
 0xa5d   : > { %3981 = vmatprep.subr.mxu0 %v6697_v45  ;;  %4134 = vset.pattern.permute.xlu1 %v4409_v27 }
 0xa5e   : > { %3982 = vmatpush3.msra.mxu0 %v6697_v45  ;;  %3108 = vperm.xlu1 %4134, %v6137_v34  }
 0xa5f   : > { %3983 = vmatprep.subr.mxu0 %v6704_v8  ;;  %4136 = vset.pattern.permute.xlu0 %v4409_v27 }
 0xa60   : > { %3984 = vmatpush3.msra.mxu0 %v6704_v8  ;;  %3112 = vperm.xlu0 %4136, %v7326_v55  }
 0xa61   : > { %3985 = vmatprep.subr.mxu0 %v6711_v61 }
 0xa62   : > { %3986 = vmatpush3.msra.mxu0 %v6711_v61  ;;  %4135 = vset.pattern.permute.xlu1 %v4410_v12 }
 0xa63   : > { %3987 = vmatprep.subr.mxu0 %v6718_v4  ;;  %3086 = vperm.xlu1 %4135, %v7326_v55  }
 0xa64   : > { %3988 = vmatpush3.msra.mxu0 %v6718_v4 }
 0xa65   : > { %3989 = vmatprep.subr.mxu0 %v6725_v62 }
 0xa66   : > { %3990 = vmatpush3.msra.mxu0 %v6725_v62 }
 0xa67   : > { %3991 = vmatprep.subr.mxu0 %v6732_v49  ;;  %3091 = vperm.xlu1 %4135, %v7327_v28  }
 0xa68   : > { %3992 = vmatpush3.msra.mxu0 %v6732_v49 }
 0xa69   : > { %3993 = vmatprep.subr.mxu0 %v6739_v29 }
 0xa6a   : > { %3994 = vmatpush3.msra.mxu0 %v6739_v29 }
 0xa6b   : > { %3995 = vmatprep.subr.mxu0 %v6746_v9 }
 0xa6c   : > { %3996 = vmatpush3.msra.mxu0 %v6746_v9 }
 0xa6d   : > { %3997 = vmatprep.subr.mxu0 %v6753_v58 }
 0xa6e   : > { %3998 = vmatpush3.msra.mxu0 %v6753_v58 }
 0xa6f   : > { %3999 = vmatprep.subr.mxu0 %v6760_v57 }
 0xa70   : > { %4000 = vmatpush3.msra.mxu0 %v6760_v57 }
 0xa71   : > { %4001 = vmatprep.subr.mxu0 %v6767_v23 }
 0xa72   : > { %4002 = vmatpush3.msra.mxu0 %v6767_v23 }
 0xa73   : > { %4003 = vmatprep.subr.mxu0 %v6773_v20 }
 0xa74   : > { %4004 = vmatpush3.msra.mxu0 %v6773_v20 }
 0xa75   : > { %3284 = vmatprep.subr.mxu0 %v6181_v18  ;;  %v7328_v18 = vmov 0  }
 0xa76   : > { %4139 = vset.pattern.permute.xlu0 %v7328_v18  ;;  %4137 = vset.pattern.permute.xlu1 %v7328_v18 }
 0xaf6   : > { %v2709_v1 = vpop.f32.mrf.mxu0  ;;  %v2798_v43 = vpop.f32.mrf.mxu1 }
 0xaf7   : > { %v3682_v5 = vmul.f32 -1.442695, %v2709_v1 }
 0xaf8   : > { %v2711_v39 = vpop.f32.mrf.mxu0  ;;  %v2800_v56 = vpop.f32.mrf.mxu1 }
 0xaf9   : > { %4306 = vpow2.f32 %v3682_v5  ;;  %v3686_v32 = vmul.f32 -1.442695, %v2800_v56 }
 0xafa   : > { %v2715_v34 = vpop.f32.mrf.mxu0  ;;  %v2804_v6 = vpop.f32.mrf.mxu1 }
 0xafb   : > { %v3683_v33 = vmul.f32 -1.442695, %v2715_v34 }
 0xafc   : > { %v2717_v15 = vpop.f32.mrf.mxu0  ;;  %v2806_v35 = vpop.f32.mrf.mxu1 }
 0xafd   : > { %4308 = vpow2.f32 %v3683_v33  ;;  %v3687_v51 = vmul.f32 -1.442695, %v2806_v35 }
 0xafe   : > { %4310 = vpow2.f32 %v3686_v32 }
 0xb05   : > { %v2721_v41 = vpop.f32.mrf.mxu0  ;;  %v2810_v44 = vpop.f32.mrf.mxu1 }
 0xb06   : > { %v4307_v3 = vpop.eup %4306  ;;  %v3684_v46 = vmul.f32 -1.442695, %v2721_v41 }
 0xb07   : > { %v2833_v53 = vadd.f32 1.0, %v4307_v3  ;;  %v2723_v19 = vpop.f32.mrf.mxu0  ;;  %v2812_v11 = vpop.f32.mrf.mxu1 }
 0xb08   : > { %4312 = vpow2.f32 %v3684_v46  ;;  %v3688_v63 = vmul.f32 -1.442695, %v2812_v11 }
 0xb09   : > { %4314 = vrcp.f32 %v2833_v53  ;;  %v2727_v47 = vpop.f32.mrf.mxu0  ;;  %v2816_v10 = vpop.f32.mrf.mxu1 }
 0xb0a   : > { %v4309_v38 = vpop.eup %4308  ;;  %v3685_v14 = vmul.f32 -1.442695, %v2727_v47  ;;  %4316 = vpow2.f32 %v3687_v51 }
 0xb0b   : > { %v2834_v60 = vadd.f32 1.0, %v4309_v38  ;;  %v2818_v37 = vpop.f32.mrf.mxu1  ;;  %v4311_v25 = vpop.eup %4310 }
 0xb0c   : > { %4318 = vpow2.f32 %v3685_v14  ;;  %v3689_v59 = vmul.f32 -1.442695, %v2818_v37  ;;  %v2869_v28 = vadd.f32 1.0, %v4311_v25  ;;  %v2729_v51 = vpop.f32.mrf.mxu0 }
 0xb0d   : > { %4320 = vrcp.f32 %v2834_v60 }
 0xb0e   : > { %4322 = vpow2.f32 %v3688_v63 }
 0xb15   : > { %v4313_v31 = vpop.eup %4312 }
 0xb16   : > { %v4315_v30 = vpop.eup %4314  ;;  %v2835_v0 = vadd.f32 1.0, %v4313_v31  ;;  %v7330_v31 = vld [vmem:[#allocation3_spill] sm:$0xff] }
 0xb17   : > { %v2845_v22 = vmul.f32 %v4315_v30, %v2711_v39  ;;  %v4317_v17 = vpop.eup %4316 }
 0xb18   : > { %4324 = vrcp.f32 %v2835_v0  ;;  %v2870_v56 = vadd.f32 1.0, %v4317_v17  ;;  %v7332_v0 = vld [vmem:[#allocation4_spill] sm:$0xff]  ;;  %v7334_v17 = vld [vmem:[#allocation14_spill] sm:$0xff] }
 0xb19   : > { %v4319_v52 = vpop.eup %4318  ;;  %v2849_v55 = vadd.f32 %v2845_v22, %v2798_v43  ;;  %4326 = vpow2.f32 %v3689_v59  ;;  %v7333_v59 = vld [vmem:[#allocation5_spill] sm:$0xff] }
 0xb1a   : > { %v4321_v1 = vpop.eup %4320  ;;  %v2836_v5 = vadd.f32 1.0, %v4319_v52 }
 0xb1b   : > { %4328 = vtanh.f32 %v2849_v55  ;;  %v2846_v34 = vmul.f32 %v4321_v1, %v2717_v15  ;;  %v4323_v32 = vpop.eup %4322  ;;  %v7335_v55 = vld [vmem:[#allocation15_spill] sm:$0xff]  ;;  %v7336_v1 = vld [vmem:[#allocation16_spill] sm:$0xff] }
 0xb1c   : > { %4330 = vrcp.f32 %v2836_v5  ;;  %v2871_v53 = vadd.f32 1.0, %v4323_v32  ;;  %v7338_v32 = vld [vmem:[#allocation18_spill] sm:$0xff] }
 0xb1d   : > { %4332 = vrcp.f32 %v2869_v28  ;;  %v2850_v33 = vadd.f32 %v2846_v34, %v2804_v6 }
 0xb1f   : > { %4334 = vtanh.f32 %v2850_v33  ;;  %v7337_v33 = vld [vmem:[#allocation17_spill] sm:$0xff] }
 0xb20   : > { %4336 = vrcp.f32 %v2870_v56 }
 0xb25   : > { %v4325_v35 = vpop.eup %4324 }
 0xb26   : > { %v2847_v39 = vmul.f32 %v4325_v35, %v2723_v19  ;;  %v4327_v41 = vpop.eup %4326  ;;  %v7339_v35 = vld [vmem:[#allocation19_spill] sm:$0xff] }
 0xb27   : > { %v2872_v11 = vadd.f32 1.0, %v4327_v41 }
 0xb28   : > { %v4329_v3 = vpop.eup %4328  ;;  %v2851_v46 = vadd.f32 %v2847_v39, %v2810_v44  ;;  %v7340_v39 = vld [vmem:[#allocation21_spill] sm:$0xff] }
 0xb29   : > { %v4331_v43 = vpop.eup %4330  ;;  %v2881_v47 = vsub.f32 %v6600_v48, %v4329_v3  ;;  %v7329_v48 = vld [vmem:[#allocation13_spill] sm:$0xff] }
 0xb2a   : > { %v4333_v38 = vpop.eup %4332  ;;  %4338 = vtanh.f32 %v2851_v46  ;;  %v2848_v15 = vmul.f32 %v4331_v43, %v2729_v51  ;;  %v7342_v46 = vld [vmem:[#allocation23_spill] sm:$0xff]  ;;  %v7345_v43 = vld [vmem:[#allocation28_spill] sm:$0xff]  ;;  %v7346_v51 = vld [vmem:[#allocation29_spill] sm:$0xff] }
 0xb2b   : > { %v2885_v14 = vmul.f32 %v4333_v38, %v2881_v47  ;;  %4340 = vrcp.f32 %v2871_v53  ;;  %v7344_v53 = vld [vmem:[#allocation26_spill] sm:$0xff]  ;;  %v7348_v38 = vld [vmem:[#allocation31_spill] sm:$0xff] }
 0xb2c   : > { %v4335_v60 = vpop.eup %4334  ;;  %v2852_v6 = vadd.f32 %v2848_v15, %v2816_v10  ;;  %v7331_v10 = vld [vmem:[#allocation2_spill] sm:$0xff] }
 0xb2d   : > { %v6791_v63 = vadd.f32 %v4329_v3, %v2885_v14  ;;  %v2882_v19 = vsub.f32 %v6608_v26, %v4335_v60  ;;  %v4337_v37 = vpop.eup %4336  ;;  %v7341_v3 = vld [vmem:[#allocation22_spill] sm:$0xff]  ;;  %v7350_v14 = vld [vmem:[#allocation36_spill] sm:$0xff] }
 0xb2e   : > { %4342 = vtanh.f32 %v2852_v6  ;;  %v7347_v47 = vld [vmem:[#allocation30_spill] sm:$0xff]  ;;  %v7352_v6 = vld [vmem:[#allocation39_spill] sm:$0xff] }
 0xb2f   : > { %4005 = vmatprep.mubr.f32.mxu0 %v6791_v63  ;;  %v2886_v44 = vmul.f32 %v4337_v37, %v2882_v19  ;;  %4344 = vrcp.f32 %v2872_v11  ;;  %v7349_v15 = vld [vmem:[#allocation34_spill] sm:$0xff]  ;;  %v7353_v11 = vld [vmem:[#allocation37_spill] sm:$0xff]  ;;  %v7354_v19 = vld [vmem:[#allocation40_spill] sm:$0xff] }
 0xb30   : > { %v7355_v37 = vld [vmem:[#allocation41_spill] sm:$0xff] }
 0xb31   : > { %v6795_v25 = vadd.f32 %v4335_v60, %v2886_v44  ;;  %v7351_v60 = vld [vmem:[#allocation38_spill] sm:$0xff] }
 0xb32   : > { %v7356_v44 = vld [vmem:[#allocation42_spill] sm:$0xff] }
 0xb33   : > { %4006 = vmatmul.mubr.f32.vlgmr.msra.gmra.mxu0 %v6795_v25 }
 0xb34   : > { %3285 = vmatpush1.msra.mxu0 %v7329_v48  ;;  %v7357_v48 = vld [vmem:[#allocation44_spill] sm:$0xff] }
 0xb35   : > { %3286 = vmatprep.subr.mxu0 %v7330_v31  ;;  %v7358_v31 = vld [vmem:[#allocation45_spill] sm:$0xff] }
 0xb36   : > { %3287 = vmatpush1.msra.mxu0 %v7331_v10  ;;  %v7359_v10 = vld [vmem:[#allocation47_spill] sm:$0xff] }
 0xb37   : > { %v4339_v30 = vpop.eup %4338  ;;  %3288 = vmatprep.subr.mxu0 %v7332_v0  ;;  %v7360_v0 = vld [vmem:[#allocation27_spill] sm:$0xff] }
 0xb38   : > { %v2883_v26 = vsub.f32 %v6631_v21, %v4339_v30  ;;  %3289 = vmatpush1.msra.mxu0 %v7333_v59  ;;  %v4341_v22 = vpop.eup %4340 }
 0xb39   : > { %3290 = vmatprep.subr.mxu0 %v7334_v17 }
 0xb3a   : > { %v2887_v52 = vmul.f32 %v4341_v22, %v2883_v26  ;;  %3291 = vmatpush1.msra.mxu0 %v7335_v55  ;;  %v7361_v22 = vld [vmem:[#allocation32_spill] sm:$0xff] }
 0xb3b   : > { %v4343_v28 = vpop.eup %4342  ;;  %3292 = vmatprep.subr.mxu0 %v7336_v1 }
 0xb3c   : > { %v6807_v5 = vadd.f32 %v4339_v30, %v2887_v52  ;;  %v2884_v34 = vsub.f32 %v6640_v42, %v4343_v28  ;;  %3293 = vmatpush1.msra.mxu0 %v7337_v33  ;;  %v4345_v56 = vpop.eup %4344  ;;  %v7343_v42 = vld [vmem:[#allocation24_spill] sm:$0xff]  ;;  %v7362_v52 = vmov 1   ;;  %v7364_v33 = vld [vmem:[#allocation46_spill] sm:$0xff] }
 0xb3d   : > { %3294 = vmatprep.subr.mxu0 %v7338_v32  ;;  %v4387_v32 = vld [vmem:[%s4471_s29 + $0x28] sm:$0xff]  ;;  %s4412_s29 = smov 4  }
 0xb3e   : > { %4008 = vmatprep.mubr.f32.mxu0 %v6807_v5  ;;  %v2888_v21 = vmul.f32 %v4345_v56, %v2884_v34  ;;  %3295 = vmatpush1.msra.mxu0 %v7339_v35  ;;  %v7367_v35 = vld [vmem:[#allocation33_spill] sm:$0xff] }
 0xb3f   : > { %3296 = vmatprep.subr.mxu0 %v7340_v39 }
 0xb40   : > { %v6815_v41 = vadd.f32 %v4343_v28, %v2888_v21  ;;  %3297 = vmatpush1.msra.mxu0 %v7341_v3  ;;  %v7363_v28 = vld [vmem:[#allocation43_spill] sm:$0xff]  ;;  %v7366_v21 = vld [vmem:[#allocation6_spill] sm:$0xff]  ;;  %v7368_v3 = vld [vmem:[#allocation25_spill] sm:$0xff] }
 0xb41   : > { %3298 = vmatprep.subr.mxu0 %v7342_v46  ;;  %v1344_v39 = vadd.f32 %v7367_v35, %v7366_v21  ;;  %v1342_v46 = vadd.f32 %v7368_v3, %v7366_v21 }
 0xb42   : > { %4009 = vmatmul.mubr.f32.gmra.mxu0 %v6815_v41 }
 0xb43   : > { %3299 = vmatpush1.msra.mxu0 %v7343_v42  ;;  %3348 = vmatprep.mubr.f32.mxu0 %v7174_v7  ;;  %v7369_v42 = vld [vmem:[#allocation8_spill] sm:$0xff] }
 0xb44   : > { %3300 = vmatprep.subr.mxu0 %v7344_v53  ;;  %v1894_v53 = vadd.f32 %v7369_v42, %v7366_v21 }
 0xb45   : > { %3301 = vmatpush1.msra.mxu0 %v7345_v43 }
 0xb46   : > { %3302 = vmatprep.subr.mxu0 %v7346_v51 }
 0xb47   : > { %3303 = vmatpush1.msra.mxu0 %v7347_v47  ;;  %v7372_v47 = vld [vmem:[#allocation35_spill] sm:$0xff] }
 0xb48   : > { %3304 = vmatprep.subr.mxu0 %v7348_v38  ;;  %v1345_v38 = vadd.f32 %v7372_v47, %v7366_v21 }
 0xb49   : > { %3305 = vmatpush1.msra.mxu0 %v7349_v15  ;;  %v2446_v15 = vadd.f32 %v7361_v22, %v7366_v21 }
 0xb4a   : > { %3306 = vmatprep.subr.mxu0 %v7350_v14  ;;  %v7373_v14 = vld [vmem:[#allocation7_spill] sm:$0xff] }
 0xb4b   : > { %3307 = vmatpush1.msra.mxu0 %v7351_v60  ;;  %v1895_v60 = vadd.f32 %v7373_v14, %v7366_v21 }
 0xb4c   : > { %3308 = vmatprep.subr.mxu0 %v7352_v6  ;;  %v2448_v6 = vadd.f32 %v7364_v33, %v7366_v21 }
 0xb4d   : > { %3309 = vmatpush1.msra.mxu0 %v7353_v11  ;;  %v7374_v11 = vld [vmem:[#allocation9_spill] sm:$0xff] }
 0xb4e   : > { %3310 = vmatprep.subr.mxu0 %v7354_v19  ;;  %v1897_v19 = vadd.f32 %v7374_v11, %v7366_v21 }
 0xb4f   : > { %3311 = vmatpush1.msra.mxu0 %v7355_v37 }
 0xb50   : > { %3312 = vmatprep.subr.mxu0 %v7356_v44  ;;  %v2447_v44 = vadd.f32 %v7360_v0, %v7366_v21 }
 0xb51   : > { %3313 = vmatpush1.msra.mxu0 %v7357_v48 }
 0xb52   : > { %3314 = vmatprep.subr.mxu0 %v7358_v31  ;;  %v2449_v31 = vadd.f32 %v7363_v28, %v7366_v21 }
 0xb53   : > { %3315 = vmatpush1.msra.mxu0 %v7359_v10 }
 0xbf3   : > { %v4007_v30 = vpop.f32.mrf.mxu0 }
 0xbf4   : > { %v6839_v26 = vadd.f32 %v4007_v30, %v7360_v0  ;;  %v3082_v0 = vpop.permute.xlu0 %3081 }
 0xbf5   : > { %v2975_v59 = vpop.f32.mrf.mxu0 }
 0xbf6   : > { %v6842_v17 = vadd.f32 %v2975_v59, %v7361_v22  ;;  %3030 = vperm.xlu1 %4137, %v6839_v26   ;;  %v2999_v10 = vadd.f32 %v6839_v26, %v7366_v21  ;;  %v3109_v59 = vpop.permute.xlu1 %3108 }
 0xbf8   : > { %3025 = vperm.xlu0 %4139, %v6842_v17   ;;  %v2998_v37 = vadd.f32 %v6842_v17, %v7366_v21 }
 0xbfa   : > { %4138 = vset.pattern.permute.xlu1 %v7362_v52  ;;  %v3087_v22 = vpop.permute.xlu1 %3086 }
 0xbfb   : > { %3056 = vperm.xlu1 %4138, %v6839_v26  }
 0xbff   : > { %3052 = vperm.xlu1 %4138, %v6842_v17  }
 0xc02   : > { %v4010_v55 = vpop.f32.mrf.mxu0 }
 0xc03   : > { %v6850_v1 = vadd.f32 %v4010_v55, %v7363_v28  ;;  %4140 = vset.pattern.permute.xlu1 %v7328_v18  ;;  %v7365_v18 = vld [vmem:[#allocation48_spill] sm:$0xff]  ;;  %v3113_v55 = vpop.permute.xlu0 %3112 }
 0xc04   : > { %v2985_v34 = vpop.f32.mrf.mxu0 }
 0xc05   : > { %v6854_v56 = vadd.f32 %v2985_v34, %v7364_v33  ;;  %3040 = vperm.xlu1 %4140, %v6850_v1   ;;  %v3001_v30 = vadd.f32 %v6850_v1, %v7366_v21 }
 0xc07   : > { %3035 = vperm.xlu0 %4139, %v6854_v56   ;;  %v3000_v48 = vadd.f32 %v6854_v56, %v7366_v21 }
 0xc09   : > { %4142 = vset.pattern.permute.xlu1 %v7362_v52 }
 0xc0a   : > { %3060 = vperm.xlu1 %4142, %v6854_v56  }
 0xc0b   : > { %4141 = vset.pattern.permute.xlu0 %v7362_v52  ;;  %v3092_v52 = vpop.permute.xlu1 %3091 }
 0xc0c   : > { %3064 = vperm.xlu0 %4141, %v6850_v1  }
 0xc0e   : > { %4143 = vset.pattern.permute.xlu1 %v4409_v27 }
 0xc0f   : > { %3116 = vperm.xlu1 %4143, %v4387_v32  }
 0xc10   : > { %4145 = vset.pattern.permute.xlu0 %v4409_v27  ;;  %v7370_v27 = vld [vmem:[#allocation20_spill] sm:$0xff] }
 0xc11   : > { %3120 = vperm.xlu0 %4145, %v7365_v18   ;;  %v1343_v43 = vadd.f32 %v7370_v27, %v7366_v21 }
 0xc13   : > { %4144 = vset.pattern.permute.xlu1 %v4410_v12  ;;  %v7371_v12 = vld [vmem:[#allocation10_spill] sm:$0xff] }
 0xc14   : > { %3096 = vperm.xlu1 %4144, %v7365_v18   ;;  %v1896_v51 = vadd.f32 %v7371_v12, %v7366_v21  ;;  %v3123_v12 = vmul.f32 %v7197_v54, %v3109_v59 }
 0xc15   : > { %1354 = vrot.lane.b32.xlu0 %v1344_v39, %s4411_s11 }
 0xc18   : > { %1350 = vrot.lane.b32.xlu1 %v1342_v46, %s4411_s11 }
 0xc19   : > { %1902 = vrot.lane.b32.xlu0 %v1894_v53, %s4412_s29  ;;  %v3099_v53 = vmul.f32 %v7196_v40, %v3082_v0 }
 0xc1c   : > { %1352 = vrot.lane.b32.xlu1 %v1343_v43, %s4411_s11 }
 0xc1d   : > { %1906 = vrot.lane.b32.xlu0 %v1896_v51, %s4412_s29  ;;  %v3100_v51 = vmul.f32 %v7196_v40, %v3087_v22 }
 0xc20   : > { %1356 = vrot.lane.b32.xlu1 %v1345_v38, %s4411_s11 }
 0xc21   : > { %2454 = vrot.lane.b32.xlu0 %v2446_v15, %s4413_s12  ;;  %v3124_v15 = vmul.f32 %v7197_v54, %v3113_v55 }
 0xc24   : > { %1904 = vrot.lane.b32.xlu1 %v1895_v60, %s4412_s29 }
 0xc25   : > { %2458 = vrot.lane.b32.xlu0 %v2448_v6, %s4413_s12 }
 0xc28   : > { %1908 = vrot.lane.b32.xlu1 %v1897_v19, %s4412_s29 }
 0xc29   : > { %3006 = vrot.lane.b32.xlu0 %v2998_v37, %s4414_s19 }
 0xc2c   : > { %2456 = vrot.lane.b32.xlu1 %v2447_v44, %s4413_s12 }
 0xc2d   : > { %3010 = vrot.lane.b32.xlu0 %v3000_v48, %s4414_s19  ;;  %v3101_v48 = vmul.f32 %v7196_v40, %v3092_v52 }
 0xc30   : > { %2460 = vrot.lane.b32.xlu1 %v2449_v31, %s4413_s12 }
 0xc34   : > { %3008 = vrot.lane.b32.xlu1 %v2999_v10, %s4414_s19 }
 0xc38   : > { %3012 = vrot.lane.b32.xlu1 %v3001_v30, %s4414_s19 }
 0xc71   : > { %v3031_v34 = vpop.permute.xlu1 %3030 }
 0xc72   : > { %v3044_v18 = vmul.f32 %v5250_v50, %v3031_v34 }
 0xc73   : > { %v3026_v33 = vpop.permute.xlu0 %3025 }
 0xc74   : > { %v3043_v28 = vmul.f32 %v5250_v50, %v3026_v33  ;;  %v3048_v3 = vadd.f32 %v3044_v18, %v6795_v25 }
 0xc76   : > { %v3057_v32 = vpop.permute.xlu1 %3056  ;;  %v3047_v46 = vadd.f32 %v3043_v28, %v6791_v63 }
 0xc77   : > { %v3068_v35 = vmul.f32 %v5255_v36, %v3057_v32 }
 0xc79   : > { %v3072_v27 = vadd.f32 %v3068_v35, %v3048_v3 }
 0xc7a   : > { %v3053_v39 = vpop.permute.xlu1 %3052 }
 0xc7b   : > { %v3067_v42 = vmul.f32 %v5255_v36, %v3053_v39  ;;  %v3104_v14 = vadd.f32 %v3100_v51, %v3072_v27 }
 0xc7d   : > { %v3071_v43 = vadd.f32 %v3067_v42, %v3047_v46  ;;  %v6918_v19 = vadd.f32 %v3124_v15, %v3104_v14 }
 0xc7f   : > { %v3103_v47 = vadd.f32 %v3099_v53, %v3071_v43 }
 0xc80   : > { %v3041_v38 = vpop.permute.xlu1 %3040 }
 0xc81   : > { %v6910_v60 = vadd.f32 %v3123_v12, %v3103_v47 }
 0xc82   : > { %v3036_v25 = vpop.permute.xlu0 %3035 }
 0xc83   : > { %v3045_v63 = vmul.f32 %v5250_v50, %v3036_v25  ;;  %3260 = vmatmul.mubr.f32.vlgmr.msra.gmra.mxu1 %v6910_v60  ;;  %3349 = vmatmul.mubr.f32.vlgmr.msra.gmra.mxu0 %v6910_v60 }
 0xc84   : > { %3265 = vmatprep.mubr.f32.mxu1 %v7174_v7  ;;  %3354 = vmatprep.mubr.f32.mxu0 %v7174_v7 }
 0xc85   : > { %v3049_v6 = vadd.f32 %v3045_v63, %v6807_v5  ;;  %v3061_v11 = vpop.permute.xlu1 %3060  ;;  %4012 = vmatpush3.msra.mxu1 %v6668_v13  ;;  %v3046_v13 = vmul.f32 %v5250_v50, %v3041_v38 }
 0xc86   : > { %v3069_v37 = vmul.f32 %v5255_v36, %v3061_v11  ;;  %4013 = vmatprep.subr.mxu1 %v6676_v16 }
 0xc87   : > { %v3065_v44 = vpop.permute.xlu0 %3064  ;;  %3266 = vmatmul.mubr.f32.gmra.mxu1 %v6918_v19  ;;  %3355 = vmatmul.mubr.f32.gmra.mxu0 %v6918_v19 }
 0xc88   : > { %v3073_v31 = vadd.f32 %v3069_v37, %v3049_v6  ;;  %3271 = vmatprep.mubr.f32.mxu1 %v7174_v7  ;;  %3360 = vmatprep.mubr.f32.mxu0 %v7174_v7  ;;  %v3070_v59 = vmul.f32 %v5255_v36, %v3065_v44 }
 0xc89   : > { %4014 = vmatpush3.msra.mxu1 %v6676_v16  ;;  %v3050_v16 = vadd.f32 %v3046_v13, %v6815_v41 }
 0xc8a   : > { %v3105_v5 = vadd.f32 %v3101_v48, %v3073_v31  ;;  %v3117_v10 = vpop.permute.xlu1 %3116  ;;  %4015 = vmatprep.subr.mxu1 %v6683_v2 }
 0xc8b   : > { %v3125_v30 = vmul.f32 %v7197_v54, %v3117_v10  ;;  %4016 = vmatpush3.msra.mxu1 %v6683_v2  ;;  %v3074_v2 = vadd.f32 %v3070_v59, %v3050_v16 }
 0xc8c   : > { %v3121_v22 = vpop.permute.xlu0 %3120  ;;  %4017 = vmatprep.subr.mxu1 %v6690_v24 }
 0xc8d   : > { %v6935_v0 = vadd.f32 %v3125_v30, %v3105_v5  ;;  %4018 = vmatpush3.msra.mxu1 %v6690_v24  ;;  %v3126_v36 = vmul.f32 %v7197_v54, %v3121_v22 }
 0xc8e   : > { %4019 = vmatprep.subr.mxu1 %v6697_v45 }
 0xc8f   : > { %3272 = vmatmul.mubr.f32.gmra.mxu1 %v6935_v0  ;;  %3361 = vmatmul.mubr.f32.gmra.mxu0 %v6935_v0  ;;  %v3097_v50 = vpop.permute.xlu1 %3096 }
 0xc90   : > { %v3102_v52 = vmul.f32 %v7196_v40, %v3097_v50  ;;  %v1355_v55 = vpop.permute.xlu0 %1354  ;;  %3277 = vmatprep.mubr.f32.mxu1 %v7174_v7  ;;  %3366 = vmatprep.mubr.f32.mxu0 %v7174_v7 }
 0xc91   : > { %4020 = vmatpush3.msra.mxu1 %v6697_v45  ;;  %1365 = vst.msk [vmem:[%s5209_s13 + $0x10] sm:$0xff] %vm1362_vm7, %v1355_v55 }
 0xc92   : > { %v3106_v24 = vadd.f32 %v3102_v52, %v3074_v2  ;;  %4021 = vmatprep.subr.mxu1 %v6704_v8 }
 0xc93   : > { %v1351_v41 = vpop.permute.xlu1 %1350  ;;  %4022 = vmatpush3.msra.mxu1 %v6704_v8 }
 0xc94   : > { %1363 = vst.msk [vmem:[%s5209_s13] sm:$0xff] %vm1362_vm7, %v1351_v41  ;;  %v1903_v54 = vpop.permute.xlu0 %1902  ;;  %v6951_v40 = vadd.f32 %v3126_v36, %v3106_v24  ;;  %4023 = vmatprep.subr.mxu1 %v6711_v61 }
 0xc95   : > { %4024 = vmatpush3.msra.mxu1 %v6711_v61  ;;  %1915 = vst.msk [vmem:[%s5209_s13] sm:$0xff] %vm1914_vm8, %v1903_v54 }
 0xc96   : > { %3278 = vmatmul.mubr.f32.gmra.mxu1 %v6951_v40  ;;  %3367 = vmatmul.mubr.f32.gmra.mxu0 %v6951_v40 }
 0xc97   : > { %v1353_v7 = vpop.permute.xlu1 %1352  ;;  %4025 = vmatprep.subr.mxu1 %v6718_v4 }
 0xc98   : > { %1364 = vst.msk [vmem:[%s5209_s13 + $0x8] sm:$0xff] %vm1362_vm7, %v1353_v7  ;;  %v1907_v45 = vpop.permute.xlu0 %1906  ;;  %4026 = vmatpush3.msra.mxu1 %v6718_v4 }
 0xc99   : > { %4027 = vmatprep.subr.mxu1 %v6725_v62  ;;  %1917 = vst.msk [vmem:[%s5209_s13 + $0x10] sm:$0xff] %vm1914_vm8, %v1907_v45 }
 0xc9a   : > { %4028 = vmatpush3.msra.mxu1 %v6725_v62 }
 0xc9b   : > { %v1357_v8 = vpop.permute.xlu1 %1356  ;;  %4029 = vmatprep.subr.mxu1 %v6732_v49 }
 0xc9c   : > { %1366 = vst.msk [vmem:[%s5209_s13 + $0x18] sm:$0xff] %vm1362_vm7, %v1357_v8  ;;  %4030 = vmatpush3.msra.mxu1 %v6732_v49  ;;  %v2455_v61 = vpop.permute.xlu0 %2454 }
 0xc9d   : > { %4031 = vmatprep.subr.mxu1 %v6739_v29  ;;  %2467 = vst.msk [vmem:[%s5209_s13] sm:$0xff] %vm2466_vm9, %v2455_v61 }
 0xc9e   : > { %4032 = vmatpush3.msra.mxu1 %v6739_v29 }
 0xc9f   : > { %v1905_v4 = vpop.permute.xlu1 %1904  ;;  %4033 = vmatprep.subr.mxu1 %v6746_v9 }
 0xca0   : > { %1916 = vst.msk [vmem:[%s5209_s13 + $0x8] sm:$0xff] %vm1914_vm8, %v1905_v4  ;;  %4034 = vmatpush3.msra.mxu1 %v6746_v9  ;;  %v2459_v49 = vpop.permute.xlu0 %2458 }
 0xca1   : > { %4035 = vmatprep.subr.mxu1 %v6753_v58  ;;  %2469 = vst.msk [vmem:[%s5209_s13 + $0x10] sm:$0xff] %vm2466_vm9, %v2459_v49 }
 0xca2   : > { %4036 = vmatpush3.msra.mxu1 %v6753_v58 }
 0xca3   : > { %v1909_v62 = vpop.permute.xlu1 %1908  ;;  %4037 = vmatprep.subr.mxu1 %v6760_v57 }
 0xca4   : > { %1918 = vst.msk [vmem:[%s5209_s13 + $0x18] sm:$0xff] %vm1914_vm8, %v1909_v62  ;;  %4038 = vmatpush3.msra.mxu1 %v6760_v57  ;;  %v3007_v9 = vpop.permute.xlu0 %3006 }
 0xca5   : > { %4039 = vmatprep.subr.mxu1 %v6767_v23  ;;  %3019 = vst.msk [vmem:[%s5209_s13] sm:$0xff] %vm3018_vm10, %v3007_v9 }
 0xca6   : > { %4040 = vmatpush3.msra.mxu1 %v6767_v23 }
 0xca7   : > { %v2457_v29 = vpop.permute.xlu1 %2456  ;;  %4041 = vmatprep.subr.mxu1 %v6773_v20 }
 0xca8   : > { %2468 = vst.msk [vmem:[%s5209_s13 + $0x8] sm:$0xff] %vm2466_vm9, %v2457_v29  ;;  %4042 = vmatpush3.msra.mxu1 %v6773_v20  ;;  %v3011_v34 = vpop.permute.xlu0 %3010 }
 0xca9   : > { %3021 = vst.msk [vmem:[%s5209_s13 + $0x10] sm:$0xff] %vm3018_vm10, %v3011_v34 }
 0xcab   : > { %v2461_v58 = vpop.permute.xlu1 %2460 }
 0xcac   : > { %2470 = vst.msk [vmem:[%s5209_s13 + $0x18] sm:$0xff] %vm2466_vm9, %v2461_v58 }
 0xcaf   : > { %v3009_v57 = vpop.permute.xlu1 %3008 }
 0xcb0   : > { %3020 = vst.msk [vmem:[%s5209_s13 + $0x8] sm:$0xff] %vm3018_vm10, %v3009_v57 }
 0xcb3   : > { %v3013_v23 = vpop.permute.xlu1 %3012 }
 0xcb4   : > { %3022 = vst.msk [vmem:[%s5209_s13 + $0x18] sm:$0xff] %vm3018_vm10, %v3013_v23 }
 0xd43   : > { %v3261_v33 = vpop.f32.mrf.mxu1  ;;  %v3350_v18 = vpop.f32.mrf.mxu0 }
 0xd44   : > { %v3690_v32 = vmul.f32 -1.442695, %v3261_v33 }
 0xd45   : > { %v3263_v28 = vpop.f32.mrf.mxu1  ;;  %v3352_v39 = vpop.f32.mrf.mxu0 }
 0xd46   : > { %4346 = vpow2.f32 %v3690_v32  ;;  %v3694_v27 = vmul.f32 -1.442695, %v3352_v39 }
 0xd47   : > { %v3267_v20 = vpop.f32.mrf.mxu1  ;;  %v3356_v3 = vpop.f32.mrf.mxu0 }
 0xd48   : > { %v3691_v35 = vmul.f32 -1.442695, %v3267_v20 }
 0xd49   : > { %v3269_v46 = vpop.f32.mrf.mxu1  ;;  %v3358_v43 = vpop.f32.mrf.mxu0 }
 0xd4a   : > { %4348 = vpow2.f32 %v3691_v35  ;;  %v3695_v47 = vmul.f32 -1.442695, %v3358_v43 }
 0xd4f   : > { %v3273_v42 = vpop.f32.mrf.mxu1  ;;  %v3362_v15 = vpop.f32.mrf.mxu0 }
 0xd50   : > { %v3692_v53 = vmul.f32 -1.442695, %v3273_v42 }
 0xd51   : > { %v3275_v38 = vpop.f32.mrf.mxu1  ;;  %v3364_v11 = vpop.f32.mrf.mxu0 }
 0xd52   : > { %4350 = vpow2.f32 %v3692_v53  ;;  %v3696_v44 = vmul.f32 -1.442695, %v3364_v11 }
 0xd53   : > { %v4347_v12 = vpop.eup %4346  ;;  %4352 = vpow2.f32 %v3694_v27 }
 0xd54   : > { %v3385_v51 = vadd.f32 1.0, %v4347_v12 }
 0xd56   : > { %4354 = vrcp.f32 %v3385_v51  ;;  %v3279_v14 = vpop.f32.mrf.mxu1  ;;  %v3368_v37 = vpop.f32.mrf.mxu0 }
 0xd57   : > { %v4349_v25 = vpop.eup %4348  ;;  %v3693_v63 = vmul.f32 -1.442695, %v3279_v14  ;;  %4356 = vpow2.f32 %v3695_v47 }
 0xd58   : > { %v3386_v6 = vadd.f32 1.0, %v4349_v25  ;;  %v3370_v13 = vpop.f32.mrf.mxu0  ;;  %v3281_v29 = vpop.f32.mrf.mxu1 }
 0xd59   : > { %4358 = vpow2.f32 %v3693_v63  ;;  %v3697_v30 = vmul.f32 -1.442695, %v3370_v13 }
 0xd5a   : > { %4360 = vrcp.f32 %v3386_v6 }
 0xd5b   : > { %4362 = vpow2.f32 %v3696_v44 }
 0xd5f   : > { %v4351_v48 = vpop.eup %4350 }
 0xd60   : > { %v3387_v31 = vadd.f32 1.0, %v4351_v48  ;;  %v4353_v5 = vpop.eup %4352 }
 0xd61   : > { %v3421_v2 = vadd.f32 1.0, %v4353_v5 }
 0xd62   : > { %4364 = vrcp.f32 %v3387_v31 }
 0xd63   : > { %v4355_v10 = vpop.eup %4354  ;;  %4366 = vpow2.f32 %v3697_v30 }
 0xd64   : > { %v3397_v59 = vmul.f32 %v4355_v10, %v3263_v28  ;;  %v4357_v22 = vpop.eup %4356 }
 0xd65   : > { %v3422_v41 = vadd.f32 1.0, %v4357_v22 }
 0xd66   : > { %v4359_v16 = vpop.eup %4358  ;;  %v3401_v50 = vadd.f32 %v3397_v59, %v3350_v18 }
 0xd67   : > { %v4361_v36 = vpop.eup %4360  ;;  %v3388_v52 = vadd.f32 1.0, %v4359_v16 }
 0xd68   : > { %4368 = vtanh.f32 %v3401_v50  ;;  %v3398_v55 = vmul.f32 %v4361_v36, %v3269_v46  ;;  %v4363_v54 = vpop.eup %4362 }
 0xd69   : > { %4370 = vrcp.f32 %v3388_v52  ;;  %v3423_v61 = vadd.f32 1.0, %v4363_v54 }
 0xd6a   : > { %4372 = vrcp.f32 %v3421_v2  ;;  %v3402_v24 = vadd.f32 %v3398_v55, %v3356_v3 }
 0xd6c   : > { %4374 = vtanh.f32 %v3402_v24 }
 0xd6d   : > { %4376 = vrcp.f32 %v3422_v41 }
 0xd6f   : > { %v4365_v7 = vpop.eup %4364 }
 0xd70   : > { %v3399_v45 = vmul.f32 %v4365_v7, %v3275_v38  ;;  %v4367_v4 = vpop.eup %4366 }
 0xd71   : > { %v3424_v32 = vadd.f32 1.0, %v4367_v4 }
 0xd72   : > { %v3403_v8 = vadd.f32 %v3399_v45, %v3362_v15 }
 0xd74   : > { %4378 = vtanh.f32 %v3403_v8 }
 0xd75   : > { %v4369_v62 = vpop.eup %4368  ;;  %4380 = vrcp.f32 %v3423_v61 }
 0xd76   : > { %v4371_v49 = vpop.eup %4370  ;;  %v3433_v9 = vsub.f32 %v6910_v60, %v4369_v62 }
 0xd77   : > { %v4373_v58 = vpop.eup %4372  ;;  %v3400_v57 = vmul.f32 %v4371_v49, %v3281_v29 }
 0xd78   : > { %v3437_v34 = vmul.f32 %v4373_v58, %v3433_v9 }
 0xd79   : > { %v4375_v23 = vpop.eup %4374  ;;  %v3404_v33 = vadd.f32 %v3400_v57, %v3368_v37 }
 0xd7a   : > { %v3441_v18 = vadd.f32 %v4369_v62, %v3437_v34  ;;  %v3434_v28 = vsub.f32 %v6918_v19, %v4375_v23  ;;  %v4377_v20 = vpop.eup %4376 }
 0xd7b   : > { %4382 = vtanh.f32 %v3404_v33 }
 0xd7c   : > { %4043 = vmatprep.mubr.f32.mxu1 %v3441_v18  ;;  %v3438_v35 = vmul.f32 %v4377_v20, %v3434_v28  ;;  %4384 = vrcp.f32 %v3424_v32 }
 0xd7e   : > { %v3442_v39 = vadd.f32 %v4375_v23, %v3438_v35 }
 0xd80   : > { %4044 = vmatmul.mubr.f32.vlgmr.msra.gmra.mxu1 %v3442_v39 }
 0xd81   : > { %v4379_v3 = vpop.eup %4378 }
 0xd82   : > { %v3435_v46 = vsub.f32 %v6935_v0, %v4379_v3  ;;  %v4381_v60 = vpop.eup %4380 }
 0xd84   : > { %v3439_v42 = vmul.f32 %v4381_v60, %v3435_v46 }
 0xd86   : > { %v3443_v53 = vadd.f32 %v4379_v3, %v3439_v42 }
 0xd88   : > { %v4383_v27 = vpop.eup %4382  ;;  %4046 = vmatprep.mubr.f32.mxu1 %v3443_v53 }
 0xd89   : > { %v3436_v43 = vsub.f32 %v6951_v40, %v4383_v27  ;;  %v4385_v12 = vpop.eup %4384 }
 0xd8b   : > { %v3440_v51 = vmul.f32 %v4385_v12, %v3436_v43 }
 0xd8d   : > { %v3444_v19 = vadd.f32 %v4383_v27, %v3440_v51 }
 0xd8f   : > { %4047 = vmatmul.mubr.f32.gmra.mxu1 %v3444_v19 }
 0xe40   : > { %v4045_v47 = vpop.f32.mrf.mxu1 }
 0xe41   : > { %v3547_v38 = vadd.f32 %v4045_v47, %v6839_v26 }
 0xe42   : > { %v3527_v15 = vpop.f32.mrf.mxu1 }
 0xe43   : > { %v3551_v14 = vadd.f32 %v3547_v38, %v7366_v21  ;;  %v3546_v25 = vadd.f32 %v3527_v15, %v6842_v17 }
 0xe45   : > { %v3550_v0 = vadd.f32 %v3546_v25, %v7366_v21  ;;  %3560 = vrot.lane.b32.xlu1 %v3551_v14, %s4415_s14 }
 0xe47   : > { %3558 = vrot.lane.b32.xlu0 %v3550_v0, %s4415_s14 }
 0xe4f   : > { %v4048_v40 = vpop.f32.mrf.mxu1 }
 0xe50   : > { %v3549_v63 = vadd.f32 %v4048_v40, %v6850_v1 }
 0xe51   : > { %v3537_v6 = vpop.f32.mrf.mxu1 }
 0xe52   : > { %v3553_v26 = vadd.f32 %v3549_v63, %v7366_v21  ;;  %v3548_v11 = vadd.f32 %v3537_v6, %v6854_v56 }
 0xe54   : > { %v3552_v37 = vadd.f32 %v3548_v11, %v7366_v21  ;;  %3564 = vrot.lane.b32.xlu1 %v3553_v26, %s4415_s14 }
 0xe56   : > { %3562 = vrot.lane.b32.xlu0 %v3552_v37, %s4415_s14 }
 0xeb7   : > { %v3561_v44 = vpop.permute.xlu1 %3560 }
 0xeb8   : > { %3572 = vst.msk [vmem:[%s5209_s13 + $0x8] sm:$0xff] %vm3570_vm11, %v3561_v44 }
 0xeb9   : > { %v3559_v17 = vpop.permute.xlu0 %3558 }
 0xeba   : > { %3571 = vst.msk [vmem:[%s5209_s13] sm:$0xff] %vm3570_vm11, %v3559_v17 }
 0xec6   : > { %v3565_v31 = vpop.permute.xlu1 %3564 }
 0xec7   : > { %3574 = vst.msk [vmem:[%s5209_s13 + $0x18] sm:$0xff] %vm3570_vm11, %v3565_v31 }
 0xec8   : > { %v3563_v48 = vpop.permute.xlu0 %3562 }
 0xec9   : > { %3573 = vst.msk [vmem:[%s5209_s13 + $0x10] sm:$0xff] %vm3570_vm11, %v3563_v48 }
 0xeca PF: > { %s14_s15 = sadd.s32 1, %s4394_s15  }
 0xecb   : > { %p11_p4 = scmp.ge.s32.totalorder %s14_s15, 4  }
 0xecd   :  { %13 = sbr.rel (!%p11_p4) target bundleno = 1 (0x1), region = 66 }

</bundles_post_ra>
